<compile_context>
chip_gen: v5e
topology: v5e:2x2
jax: 0.10.0
libtpu: 0.0.40
codegen_flags: <defaults>
</compile_context>

<pallas_src>
import functools
import math

import jax
import jax.numpy as jnp
from jax.experimental import pallas as pl
from jax.experimental.pallas import tpu as pltpu


_MATMUL_DTYPE = jnp.bfloat16          # MXU-native on v5e / v6e / v7x
_VMEM_LIMIT = 64 * 1024 * 1024        # explicit scoped-VMEM budget (bytes)


# ----------------------------------------------------------------------------
# Shared in-kernel math
# ----------------------------------------------------------------------------

def _torch_layernorm(x, gamma, beta, eps):
    """torch-style LN: (x - mean) / (std_unbiased + eps) * gamma + beta.

    Matches the reference LayerNorm module: x.std() is Bessel-corrected and
    eps is added to the std (not the variance). Divide goes to the EUP via
    pl.reciprocal(approx=True).
    """
    d = x.shape[-1]
    mean = jnp.mean(x, axis=-1, keepdims=True)
    diff = x - mean
    var = jnp.sum(diff * diff, axis=-1, keepdims=True) / (d - 1)  # unbiased
    inv = pl.reciprocal(jnp.sqrt(var) + eps, approx=True)
    return gamma * (diff * inv) + beta


# ----------------------------------------------------------------------------
# Kernels
# ----------------------------------------------------------------------------

def _linear_kernel(x_ref, w_ref, b_ref, o_ref):
    """y = x @ W + b.   x:(tm,K) f32, W:(K,N) bf16, b:(1,N) f32 -> y:(tm,N)."""
    x = x_ref[...].astype(_MATMUL_DTYPE)
    y = jnp.dot(x, w_ref[...], preferred_element_type=jnp.float32)
    y = y + b_ref[...].astype(jnp.float32)
    o_ref[...] = y.astype(o_ref.dtype)


def _attn_block_kernel(h_ref, wqkv_ref, bqkv_ref, wo_ref, bo_ref,
                       ln_g_ref, ln_b_ref, o_ref,
                       *, n_heads, inv_scale, eps):
    """Fused: QKV proj -> head-batched attention -> out proj -> +res -> LN.

    Block shapes: h (1, S, hid); wqkv (hid, 3*hid) bf16; wo (hid, hid) bf16;
    biases / LN params (1, ...) f32; output (1, S, hid) f32.
    """
    h = h_ref[0].astype(jnp.float32)                      # (S, hid) residual
    s, hid = h.shape
    dh = hid // n_heads

    # Single fused QKV matmul (bf16 operands, f32 accumulation).
    qkv = jnp.dot(h.astype(_MATMUL_DTYPE), wqkv_ref[...],
                  preferred_element_type=jnp.float32)
    qkv = qkv + bqkv_ref[...].astype(jnp.float32)         # (S, 3*hid) f32

    # Head-split views; all heads handled by ONE batched dot_general, so no
    # per-head lane slices and no lane-axis concatenation.
    q = qkv[:, 0 * hid:1 * hid].reshape(s, n_heads, dh)
    k = qkv[:, 1 * hid:2 * hid].reshape(s, n_heads, dh)
    v = qkv[:, 2 * hid:3 * hid].reshape(s, n_heads, dh)

    # Pre-scale q (S*dh multiplies instead of S*S per head).
    qb = (q * inv_scale).astype(_MATMUL_DTYPE)
    kb = k.astype(_MATMUL_DTYPE)
    vb = v.astype(_MATMUL_DTYPE)

    # Scores: (H, S, S) in f32, softmax over last dim.
    energy = jnp.einsum("qhd,khd->hqk", qb, kb,
                        preferred_element_type=jnp.float32)
    m = jnp.max(energy, axis=-1, keepdims=True)
    p = jnp.exp(energy - m)
    attn = p * pl.reciprocal(jnp.sum(p, axis=-1, keepdims=True), approx=True)

    # Context directly in (S, H, dh) order -> lane-dense (S, hid) reshape.
    ctx = jnp.einsum("hqk,khd->qhd", attn.astype(_MATMUL_DTYPE), vb,
                     preferred_element_type=jnp.float32)
    ctx = ctx.reshape(s, hid)

    # Output projection + residual + torch-style LayerNorm (fused epilogue).
    sa = jnp.dot(ctx.astype(_MATMUL_DTYPE), wo_ref[...],
                 preferred_element_type=jnp.float32)
    sa = sa + bo_ref[...].astype(jnp.float32)
    out = _torch_layernorm(h + sa,
                           ln_g_ref[...].astype(jnp.float32),
                           ln_b_ref[...].astype(jnp.float32), eps)
    o_ref[0] = out.astype(o_ref.dtype)


def _ffn_ln_kernel(h_ref, w1_ref, b1_ref, w2_ref, b2_ref,
                   ln_g_ref, ln_b_ref, o_ref, *, eps):
    """Fused: relu(x@W1+b1)@W2+b2 -> +residual -> LN.  x:(tm,hid) f32."""
    h = h_ref[...].astype(jnp.float32)                    # (tm, hid) residual
    f1 = jnp.dot(h.astype(_MATMUL_DTYPE), w1_ref[...],
                 preferred_element_type=jnp.float32)
    f1 = jnp.maximum(f1 + b1_ref[...].astype(jnp.float32), 0.0)   # (tm, pf)
    f2 = jnp.dot(f1.astype(_MATMUL_DTYPE), w2_ref[...],
                 preferred_element_type=jnp.float32)
    f2 = f2 + b2_ref[...].astype(jnp.float32)
    out = _torch_layernorm(h + f2,
                           ln_g_ref[...].astype(jnp.float32),
                           ln_b_ref[...].astype(jnp.float32), eps)
    o_ref[...] = out.astype(o_ref.dtype)


# ----------------------------------------------------------------------------
# Wrappers
# ----------------------------------------------------------------------------

def _round_up(x, m):
    return ((x + m - 1) // m) * m


def _pick_row_tile(m, cap=512):
    """Row-tile (multiple of 8 sublanes). Rows get zero-padded to the tile, so
    any m is handled — no giant fallback block."""
    if m >= cap:
        return cap
    return max(8, _round_up(m, 8))


def _pad_rows(x2d, tm):
    m = x2d.shape[0]
    pad = (-m) % tm
    if pad:
        x2d = jnp.pad(x2d, ((0, pad), (0, 0)))
    return x2d


def linear_pallas(x2d, w, b):
    m, k = x2d.shape
    n = w.shape[1]
    tm = _pick_row_tile(m)
    xp = _pad_rows(x2d, tm)
    mp = xp.shape[0]
    out = pl.pallas_call(
        _linear_kernel,
        out_shape=jax.ShapeDtypeStruct((mp, n), jnp.float32),
        grid=(mp // tm,),
        in_specs=[
            pl.BlockSpec((tm, k), lambda i: (i, 0)),
            pl.BlockSpec((k, n), lambda i: (0, 0)),
            pl.BlockSpec((1, n), lambda i: (0, 0)),
        ],
        out_specs=pl.BlockSpec((tm, n), lambda i: (i, 0)),
        compiler_params=pltpu.CompilerParams(
            dimension_semantics=("parallel",),
            vmem_limit_bytes=_VMEM_LIMIT),
    )(xp, w, b.reshape(1, n))
    return out[:m]


def attention_block_pallas(h, wqkv, bqkv, wo, bo, gamma, beta,
                           *, n_heads, inv_scale, eps=1e-12):
    bsz, s, hid = h.shape
    kernel = functools.partial(_attn_block_kernel, n_heads=n_heads,
                               inv_scale=inv_scale, eps=eps)
    return pl.pallas_call(
        kernel,
        out_shape=jax.ShapeDtypeStruct((bsz, s, hid), jnp.float32),
        grid=(bsz,),
        in_specs=[
            pl.BlockSpec((1, s, hid), lambda b: (b, 0, 0)),
            pl.BlockSpec((hid, 3 * hid), lambda b: (0, 0)),
            pl.BlockSpec((1, 3 * hid), lambda b: (0, 0)),
            pl.BlockSpec((hid, hid), lambda b: (0, 0)),
            pl.BlockSpec((1, hid), lambda b: (0, 0)),
            pl.BlockSpec((1, hid), lambda b: (0, 0)),
            pl.BlockSpec((1, hid), lambda b: (0, 0)),
        ],
        out_specs=pl.BlockSpec((1, s, hid), lambda b: (b, 0, 0)),
        compiler_params=pltpu.CompilerParams(
            dimension_semantics=("parallel",),
            vmem_limit_bytes=_VMEM_LIMIT),
    )(h, wqkv, bqkv.reshape(1, -1), wo, bo.reshape(1, -1),
      gamma.reshape(1, -1), beta.reshape(1, -1))


def ffn_ln_pallas(h, w1, b1, w2, b2, gamma, beta, eps=1e-12):
    bsz, s, hid = h.shape
    pf = w1.shape[1]
    m = bsz * s
    tm = _pick_row_tile(m)
    h2 = _pad_rows(h.reshape(m, hid), tm)
    mp = h2.shape[0]
    out = pl.pallas_call(
        functools.partial(_ffn_ln_kernel, eps=eps),
        out_shape=jax.ShapeDtypeStruct((mp, hid), jnp.float32),
        grid=(mp // tm,),
        in_specs=[
            pl.BlockSpec((tm, hid), lambda i: (i, 0)),
            pl.BlockSpec((hid, pf), lambda i: (0, 0)),
            pl.BlockSpec((1, pf), lambda i: (0, 0)),
            pl.BlockSpec((pf, hid), lambda i: (0, 0)),
            pl.BlockSpec((1, hid), lambda i: (0, 0)),
            pl.BlockSpec((1, hid), lambda i: (0, 0)),
            pl.BlockSpec((1, hid), lambda i: (0, 0)),
        ],
        out_specs=pl.BlockSpec((tm, hid), lambda i: (i, 0)),
        compiler_params=pltpu.CompilerParams(
            dimension_semantics=("parallel",),
            vmem_limit_bytes=_VMEM_LIMIT),
    )(h2, w1, b1.reshape(1, pf), w2, b2.reshape(1, hid),
      gamma.reshape(1, hid), beta.reshape(1, hid))
    return out[:m].reshape(bsz, s, hid)


# ----------------------------------------------------------------------------
# Encoder forward
# ----------------------------------------------------------------------------

def encoder_forward(params, trg, *, n_heads):
    bsz, seq, _ = trg.shape
    hid = params["ft_w"].shape[1]
    assert hid % n_heads == 0, "hid_dim must be divisible by n_heads"
    dh = hid // n_heads
    inv_scale = 1.0 / math.sqrt(dh)        # Python scalar (no tracing)

    # ft : Linear(dna_dim -> hid_dim)
    h = linear_pallas(trg.reshape(bsz * seq, -1),
                      params["ft_w"], params["ft_b"]).reshape(bsz, seq, hid)

    for lp in params["layers"]:
        # Fused: QKV proj + head-batched attention + out proj + residual + LN1.
        h = attention_block_pallas(
            h, lp["wqkv_w"], lp["wqkv_b"], lp["fc_w"], lp["fc_b"],
            lp["ln1_g"], lp["ln1_b"],
            n_heads=n_heads, inv_scale=inv_scale)

        # Fused: positionwise FFN (1x1 convs == linears) + residual + LN2.
        h = ffn_ln_pallas(
            h, lp["pf1_w"], lp["pf1_b"], lp["pf2_w"], lp["pf2_b"],
            lp["ln2_g"], lp["ln2_b"])

    return h


# ----------------------------------------------------------------------------
# Deterministic parameter construction
# ----------------------------------------------------------------------------

def init_params(key, dna_dim, hid_dim, n_layers, pf_dim):
    """Weights stored in bf16 (halves HBM/VMEM traffic); biases/LN in f32."""
    def dense(k, fan_in, fan_out):
        kw, kb = jax.random.split(k)
        w = jax.random.normal(kw, (fan_in, fan_out), jnp.float32) * 0.02
        b = jax.random.normal(kb, (fan_out,), jnp.float32) * 0.02
        return w.astype(_MATMUL_DTYPE), b

    keys = jax.random.split(key, n_layers + 1)
    ft_w, ft_b = dense(keys[0], dna_dim, hid_dim)
    layers = []
    for i in range(n_layers):
        ks = jax.random.split(keys[i + 1], 6)
        wq_w, wq_b = dense(ks[0], hid_dim, hid_dim)
        wk_w, wk_b = dense(ks[1], hid_dim, hid_dim)
        wv_w, wv_b = dense(ks[2], hid_dim, hid_dim)
        fc_w, fc_b = dense(ks[3], hid_dim, hid_dim)
        pf1_w, pf1_b = dense(ks[4], hid_dim, pf_dim)   # Conv1d(hid, pf, 1)
        pf2_w, pf2_b = dense(ks[5], pf_dim, hid_dim)   # Conv1d(pf, hid, 1)
        layers.append(dict(
            # Q/K/V weights fused once at init -> single matmul in-kernel.
            wqkv_w=jnp.concatenate([wq_w, wk_w, wv_w], axis=1),
            wqkv_b=jnp.concatenate([wq_b, wk_b, wv_b], axis=0),
            fc_w=fc_w, fc_b=fc_b,
            pf1_w=pf1_w, pf1_b=pf1_b, pf2_w=pf2_w, pf2_b=pf2_b,
            ln1_g=jnp.ones((hid_dim,), jnp.float32),
            ln1_b=jnp.zeros((hid_dim,), jnp.float32),
            ln2_g=jnp.ones((hid_dim,), jnp.float32),
            ln2_b=jnp.zeros((hid_dim,), jnp.float32),
        ))
    return dict(ft_w=ft_w, ft_b=ft_b, layers=layers)


# ----------------------------------------------------------------------------

if __name__ == "__main__":
    # Small, forward-consistent shapes
    DNA_DIM = 16
    HID_DIM = 32
    N_LAYERS = 2
    N_HEADS = 4
    PF_DIM = 64
    BATCH = 2
    SEQ = 8

    root = jax.random.PRNGKey(0)
    k_params, k_input = jax.random.split(root)

    params = init_params(k_params, DNA_DIM, HID_DIM, N_LAYERS, PF_DIM)
    trg = jax.random.normal(k_input, (BATCH, SEQ, DNA_DIM), jnp.float32)

    fwd = jax.jit(functools.partial(encoder_forward, n_heads=N_HEADS))
    out = fwd(params, trg)
    out = jax.block_until_ready(out)

    assert out.shape == (BATCH, SEQ, HID_DIM)
    assert bool(jnp.all(jnp.isfinite(out)))
    print("KERNEL_OK")
</pallas_src>

<mosaic_0001>
module attributes {stable_mosaic.version = 11 : i64} {
  func.func @_linear_kernel(%arg0: i32, %arg1: memref<16x16xf32, #tpu.memory_space<vmem>>, %arg2: memref<16x32xbf16, #tpu.memory_space<vmem>>, %arg3: memref<1x32xf32, #tpu.memory_space<vmem>>, %arg4: memref<16x32xf32, #tpu.memory_space<vmem>>) attributes {dimension_semantics = [#tpu.dimension_semantics<parallel>], iteration_bounds = array<i64: 1>, scalar_prefetch = 0 : i64, scratch_operands = 0 : i64, tpu.core_type = #tpu.core_type<tc>, window_params = [{transform_indices = @transform_0, window_bounds = array<i64: 16, 16>}, {pipeline_mode = #tpu.pipeline_mode<synchronous>, transform_indices = @transform_1, window_bounds = array<i64: 16, 32>}, {pipeline_mode = #tpu.pipeline_mode<synchronous>, transform_indices = @transform_2, window_bounds = array<i64: 1, 32>}, {transform_indices = @transform_3, window_bounds = array<i64: 16, 32>}]} {
    %c0 = arith.constant 0 : index
    %c0_0 = arith.constant 0 : index
    %0 = vector.load %arg1[%c0, %c0_0] : memref<16x16xf32, #tpu.memory_space<vmem>>, vector<16x16xf32>
    %1 = arith.truncf %0 : vector<16x16xf32> to vector<16x16xbf16>
    %c0_1 = arith.constant 0 : index
    %c0_2 = arith.constant 0 : index
    %2 = vector.load %arg2[%c0_1, %c0_2] : memref<16x32xbf16, #tpu.memory_space<vmem>>, vector<16x32xbf16>
    %cst = arith.constant dense<0.000000e+00> : vector<16x32xf32>
    %3 = tpu.matmul %1, %2, %cst {dimension_numbers = #tpu.dot_dimension_numbers<[1], [0], [0], [1], [0, 0, 1, 1], [], []>} : vector<16x16xbf16>, vector<16x32xbf16>, vector<16x32xf32> -> vector<16x32xf32>
    %c0_3 = arith.constant 0 : index
    %c0_4 = arith.constant 0 : index
    %4 = vector.load %arg3[%c0_3, %c0_4] : memref<1x32xf32, #tpu.memory_space<vmem>>, vector<1x32xf32>
    %5 = vector.broadcast %4 : vector<1x32xf32> to vector<16x32xf32>
    %6 = arith.addf %3, %5 : vector<16x32xf32>
    %c0_5 = arith.constant 0 : index
    %c0_6 = arith.constant 0 : index
    %7 = vector.load %arg4[%c0_5, %c0_6] : memref<16x32xf32, #tpu.memory_space<vmem>>, vector<16x32xf32>
    tpu.vector_store %arg4[%c0_5, %c0_6], %6 {strides = array<i32>} : memref<16x32xf32, #tpu.memory_space<vmem>>, vector<16x32xf32>,
    return
  }
  func.func @transform_0(%arg0: i32) -> (i32, i32) {
    %c0_i32 = arith.constant 0 : i32
    %c0_i32_0 = arith.constant 0 : i32
    return %arg0, %c0_i32 : i32, i32
  }
  func.func @transform_1(%arg0: i32) -> (i32, i32) {
    %c0_i32 = arith.constant 0 : i32
    %c0_i32_0 = arith.constant 0 : i32
    %c0_i32_1 = arith.constant 0 : i32
    return %c0_i32, %c0_i32_0 : i32, i32
  }
  func.func @transform_2(%arg0: i32) -> (i32, i32) {
    %c0_i32 = arith.constant 0 : i32
    %c0_i32_0 = arith.constant 0 : i32
    %c0_i32_1 = arith.constant 0 : i32
    return %c0_i32, %c0_i32_0 : i32, i32
  }
  func.func @transform_3(%arg0: i32) -> (i32, i32) {
    %c0_i32 = arith.constant 0 : i32
    %c0_i32_0 = arith.constant 0 : i32
    return %arg0, %c0_i32 : i32, i32
  }
}

module attributes {stable_mosaic.version = 11 : i64} {
  func.func @_attn_block_kernel(%arg0: i32, %arg1: memref<1x8x32xf32, #tpu.memory_space<vmem>>, %arg2: memref<32x96xbf16, #tpu.memory_space<vmem>>, %arg3: memref<1x96xf32, #tpu.memory_space<vmem>>, %arg4: memref<32x32xbf16, #tpu.memory_space<vmem>>, %arg5: memref<1x32xf32, #tpu.memory_space<vmem>>, %arg6: memref<1x32xf32, #tpu.memory_space<vmem>>, %arg7: memref<1x32xf32, #tpu.memory_space<vmem>>, %arg8: memref<1x8x32xf32, #tpu.memory_space<vmem>>) attributes {dimension_semantics = [#tpu.dimension_semantics<parallel>], iteration_bounds = array<i64: 2>, scalar_prefetch = 0 : i64, scratch_operands = 0 : i64, tpu.core_type = #tpu.core_type<tc>, window_params = [{transform_indices = @transform_0, window_bounds = array<i64: 1, 8, 32>}, {pipeline_mode = #tpu.pipeline_mode<synchronous>, transform_indices = @transform_1, window_bounds = array<i64: 32, 96>}, {pipeline_mode = #tpu.pipeline_mode<synchronous>, transform_indices = @transform_2, window_bounds = array<i64: 1, 96>}, {pipeline_mode = #tpu.pipeline_mode<synchronous>, transform_indices = @transform_3, window_bounds = array<i64: 32, 32>}, {pipeline_mode = #tpu.pipeline_mode<synchronous>, transform_indices = @transform_4, window_bounds = array<i64: 1, 32>}, {pipeline_mode = #tpu.pipeline_mode<synchronous>, transform_indices = @transform_5, window_bounds = array<i64: 1, 32>}, {pipeline_mode = #tpu.pipeline_mode<synchronous>, transform_indices = @transform_6, window_bounds = array<i64: 1, 32>}, {transform_indices = @transform_7, window_bounds = array<i64: 1, 8, 32>}]} {
    %c0 = arith.constant 0 : index
    %c0_0 = arith.constant 0 : index
    %c0_1 = arith.constant 0 : index
    %0 = vector.load %arg1[%c0, %c0_0, %c0_1] : memref<1x8x32xf32, #tpu.memory_space<vmem>>, vector<1x8x32xf32>
    %1 = vector.shape_cast %0 : vector<1x8x32xf32> to vector<8x32xf32>
    %2 = arith.truncf %1 : vector<8x32xf32> to vector<8x32xbf16>
    %c0_2 = arith.constant 0 : index
    %c0_3 = arith.constant 0 : index
    %3 = vector.load %arg2[%c0_2, %c0_3] : memref<32x96xbf16, #tpu.memory_space<vmem>>, vector<32x96xbf16>
    %cst = arith.constant dense<0.000000e+00> : vector<8x96xf32>
    %4 = tpu.matmul %2, %3, %cst {dimension_numbers = #tpu.dot_dimension_numbers<[1], [0], [0], [1], [0, 0, 1, 1], [], []>} : vector<8x32xbf16>, vector<32x96xbf16>, vector<8x96xf32> -> vector<8x96xf32>
    %c0_4 = arith.constant 0 : index
    %c0_5 = arith.constant 0 : index
    %5 = vector.load %arg3[%c0_4, %c0_5] : memref<1x96xf32, #tpu.memory_space<vmem>>, vector<1x96xf32>
    %6 = vector.broadcast %5 : vector<1x96xf32> to vector<8x96xf32>
    %7 = arith.addf %4, %6 : vector<8x96xf32>
    %8 = vector.extract_strided_slice %7 {offsets = [0, 0], sizes = [8, 32], strides = [1, 1]} : vector<8x96xf32> to vector<8x32xf32>
    %9 = vector.shape_cast %8 : vector<8x32xf32> to vector<8x4x8xf32>
    %10 = vector.extract_strided_slice %7 {offsets = [0, 32], sizes = [8, 32], strides = [1, 1]} : vector<8x96xf32> to vector<8x32xf32>
    %11 = vector.shape_cast %10 : vector<8x32xf32> to vector<8x4x8xf32>
    %12 = vector.extract_strided_slice %7 {offsets = [0, 64], sizes = [8, 32], strides = [1, 1]} : vector<8x96xf32> to vector<8x32xf32>
    %13 = vector.shape_cast %12 : vector<8x32xf32> to vector<8x4x8xf32>
    %cst_6 = arith.constant 0.353553385 : f32
    %14 = vector.broadcast %cst_6 : f32 to vector<8x4x8xf32>
    %15 = arith.mulf %9, %14 : vector<8x4x8xf32>
    %16 = arith.truncf %15 : vector<8x4x8xf32> to vector<8x4x8xbf16>
    %17 = arith.truncf %11 : vector<8x4x8xf32> to vector<8x4x8xbf16>
    %18 = arith.truncf %13 : vector<8x4x8xf32> to vector<8x4x8xbf16>
    "tpu.trace_start"() <{level = 10 : i32, message = "qhd,khd->hqk"}> : () -> ()
    %cst_7 = arith.constant dense<0.000000e+00> : vector<4x8x8xf32>
    %19 = tpu.matmul %16, %17, %cst_7 {dimension_numbers = #tpu.dot_dimension_numbers<[2], [2], [0], [0], [0, 1, 0, 0, 1, 0], [1], [1]>} : vector<8x4x8xbf16>, vector<8x4x8xbf16>, vector<4x8x8xf32> -> vector<4x8x8xf32>
    "tpu.trace_stop"() : () -> ()
    %cst_8 = arith.constant dense<0xFF800000> : vector<4x8xf32>
    %20 = vector.multi_reduction <maximumf>, %19, %cst_8 [2] : vector<4x8x8xf32> to vector<4x8xf32>
    %21 = vector.shape_cast %20 : vector<4x8xf32> to vector<4x8x1xf32>
    %22 = vector.broadcast %21 : vector<4x8x1xf32> to vector<4x8x8xf32>
    %23 = arith.subf %19, %22 : vector<4x8x8xf32>
    %24 = math.exp %23 : vector<4x8x8xf32>
    %cst_9 = arith.constant dense<0.000000e+00> : vector<4x8xf32>
    %25 = vector.multi_reduction <add>, %24, %cst_9 [2] : vector<4x8x8xf32> to vector<4x8xf32>
    %26 = vector.shape_cast %25 : vector<4x8xf32> to vector<4x8x1xf32>
    %27 = tpu.reciprocal %26 {approx = true} : vector<4x8x1xf32> -> vector<4x8x1xf32>
    %28 = vector.broadcast %27 : vector<4x8x1xf32> to vector<4x8x8xf32>
    %29 = arith.mulf %24, %28 : vector<4x8x8xf32>
    %30 = arith.truncf %29 : vector<4x8x8xf32> to vector<4x8x8xbf16>
    "tpu.trace_start"() <{level = 10 : i32, message = "hqk,khd->qhd"}> : () -> ()
    %cst_10 = arith.constant dense<0.000000e+00> : vector<4x8x8xf32>
    %31 = tpu.matmul %18, %30, %cst_10 {dimension_numbers = #tpu.dot_dimension_numbers<[0], [2], [2], [1], [0, 1, 0, 2, 1, 1], [1], [0]>} : vector<8x4x8xbf16>, vector<4x8x8xbf16>, vector<4x8x8xf32> -> vector<4x8x8xf32>
    %32 = tpu.transpose %31, [2, 0, 1] : vector<4x8x8xf32> -> vector<8x4x8xf32>
    "tpu.trace_stop"() : () -> ()
    %33 = vector.shape_cast %32 : vector<8x4x8xf32> to vector<8x32xf32>
    %34 = arith.truncf %33 : vector<8x32xf32> to vector<8x32xbf16>
    %c0_11 = arith.constant 0 : index
    %c0_12 = arith.constant 0 : index
    %35 = vector.load %arg4[%c0_11, %c0_12] : memref<32x32xbf16, #tpu.memory_space<vmem>>, vector<32x32xbf16>
    %cst_13 = arith.constant dense<0.000000e+00> : vector<8x32xf32>
    %36 = tpu.matmul %34, %35, %cst_13 {dimension_numbers = #tpu.dot_dimension_numbers<[1], [0], [0], [1], [0, 0, 1, 1], [], []>} : vector<8x32xbf16>, vector<32x32xbf16>, vector<8x32xf32> -> vector<8x32xf32>
    %c0_14 = arith.constant 0 : index
    %c0_15 = arith.constant 0 : index
    %37 = vector.load %arg5[%c0_14, %c0_15] : memref<1x32xf32, #tpu.memory_space<vmem>>, vector<1x32xf32>
    %38 = vector.broadcast %37 : vector<1x32xf32> to vector<8x32xf32>
    %39 = arith.addf %36, %38 : vector<8x32xf32>
    %40 = arith.addf %1, %39 : vector<8x32xf32>
    %c0_16 = arith.constant 0 : index
    %c0_17 = arith.constant 0 : index
    %41 = vector.load %arg6[%c0_16, %c0_17] : memref<1x32xf32, #tpu.memory_space<vmem>>, vector<1x32xf32>
    %c0_18 = arith.constant 0 : index
    %c0_19 = arith.constant 0 : index
    %42 = vector.load %arg7[%c0_18, %c0_19] : memref<1x32xf32, #tpu.memory_space<vmem>>, vector<1x32xf32>
    %cst_20 = arith.constant dense<0.000000e+00> : vector<8xf32>
    %43 = vector.multi_reduction <add>, %40, %cst_20 [1] : vector<8x32xf32> to vector<8xf32>
    %44 = vector.shape_cast %43 : vector<8xf32> to vector<8x1xf32>
    %cst_21 = arith.constant 3.200000e+01 : f32
    %45 = vector.broadcast %cst_21 : f32 to vector<8x1xf32>
    %46 = arith.divf %44, %45 : vector<8x1xf32>
    %47 = vector.broadcast %46 : vector<8x1xf32> to vector<8x32xf32>
    %48 = arith.subf %40, %47 : vector<8x32xf32>
    %49 = arith.mulf %48, %48 : vector<8x32xf32>
    %cst_22 = arith.constant dense<0.000000e+00> : vector<8xf32>
    %50 = vector.multi_reduction <add>, %49, %cst_22 [1] : vector<8x32xf32> to vector<8xf32>
    %51 = vector.shape_cast %50 : vector<8xf32> to vector<8x1xf32>
    %cst_23 = arith.constant 3.100000e+01 : f32
    %52 = vector.broadcast %cst_23 : f32 to vector<8x1xf32>
    %53 = arith.divf %51, %52 : vector<8x1xf32>
    %54 = math.sqrt %53 : vector<8x1xf32>
    %cst_24 = arith.constant 9.99999996E-13 : f32
    %55 = vector.broadcast %cst_24 : f32 to vector<8x1xf32>
    %56 = arith.addf %54, %55 : vector<8x1xf32>
    %57 = tpu.reciprocal %56 {approx = true} : vector<8x1xf32> -> vector<8x1xf32>
    %58 = vector.broadcast %57 : vector<8x1xf32> to vector<8x32xf32>
    %59 = arith.mulf %48, %58 : vector<8x32xf32>
    %60 = vector.broadcast %41 : vector<1x32xf32> to vector<8x32xf32>
    %61 = arith.mulf %60, %59 : vector<8x32xf32>
    %62 = vector.broadcast %42 : vector<1x32xf32> to vector<8x32xf32>
    %63 = arith.addf %61, %62 : vector<8x32xf32>
    %c0_25 = arith.constant 0 : index
    %c0_26 = arith.constant 0 : index
    %c0_27 = arith.constant 0 : index
    %64 = vector.load %arg8[%c0_25, %c0_26, %c0_27] : memref<1x8x32xf32, #tpu.memory_space<vmem>>, vector<1x8x32xf32>
    %65 = vector.shape_cast %64 : vector<1x8x32xf32> to vector<8x32xf32>
    %66 = vector.shape_cast %63 : vector<8x32xf32> to vector<1x8x32xf32>
    tpu.vector_store %arg8[%c0_25, %c0_26, %c0_27], %66 {strides = array<i32>} : memref<1x8x32xf32, #tpu.memory_space<vmem>>, vector<1x8x32xf32>,
    return
  }
  func.func @transform_0(%arg0: i32) -> (i32, i32, i32) {
    %c0_i32 = arith.constant 0 : i32
    %c0_i32_0 = arith.constant 0 : i32
    %c0_i32_1 = arith.constant 0 : i32
    return %arg0, %c0_i32, %c0_i32_0 : i32, i32, i32
  }
  func.func @transform_1(%arg0: i32) -> (i32, i32) {
    %c0_i32 = arith.constant 0 : i32
    %c0_i32_0 = arith.constant 0 : i32
    %c0_i32_1 = arith.constant 0 : i32
    return %c0_i32, %c0_i32_0 : i32, i32
  }
  func.func @transform_2(%arg0: i32) -> (i32, i32) {
    %c0_i32 = arith.constant 0 : i32
    %c0_i32_0 = arith.constant 0 : i32
    %c0_i32_1 = arith.constant 0 : i32
    return %c0_i32, %c0_i32_0 : i32, i32
  }
  func.func @transform_3(%arg0: i32) -> (i32, i32) {
    %c0_i32 = arith.constant 0 : i32
    %c0_i32_0 = arith.constant 0 : i32
    %c0_i32_1 = arith.constant 0 : i32
    return %c0_i32, %c0_i32_0 : i32, i32
  }
  func.func @transform_4(%arg0: i32) -> (i32, i32) {
    %c0_i32 = arith.constant 0 : i32
    %c0_i32_0 = arith.constant 0 : i32
    %c0_i32_1 = arith.constant 0 : i32
    return %c0_i32, %c0_i32_0 : i32, i32
  }
  func.func @transform_5(%arg0: i32) -> (i32, i32) {
    %c0_i32 = arith.constant 0 : i32
    %c0_i32_0 = arith.constant 0 : i32
    %c0_i32_1 = arith.constant 0 : i32
    return %c0_i32, %c0_i32_0 : i32, i32
  }
  func.func @transform_6(%arg0: i32) -> (i32, i32) {
    %c0_i32 = arith.constant 0 : i32
    %c0_i32_0 = arith.constant 0 : i32
    %c0_i32_1 = arith.constant 0 : i32
    return %c0_i32, %c0_i32_0 : i32, i32
  }
  func.func @transform_7(%arg0: i32) -> (i32, i32, i32) {
    %c0_i32 = arith.constant 0 : i32
    %c0_i32_0 = arith.constant 0 : i32
    %c0_i32_1 = arith.constant 0 : i32
    return %arg0, %c0_i32, %c0_i32_0 : i32, i32, i32
  }
}

module attributes {stable_mosaic.version = 11 : i64} {
  func.func @_ffn_ln_kernel(%arg0: i32, %arg1: memref<16x32xf32, #tpu.memory_space<vmem>>, %arg2: memref<32x64xbf16, #tpu.memory_space<vmem>>, %arg3: memref<1x64xf32, #tpu.memory_space<vmem>>, %arg4: memref<64x32xbf16, #tpu.memory_space<vmem>>, %arg5: memref<1x32xf32, #tpu.memory_space<vmem>>, %arg6: memref<1x32xf32, #tpu.memory_space<vmem>>, %arg7: memref<1x32xf32, #tpu.memory_space<vmem>>, %arg8: memref<16x32xf32, #tpu.memory_space<vmem>>) attributes {dimension_semantics = [#tpu.dimension_semantics<parallel>], iteration_bounds = array<i64: 1>, scalar_prefetch = 0 : i64, scratch_operands = 0 : i64, tpu.core_type = #tpu.core_type<tc>, window_params = [{transform_indices = @transform_0, window_bounds = array<i64: 16, 32>}, {pipeline_mode = #tpu.pipeline_mode<synchronous>, transform_indices = @transform_1, window_bounds = array<i64: 32, 64>}, {pipeline_mode = #tpu.pipeline_mode<synchronous>, transform_indices = @transform_2, window_bounds = array<i64: 1, 64>}, {pipeline_mode = #tpu.pipeline_mode<synchronous>, transform_indices = @transform_3, window_bounds = array<i64: 64, 32>}, {pipeline_mode = #tpu.pipeline_mode<synchronous>, transform_indices = @transform_4, window_bounds = array<i64: 1, 32>}, {pipeline_mode = #tpu.pipeline_mode<synchronous>, transform_indices = @transform_5, window_bounds = array<i64: 1, 32>}, {pipeline_mode = #tpu.pipeline_mode<synchronous>, transform_indices = @transform_6, window_bounds = array<i64: 1, 32>}, {transform_indices = @transform_7, window_bounds = array<i64: 16, 32>}]} {
    %c0 = arith.constant 0 : index
    %c0_0 = arith.constant 0 : index
    %0 = vector.load %arg1[%c0, %c0_0] : memref<16x32xf32, #tpu.memory_space<vmem>>, vector<16x32xf32>
    %1 = arith.truncf %0 : vector<16x32xf32> to vector<16x32xbf16>
    %c0_1 = arith.constant 0 : index
    %c0_2 = arith.constant 0 : index
    %2 = vector.load %arg2[%c0_1, %c0_2] : memref<32x64xbf16, #tpu.memory_space<vmem>>, vector<32x64xbf16>
    %cst = arith.constant dense<0.000000e+00> : vector<16x64xf32>
    %3 = tpu.matmul %1, %2, %cst {dimension_numbers = #tpu.dot_dimension_numbers<[1], [0], [0], [1], [0, 0, 1, 1], [], []>} : vector<16x32xbf16>, vector<32x64xbf16>, vector<16x64xf32> -> vector<16x64xf32>
    %c0_3 = arith.constant 0 : index
    %c0_4 = arith.constant 0 : index
    %4 = vector.load %arg3[%c0_3, %c0_4] : memref<1x64xf32, #tpu.memory_space<vmem>>, vector<1x64xf32>
    %5 = vector.broadcast %4 : vector<1x64xf32> to vector<16x64xf32>
    %6 = arith.addf %3, %5 : vector<16x64xf32>
    %cst_5 = arith.constant 0.000000e+00 : f32
    %7 = vector.broadcast %cst_5 : f32 to vector<16x64xf32>
    %8 = arith.maximumf %6, %7 : vector<16x64xf32>
    %9 = arith.truncf %8 : vector<16x64xf32> to vector<16x64xbf16>
    %c0_6 = arith.constant 0 : index
    %c0_7 = arith.constant 0 : index
    %10 = vector.load %arg4[%c0_6, %c0_7] : memref<64x32xbf16, #tpu.memory_space<vmem>>, vector<64x32xbf16>
    %cst_8 = arith.constant dense<0.000000e+00> : vector<16x32xf32>
    %11 = tpu.matmul %9, %10, %cst_8 {dimension_numbers = #tpu.dot_dimension_numbers<[1], [0], [0], [1], [0, 0, 1, 1], [], []>} : vector<16x64xbf16>, vector<64x32xbf16>, vector<16x32xf32> -> vector<16x32xf32>
    %c0_9 = arith.constant 0 : index
    %c0_10 = arith.constant 0 : index
    %12 = vector.load %arg5[%c0_9, %c0_10] : memref<1x32xf32, #tpu.memory_space<vmem>>, vector<1x32xf32>
    %13 = vector.broadcast %12 : vector<1x32xf32> to vector<16x32xf32>
    %14 = arith.addf %11, %13 : vector<16x32xf32>
    %15 = arith.addf %0, %14 : vector<16x32xf32>
    %c0_11 = arith.constant 0 : index
    %c0_12 = arith.constant 0 : index
    %16 = vector.load %arg6[%c0_11, %c0_12] : memref<1x32xf32, #tpu.memory_space<vmem>>, vector<1x32xf32>
    %c0_13 = arith.constant 0 : index
    %c0_14 = arith.constant 0 : index
    %17 = vector.load %arg7[%c0_13, %c0_14] : memref<1x32xf32, #tpu.memory_space<vmem>>, vector<1x32xf32>
    %cst_15 = arith.constant dense<0.000000e+00> : vector<16xf32>
    %18 = vector.multi_reduction <add>, %15, %cst_15 [1] : vector<16x32xf32> to vector<16xf32>
    %19 = vector.shape_cast %18 : vector<16xf32> to vector<16x1xf32>
    %cst_16 = arith.constant 3.200000e+01 : f32
    %20 = vector.broadcast %cst_16 : f32 to vector<16x1xf32>
    %21 = arith.divf %19, %20 : vector<16x1xf32>
    %22 = vector.broadcast %21 : vector<16x1xf32> to vector<16x32xf32>
    %23 = arith.subf %15, %22 : vector<16x32xf32>
    %24 = arith.mulf %23, %23 : vector<16x32xf32>
    %cst_17 = arith.constant dense<0.000000e+00> : vector<16xf32>
    %25 = vector.multi_reduction <add>, %24, %cst_17 [1] : vector<16x32xf32> to vector<16xf32>
    %26 = vector.shape_cast %25 : vector<16xf32> to vector<16x1xf32>
    %cst_18 = arith.constant 3.100000e+01 : f32
    %27 = vector.broadcast %cst_18 : f32 to vector<16x1xf32>
    %28 = arith.divf %26, %27 : vector<16x1xf32>
    %29 = math.sqrt %28 : vector<16x1xf32>
    %cst_19 = arith.constant 9.99999996E-13 : f32
    %30 = vector.broadcast %cst_19 : f32 to vector<16x1xf32>
    %31 = arith.addf %29, %30 : vector<16x1xf32>
    %32 = tpu.reciprocal %31 {approx = true} : vector<16x1xf32> -> vector<16x1xf32>
    %33 = vector.broadcast %32 : vector<16x1xf32> to vector<16x32xf32>
    %34 = arith.mulf %23, %33 : vector<16x32xf32>
    %35 = vector.broadcast %16 : vector<1x32xf32> to vector<16x32xf32>
    %36 = arith.mulf %35, %34 : vector<16x32xf32>
    %37 = vector.broadcast %17 : vector<1x32xf32> to vector<16x32xf32>
    %38 = arith.addf %36, %37 : vector<16x32xf32>
    %c0_20 = arith.constant 0 : index
    %c0_21 = arith.constant 0 : index
    %39 = vector.load %arg8[%c0_20, %c0_21] : memref<16x32xf32, #tpu.memory_space<vmem>>, vector<16x32xf32>
    tpu.vector_store %arg8[%c0_20, %c0_21], %38 {strides = array<i32>} : memref<16x32xf32, #tpu.memory_space<vmem>>, vector<16x32xf32>,
    return
  }
  func.func @transform_0(%arg0: i32) -> (i32, i32) {
    %c0_i32 = arith.constant 0 : i32
    %c0_i32_0 = arith.constant 0 : i32
    return %arg0, %c0_i32 : i32, i32
  }
  func.func @transform_1(%arg0: i32) -> (i32, i32) {
    %c0_i32 = arith.constant 0 : i32
    %c0_i32_0 = arith.constant 0 : i32
    %c0_i32_1 = arith.constant 0 : i32
    return %c0_i32, %c0_i32_0 : i32, i32
  }
  func.func @transform_2(%arg0: i32) -> (i32, i32) {
    %c0_i32 = arith.constant 0 : i32
    %c0_i32_0 = arith.constant 0 : i32
    %c0_i32_1 = arith.constant 0 : i32
    return %c0_i32, %c0_i32_0 : i32, i32
  }
  func.func @transform_3(%arg0: i32) -> (i32, i32) {
    %c0_i32 = arith.constant 0 : i32
    %c0_i32_0 = arith.constant 0 : i32
    %c0_i32_1 = arith.constant 0 : i32
    return %c0_i32, %c0_i32_0 : i32, i32
  }
  func.func @transform_4(%arg0: i32) -> (i32, i32) {
    %c0_i32 = arith.constant 0 : i32
    %c0_i32_0 = arith.constant 0 : i32
    %c0_i32_1 = arith.constant 0 : i32
    return %c0_i32, %c0_i32_0 : i32, i32
  }
  func.func @transform_5(%arg0: i32) -> (i32, i32) {
    %c0_i32 = arith.constant 0 : i32
    %c0_i32_0 = arith.constant 0 : i32
    %c0_i32_1 = arith.constant 0 : i32
    return %c0_i32, %c0_i32_0 : i32, i32
  }
  func.func @transform_6(%arg0: i32) -> (i32, i32) {
    %c0_i32 = arith.constant 0 : i32
    %c0_i32_0 = arith.constant 0 : i32
    %c0_i32_1 = arith.constant 0 : i32
    return %c0_i32, %c0_i32_0 : i32, i32
  }
  func.func @transform_7(%arg0: i32) -> (i32, i32) {
    %c0_i32 = arith.constant 0 : i32
    %c0_i32_0 = arith.constant 0 : i32
    return %arg0, %c0_i32 : i32, i32
  }
}

module attributes {stable_mosaic.version = 11 : i64} {
  func.func @_attn_block_kernel(%arg0: i32, %arg1: memref<1x8x32xf32, #tpu.memory_space<vmem>>, %arg2: memref<32x96xbf16, #tpu.memory_space<vmem>>, %arg3: memref<1x96xf32, #tpu.memory_space<vmem>>, %arg4: memref<32x32xbf16, #tpu.memory_space<vmem>>, %arg5: memref<1x32xf32, #tpu.memory_space<vmem>>, %arg6: memref<1x32xf32, #tpu.memory_space<vmem>>, %arg7: memref<1x32xf32, #tpu.memory_space<vmem>>, %arg8: memref<1x8x32xf32, #tpu.memory_space<vmem>>) attributes {dimension_semantics = [#tpu.dimension_semantics<parallel>], iteration_bounds = array<i64: 2>, scalar_prefetch = 0 : i64, scratch_operands = 0 : i64, tpu.core_type = #tpu.core_type<tc>, window_params = [{transform_indices = @transform_0, window_bounds = array<i64: 1, 8, 32>}, {pipeline_mode = #tpu.pipeline_mode<synchronous>, transform_indices = @transform_1, window_bounds = array<i64: 32, 96>}, {pipeline_mode = #tpu.pipeline_mode<synchronous>, transform_indices = @transform_2, window_bounds = array<i64: 1, 96>}, {pipeline_mode = #tpu.pipeline_mode<synchronous>, transform_indices = @transform_3, window_bounds = array<i64: 32, 32>}, {pipeline_mode = #tpu.pipeline_mode<synchronous>, transform_indices = @transform_4, window_bounds = array<i64: 1, 32>}, {pipeline_mode = #tpu.pipeline_mode<synchronous>, transform_indices = @transform_5, window_bounds = array<i64: 1, 32>}, {pipeline_mode = #tpu.pipeline_mode<synchronous>, transform_indices = @transform_6, window_bounds = array<i64: 1, 32>}, {transform_indices = @transform_7, window_bounds = array<i64: 1, 8, 32>}]} {
    %c0 = arith.constant 0 : index
    %c0_0 = arith.constant 0 : index
    %c0_1 = arith.constant 0 : index
    %0 = vector.load %arg1[%c0, %c0_0, %c0_1] : memref<1x8x32xf32, #tpu.memory_space<vmem>>, vector<1x8x32xf32>
    %1 = vector.shape_cast %0 : vector<1x8x32xf32> to vector<8x32xf32>
    %2 = arith.truncf %1 : vector<8x32xf32> to vector<8x32xbf16>
    %c0_2 = arith.constant 0 : index
    %c0_3 = arith.constant 0 : index
    %3 = vector.load %arg2[%c0_2, %c0_3] : memref<32x96xbf16, #tpu.memory_space<vmem>>, vector<32x96xbf16>
    %cst = arith.constant dense<0.000000e+00> : vector<8x96xf32>
    %4 = tpu.matmul %2, %3, %cst {dimension_numbers = #tpu.dot_dimension_numbers<[1], [0], [0], [1], [0, 0, 1, 1], [], []>} : vector<8x32xbf16>, vector<32x96xbf16>, vector<8x96xf32> -> vector<8x96xf32>
    %c0_4 = arith.constant 0 : index
    %c0_5 = arith.constant 0 : index
    %5 = vector.load %arg3[%c0_4, %c0_5] : memref<1x96xf32, #tpu.memory_space<vmem>>, vector<1x96xf32>
    %6 = vector.broadcast %5 : vector<1x96xf32> to vector<8x96xf32>
    %7 = arith.addf %4, %6 : vector<8x96xf32>
    %8 = vector.extract_strided_slice %7 {offsets = [0, 0], sizes = [8, 32], strides = [1, 1]} : vector<8x96xf32> to vector<8x32xf32>
    %9 = vector.shape_cast %8 : vector<8x32xf32> to vector<8x4x8xf32>
    %10 = vector.extract_strided_slice %7 {offsets = [0, 32], sizes = [8, 32], strides = [1, 1]} : vector<8x96xf32> to vector<8x32xf32>
    %11 = vector.shape_cast %10 : vector<8x32xf32> to vector<8x4x8xf32>
    %12 = vector.extract_strided_slice %7 {offsets = [0, 64], sizes = [8, 32], strides = [1, 1]} : vector<8x96xf32> to vector<8x32xf32>
    %13 = vector.shape_cast %12 : vector<8x32xf32> to vector<8x4x8xf32>
    %cst_6 = arith.constant 0.353553385 : f32
    %14 = vector.broadcast %cst_6 : f32 to vector<8x4x8xf32>
    %15 = arith.mulf %9, %14 : vector<8x4x8xf32>
    %16 = arith.truncf %15 : vector<8x4x8xf32> to vector<8x4x8xbf16>
    %17 = arith.truncf %11 : vector<8x4x8xf32> to vector<8x4x8xbf16>
    %18 = arith.truncf %13 : vector<8x4x8xf32> to vector<8x4x8xbf16>
    "tpu.trace_start"() <{level = 10 : i32, message = "qhd,khd->hqk"}> : () -> ()
    %cst_7 = arith.constant dense<0.000000e+00> : vector<4x8x8xf32>
    %19 = tpu.matmul %16, %17, %cst_7 {dimension_numbers = #tpu.dot_dimension_numbers<[2], [2], [0], [0], [0, 1, 0, 0, 1, 0], [1], [1]>} : vector<8x4x8xbf16>, vector<8x4x8xbf16>, vector<4x8x8xf32> -> vector<4x8x8xf32>
    "tpu.trace_stop"() : () -> ()
    %cst_8 = arith.constant dense<0xFF800000> : vector<4x8xf32>
    %20 = vector.multi_reduction <maximumf>, %19, %cst_8 [2] : vector<4x8x8xf32> to vector<4x8xf32>
    %21 = vector.shape_cast %20 : vector<4x8xf32> to vector<4x8x1xf32>
    %22 = vector.broadcast %21 : vector<4x8x1xf32> to vector<4x8x8xf32>
    %23 = arith.subf %19, %22 : vector<4x8x8xf32>
    %24 = math.exp %23 : vector<4x8x8xf32>
    %cst_9 = arith.constant dense<0.000000e+00> : vector<4x8xf32>
    %25 = vector.multi_reduction <add>, %24, %cst_9 [2] : vector<4x8x8xf32> to vector<4x8xf32>
    %26 = vector.shape_cast %25 : vector<4x8xf32> to vector<4x8x1xf32>
    %27 = tpu.reciprocal %26 {approx = true} : vector<4x8x1xf32> -> vector<4x8x1xf32>
    %28 = vector.broadcast %27 : vector<4x8x1xf32> to vector<4x8x8xf32>
    %29 = arith.mulf %24, %28 : vector<4x8x8xf32>
    %30 = arith.truncf %29 : vector<4x8x8xf32> to vector<4x8x8xbf16>
    "tpu.trace_start"() <{level = 10 : i32, message = "hqk,khd->qhd"}> : () -> ()
    %cst_10 = arith.constant dense<0.000000e+00> : vector<4x8x8xf32>
    %31 = tpu.matmul %18, %30, %cst_10 {dimension_numbers = #tpu.dot_dimension_numbers<[0], [2], [2], [1], [0, 1, 0, 2, 1, 1], [1], [0]>} : vector<8x4x8xbf16>, vector<4x8x8xbf16>, vector<4x8x8xf32> -> vector<4x8x8xf32>
    %32 = tpu.transpose %31, [2, 0, 1] : vector<4x8x8xf32> -> vector<8x4x8xf32>
    "tpu.trace_stop"() : () -> ()
    %33 = vector.shape_cast %32 : vector<8x4x8xf32> to vector<8x32xf32>
    %34 = arith.truncf %33 : vector<8x32xf32> to vector<8x32xbf16>
    %c0_11 = arith.constant 0 : index
    %c0_12 = arith.constant 0 : index
    %35 = vector.load %arg4[%c0_11, %c0_12] : memref<32x32xbf16, #tpu.memory_space<vmem>>, vector<32x32xbf16>
    %cst_13 = arith.constant dense<0.000000e+00> : vector<8x32xf32>
    %36 = tpu.matmul %34, %35, %cst_13 {dimension_numbers = #tpu.dot_dimension_numbers<[1], [0], [0], [1], [0, 0, 1, 1], [], []>} : vector<8x32xbf16>, vector<32x32xbf16>, vector<8x32xf32> -> vector<8x32xf32>
    %c0_14 = arith.constant 0 : index
    %c0_15 = arith.constant 0 : index
    %37 = vector.load %arg5[%c0_14, %c0_15] : memref<1x32xf32, #tpu.memory_space<vmem>>, vector<1x32xf32>
    %38 = vector.broadcast %37 : vector<1x32xf32> to vector<8x32xf32>
    %39 = arith.addf %36, %38 : vector<8x32xf32>
    %40 = arith.addf %1, %39 : vector<8x32xf32>
    %c0_16 = arith.constant 0 : index
    %c0_17 = arith.constant 0 : index
    %41 = vector.load %arg6[%c0_16, %c0_17] : memref<1x32xf32, #tpu.memory_space<vmem>>, vector<1x32xf32>
    %c0_18 = arith.constant 0 : index
    %c0_19 = arith.constant 0 : index
    %42 = vector.load %arg7[%c0_18, %c0_19] : memref<1x32xf32, #tpu.memory_space<vmem>>, vector<1x32xf32>
    %cst_20 = arith.constant dense<0.000000e+00> : vector<8xf32>
    %43 = vector.multi_reduction <add>, %40, %cst_20 [1] : vector<8x32xf32> to vector<8xf32>
    %44 = vector.shape_cast %43 : vector<8xf32> to vector<8x1xf32>
    %cst_21 = arith.constant 3.200000e+01 : f32
    %45 = vector.broadcast %cst_21 : f32 to vector<8x1xf32>
    %46 = arith.divf %44, %45 : vector<8x1xf32>
    %47 = vector.broadcast %46 : vector<8x1xf32> to vector<8x32xf32>
    %48 = arith.subf %40, %47 : vector<8x32xf32>
    %49 = arith.mulf %48, %48 : vector<8x32xf32>
    %cst_22 = arith.constant dense<0.000000e+00> : vector<8xf32>
    %50 = vector.multi_reduction <add>, %49, %cst_22 [1] : vector<8x32xf32> to vector<8xf32>
    %51 = vector.shape_cast %50 : vector<8xf32> to vector<8x1xf32>
    %cst_23 = arith.constant 3.100000e+01 : f32
    %52 = vector.broadcast %cst_23 : f32 to vector<8x1xf32>
    %53 = arith.divf %51, %52 : vector<8x1xf32>
    %54 = math.sqrt %53 : vector<8x1xf32>
    %cst_24 = arith.constant 9.99999996E-13 : f32
    %55 = vector.broadcast %cst_24 : f32 to vector<8x1xf32>
    %56 = arith.addf %54, %55 : vector<8x1xf32>
    %57 = tpu.reciprocal %56 {approx = true} : vector<8x1xf32> -> vector<8x1xf32>
    %58 = vector.broadcast %57 : vector<8x1xf32> to vector<8x32xf32>
    %59 = arith.mulf %48, %58 : vector<8x32xf32>
    %60 = vector.broadcast %41 : vector<1x32xf32> to vector<8x32xf32>
    %61 = arith.mulf %60, %59 : vector<8x32xf32>
    %62 = vector.broadcast %42 : vector<1x32xf32> to vector<8x32xf32>
    %63 = arith.addf %61, %62 : vector<8x32xf32>
    %c0_25 = arith.constant 0 : index
    %c0_26 = arith.constant 0 : index
    %c0_27 = arith.constant 0 : index
    %64 = vector.load %arg8[%c0_25, %c0_26, %c0_27] : memref<1x8x32xf32, #tpu.memory_space<vmem>>, vector<1x8x32xf32>
    %65 = vector.shape_cast %64 : vector<1x8x32xf32> to vector<8x32xf32>
    %66 = vector.shape_cast %63 : vector<8x32xf32> to vector<1x8x32xf32>
    tpu.vector_store %arg8[%c0_25, %c0_26, %c0_27], %66 {strides = array<i32>} : memref<1x8x32xf32, #tpu.memory_space<vmem>>, vector<1x8x32xf32>,
    return
  }
  func.func @transform_0(%arg0: i32) -> (i32, i32, i32) {
    %c0_i32 = arith.constant 0 : i32
    %c0_i32_0 = arith.constant 0 : i32
    %c0_i32_1 = arith.constant 0 : i32
    return %arg0, %c0_i32, %c0_i32_0 : i32, i32, i32
  }
  func.func @transform_1(%arg0: i32) -> (i32, i32) {
    %c0_i32 = arith.constant 0 : i32
    %c0_i32_0 = arith.constant 0 : i32
    %c0_i32_1 = arith.constant 0 : i32
    return %c0_i32, %c0_i32_0 : i32, i32
  }
  func.func @transform_2(%arg0: i32) -> (i32, i32) {
    %c0_i32 = arith.constant 0 : i32
    %c0_i32_0 = arith.constant 0 : i32
    %c0_i32_1 = arith.constant 0 : i32
    return %c0_i32, %c0_i32_0 : i32, i32
  }
  func.func @transform_3(%arg0: i32) -> (i32, i32) {
    %c0_i32 = arith.constant 0 : i32
    %c0_i32_0 = arith.constant 0 : i32
    %c0_i32_1 = arith.constant 0 : i32
    return %c0_i32, %c0_i32_0 : i32, i32
  }
  func.func @transform_4(%arg0: i32) -> (i32, i32) {
    %c0_i32 = arith.constant 0 : i32
    %c0_i32_0 = arith.constant 0 : i32
    %c0_i32_1 = arith.constant 0 : i32
    return %c0_i32, %c0_i32_0 : i32, i32
  }
  func.func @transform_5(%arg0: i32) -> (i32, i32) {
    %c0_i32 = arith.constant 0 : i32
    %c0_i32_0 = arith.constant 0 : i32
    %c0_i32_1 = arith.constant 0 : i32
    return %c0_i32, %c0_i32_0 : i32, i32
  }
  func.func @transform_6(%arg0: i32) -> (i32, i32) {
    %c0_i32 = arith.constant 0 : i32
    %c0_i32_0 = arith.constant 0 : i32
    %c0_i32_1 = arith.constant 0 : i32
    return %c0_i32, %c0_i32_0 : i32, i32
  }
  func.func @transform_7(%arg0: i32) -> (i32, i32, i32) {
    %c0_i32 = arith.constant 0 : i32
    %c0_i32_0 = arith.constant 0 : i32
    %c0_i32_1 = arith.constant 0 : i32
    return %arg0, %c0_i32, %c0_i32_0 : i32, i32, i32
  }
}

module attributes {stable_mosaic.version = 11 : i64} {
  func.func @_ffn_ln_kernel(%arg0: i32, %arg1: memref<16x32xf32, #tpu.memory_space<vmem>>, %arg2: memref<32x64xbf16, #tpu.memory_space<vmem>>, %arg3: memref<1x64xf32, #tpu.memory_space<vmem>>, %arg4: memref<64x32xbf16, #tpu.memory_space<vmem>>, %arg5: memref<1x32xf32, #tpu.memory_space<vmem>>, %arg6: memref<1x32xf32, #tpu.memory_space<vmem>>, %arg7: memref<1x32xf32, #tpu.memory_space<vmem>>, %arg8: memref<16x32xf32, #tpu.memory_space<vmem>>) attributes {dimension_semantics = [#tpu.dimension_semantics<parallel>], iteration_bounds = array<i64: 1>, scalar_prefetch = 0 : i64, scratch_operands = 0 : i64, tpu.core_type = #tpu.core_type<tc>, window_params = [{transform_indices = @transform_0, window_bounds = array<i64: 16, 32>}, {pipeline_mode = #tpu.pipeline_mode<synchronous>, transform_indices = @transform_1, window_bounds = array<i64: 32, 64>}, {pipeline_mode = #tpu.pipeline_mode<synchronous>, transform_indices = @transform_2, window_bounds = array<i64: 1, 64>}, {pipeline_mode = #tpu.pipeline_mode<synchronous>, transform_indices = @transform_3, window_bounds = array<i64: 64, 32>}, {pipeline_mode = #tpu.pipeline_mode<synchronous>, transform_indices = @transform_4, window_bounds = array<i64: 1, 32>}, {pipeline_mode = #tpu.pipeline_mode<synchronous>, transform_indices = @transform_5, window_bounds = array<i64: 1, 32>}, {pipeline_mode = #tpu.pipeline_mode<synchronous>, transform_indices = @transform_6, window_bounds = array<i64: 1, 32>}, {transform_indices = @transform_7, window_bounds = array<i64: 16, 32>}]} {
    %c0 = arith.constant 0 : index
    %c0_0 = arith.constant 0 : index
    %0 = vector.load %arg1[%c0, %c0_0] : memref<16x32xf32, #tpu.memory_space<vmem>>, vector<16x32xf32>
    %1 = arith.truncf %0 : vector<16x32xf32> to vector<16x32xbf16>
    %c0_1 = arith.constant 0 : index
    %c0_2 = arith.constant 0 : index
    %2 = vector.load %arg2[%c0_1, %c0_2] : memref<32x64xbf16, #tpu.memory_space<vmem>>, vector<32x64xbf16>
    %cst = arith.constant dense<0.000000e+00> : vector<16x64xf32>
    %3 = tpu.matmul %1, %2, %cst {dimension_numbers = #tpu.dot_dimension_numbers<[1], [0], [0], [1], [0, 0, 1, 1], [], []>} : vector<16x32xbf16>, vector<32x64xbf16>, vector<16x64xf32> -> vector<16x64xf32>
    %c0_3 = arith.constant 0 : index
    %c0_4 = arith.constant 0 : index
    %4 = vector.load %arg3[%c0_3, %c0_4] : memref<1x64xf32, #tpu.memory_space<vmem>>, vector<1x64xf32>
    %5 = vector.broadcast %4 : vector<1x64xf32> to vector<16x64xf32>
    %6 = arith.addf %3, %5 : vector<16x64xf32>
    %cst_5 = arith.constant 0.000000e+00 : f32
    %7 = vector.broadcast %cst_5 : f32 to vector<16x64xf32>
    %8 = arith.maximumf %6, %7 : vector<16x64xf32>
    %9 = arith.truncf %8 : vector<16x64xf32> to vector<16x64xbf16>
    %c0_6 = arith.constant 0 : index
    %c0_7 = arith.constant 0 : index
    %10 = vector.load %arg4[%c0_6, %c0_7] : memref<64x32xbf16, #tpu.memory_space<vmem>>, vector<64x32xbf16>
    %cst_8 = arith.constant dense<0.000000e+00> : vector<16x32xf32>
    %11 = tpu.matmul %9, %10, %cst_8 {dimension_numbers = #tpu.dot_dimension_numbers<[1], [0], [0], [1], [0, 0, 1, 1], [], []>} : vector<16x64xbf16>, vector<64x32xbf16>, vector<16x32xf32> -> vector<16x32xf32>
    %c0_9 = arith.constant 0 : index
    %c0_10 = arith.constant 0 : index
    %12 = vector.load %arg5[%c0_9, %c0_10] : memref<1x32xf32, #tpu.memory_space<vmem>>, vector<1x32xf32>
    %13 = vector.broadcast %12 : vector<1x32xf32> to vector<16x32xf32>
    %14 = arith.addf %11, %13 : vector<16x32xf32>
    %15 = arith.addf %0, %14 : vector<16x32xf32>
    %c0_11 = arith.constant 0 : index
    %c0_12 = arith.constant 0 : index
    %16 = vector.load %arg6[%c0_11, %c0_12] : memref<1x32xf32, #tpu.memory_space<vmem>>, vector<1x32xf32>
    %c0_13 = arith.constant 0 : index
    %c0_14 = arith.constant 0 : index
    %17 = vector.load %arg7[%c0_13, %c0_14] : memref<1x32xf32, #tpu.memory_space<vmem>>, vector<1x32xf32>
    %cst_15 = arith.constant dense<0.000000e+00> : vector<16xf32>
    %18 = vector.multi_reduction <add>, %15, %cst_15 [1] : vector<16x32xf32> to vector<16xf32>
    %19 = vector.shape_cast %18 : vector<16xf32> to vector<16x1xf32>
    %cst_16 = arith.constant 3.200000e+01 : f32
    %20 = vector.broadcast %cst_16 : f32 to vector<16x1xf32>
    %21 = arith.divf %19, %20 : vector<16x1xf32>
    %22 = vector.broadcast %21 : vector<16x1xf32> to vector<16x32xf32>
    %23 = arith.subf %15, %22 : vector<16x32xf32>
    %24 = arith.mulf %23, %23 : vector<16x32xf32>
    %cst_17 = arith.constant dense<0.000000e+00> : vector<16xf32>
    %25 = vector.multi_reduction <add>, %24, %cst_17 [1] : vector<16x32xf32> to vector<16xf32>
    %26 = vector.shape_cast %25 : vector<16xf32> to vector<16x1xf32>
    %cst_18 = arith.constant 3.100000e+01 : f32
    %27 = vector.broadcast %cst_18 : f32 to vector<16x1xf32>
    %28 = arith.divf %26, %27 : vector<16x1xf32>
    %29 = math.sqrt %28 : vector<16x1xf32>
    %cst_19 = arith.constant 9.99999996E-13 : f32
    %30 = vector.broadcast %cst_19 : f32 to vector<16x1xf32>
    %31 = arith.addf %29, %30 : vector<16x1xf32>
    %32 = tpu.reciprocal %31 {approx = true} : vector<16x1xf32> -> vector<16x1xf32>
    %33 = vector.broadcast %32 : vector<16x1xf32> to vector<16x32xf32>
    %34 = arith.mulf %23, %33 : vector<16x32xf32>
    %35 = vector.broadcast %16 : vector<1x32xf32> to vector<16x32xf32>
    %36 = arith.mulf %35, %34 : vector<16x32xf32>
    %37 = vector.broadcast %17 : vector<1x32xf32> to vector<16x32xf32>
    %38 = arith.addf %36, %37 : vector<16x32xf32>
    %c0_20 = arith.constant 0 : index
    %c0_21 = arith.constant 0 : index
    %39 = vector.load %arg8[%c0_20, %c0_21] : memref<16x32xf32, #tpu.memory_space<vmem>>, vector<16x32xf32>
    tpu.vector_store %arg8[%c0_20, %c0_21], %38 {strides = array<i32>} : memref<16x32xf32, #tpu.memory_space<vmem>>, vector<16x32xf32>,
    return
  }
  func.func @transform_0(%arg0: i32) -> (i32, i32) {
    %c0_i32 = arith.constant 0 : i32
    %c0_i32_0 = arith.constant 0 : i32
    return %arg0, %c0_i32 : i32, i32
  }
  func.func @transform_1(%arg0: i32) -> (i32, i32) {
    %c0_i32 = arith.constant 0 : i32
    %c0_i32_0 = arith.constant 0 : i32
    %c0_i32_1 = arith.constant 0 : i32
    return %c0_i32, %c0_i32_0 : i32, i32
  }
  func.func @transform_2(%arg0: i32) -> (i32, i32) {
    %c0_i32 = arith.constant 0 : i32
    %c0_i32_0 = arith.constant 0 : i32
    %c0_i32_1 = arith.constant 0 : i32
    return %c0_i32, %c0_i32_0 : i32, i32
  }
  func.func @transform_3(%arg0: i32) -> (i32, i32) {
    %c0_i32 = arith.constant 0 : i32
    %c0_i32_0 = arith.constant 0 : i32
    %c0_i32_1 = arith.constant 0 : i32
    return %c0_i32, %c0_i32_0 : i32, i32
  }
  func.func @transform_4(%arg0: i32) -> (i32, i32) {
    %c0_i32 = arith.constant 0 : i32
    %c0_i32_0 = arith.constant 0 : i32
    %c0_i32_1 = arith.constant 0 : i32
    return %c0_i32, %c0_i32_0 : i32, i32
  }
  func.func @transform_5(%arg0: i32) -> (i32, i32) {
    %c0_i32 = arith.constant 0 : i32
    %c0_i32_0 = arith.constant 0 : i32
    %c0_i32_1 = arith.constant 0 : i32
    return %c0_i32, %c0_i32_0 : i32, i32
  }
  func.func @transform_6(%arg0: i32) -> (i32, i32) {
    %c0_i32 = arith.constant 0 : i32
    %c0_i32_0 = arith.constant 0 : i32
    %c0_i32_1 = arith.constant 0 : i32
    return %c0_i32, %c0_i32_0 : i32, i32
  }
  func.func @transform_7(%arg0: i32) -> (i32, i32) {
    %c0_i32 = arith.constant 0 : i32
    %c0_i32_0 = arith.constant 0 : i32
    return %arg0, %c0_i32 : i32, i32
  }
}

</mosaic_0001>

<bundles_post_ra>
// kernel: encoder_forward.5
= control target key start
LH: loop header
LB: loop body
LE: loop exit
PB: predicated region body
PF: predicated region fallthrough
CT: control target
= control target key end

     0   :  { %8 = vsyncpa [#allocation3], 0  ;;  %s192_s0 = inlined_call_operand.vmem [shape: f32[16,16], index: 0, kind: input, shape index: {}]   ;;  %s193_s1 = inlined_call_operand.hbm [shape: bf16[16,32], index: 1, kind: input, shape index: {}]   ;;  %s194_s2 = inlined_call_operand.hbm [shape: f32[1,32], index: 2, kind: input, shape index: {}]   ;;  %s195_s3 = inlined_call_operand.vmem [shape: f32[16,32], index: 3, kind: output, shape index: {}]  }
   0x1   :  { %s16_s14 = sshll.u32 %s193_s1, 4  ;;  %s17_s14 = int_to_ptr.hbm [resolvable:$true] %s16_s14 }
   0x2   :  { %9 = vsyncpa [#allocation5], 0  ;;  %s150_s15 = smov [#allocation2]   ;;  %s30_s19 = sshll.u32 %s194_s2, 4  ;;  %s31_s19 = int_to_ptr.hbm [resolvable:$true] %s30_s19 }
   0x3   :  { %s18_s16 = sshll.u32 %s150_s15, 4  ;;  %s151_s20 = smov 64   ;;  %s19_s16 = int_to_ptr.vmem [resolvable:$true] %s18_s16 }
   0x4   :  { %s152_s21 = smov 4   ;;  %s153_s22 = smov [#allocation4]  }
   0x5   :  { %24 = dma.hbm_to_vmem [thread:$0]  %s17_s14, 128, %s19_s16, [#allocation3], %s151_s20, %s151_s20, %s152_s21  }
   0x6   :  { %s32_s23 = sshll.u32 %s153_s22, 4  ;;  %s33_s23 = int_to_ptr.vmem [resolvable:$true] %s32_s23 }
   0x7   :  { %35 = dma.hbm_to_vmem [thread:$0]  %s31_s19, 16, %s33_s23, [#allocation5]  }
   0x8   :  { %146 = dma.done.wait [#allocation3], 128  }
   0x9   :  { %147 = vsyncadd [#allocation3], 4294967168 }
   0xa   :  { %148 = dma.done.wait [#allocation5], 16  }
   0xb   :  { %149 = vsyncadd [#allocation5], 4294967280  ;;  %v92_v0 = vld [vmem:[#allocation2] sm:$0xff]  ;;  %v46_v2 = vld [vmem:[%s192_s0 + $0x8] sm:$0xff]  ;;  %vm60_vm0 = vcmask 130048   ;;  %vm78_vm1 = vcmask 261120  }
   0xc   :  { %v45_v1 = vld [vmem:[%s192_s0] sm:$0xff]  ;;  %71 = vmatpush.bf16.msra.mxu0 %v92_v0  ;;  %v97_v4 = vld [vmem:[#allocation4] ss:$0 sm:$0xff] }
   0xd   :  { %v47_v3 = vpack.c.bf16 %v46_v2, %v45_v1 }
   0xf   :  { %91 = vmatmul.msk.bf16.vlgmr.msra.gmra.mxu0 %vm60_vm0, %v47_v3 }
  0x8c   :  { %v73_v5 = vpop.f32.mrf.mxu0 }
  0x8d   :  { %v74_v6 = vadd.f32 %v97_v4, %v73_v5 }
  0x8f   :  { %79 = vst.msk [vmem:[%s195_s3] sm:$0xff] %vm78_vm1, %v74_v6 }
  0x94   :  { %v75_v7 = vpop.f32.mrf.mxu0 }
  0x95   :  { %v76_v8 = vadd.f32 %v97_v4, %v75_v7 }
  0x97   :  { %80 = vst.msk [vmem:[%s195_s3 + $0x8] sm:$0xff] %vm78_vm1, %v76_v8 }
  0x98   :  { %85 = vsyncpa [#allocation3], 1 }
  0x99   :  { %86 = vsyncpa [#allocation5], 1 }

// kernel: encoder_forward.7
= control target key start
LH: loop header
LB: loop body
LE: loop exit
PB: predicated region body
PF: predicated region fallthrough
CT: control target
= control target key end

     0   :  { %vm50_vm0 = vcmask 261120   ;;  %vm107_vm1 = vcmask 523264   ;;  %v259_v26 = vmov 32.0   ;;  %v260_v43 = vmov 31.0   ;;  %s350_s1 = inlined_call_operand.vmem [shape: bf16[32,64], index: 1, kind: input, shape index: {}]   ;;  %s351_s0 = inlined_call_operand.vmem [shape: f32[16,32], index: 0, kind: input, shape index: {}]   ;;  %s352_s2 = inlined_call_operand.vmem [shape: f32[1,64], index: 2, kind: input, shape index: {}]   ;;  %s353_s4 = inlined_call_operand.vmem [shape: f32[1,32], index: 4, kind: input, shape index: {}]   ;;  %s354_s3 = inlined_call_operand.vmem [shape: bf16[64,32], index: 3, kind: input, shape index: {}]   ;;  %s355_s5 = inlined_call_operand.vmem [shape: f32[1,32], index: 5, kind: input, shape index: {}]   ;;  %s356_s6 = inlined_call_operand.vmem [shape: f32[1,32], index: 6, kind: input, shape index: {}]   ;;  %s357_s7 = inlined_call_operand.vmem [shape: f32[16,32], index: 7, kind: output, shape index: {}]  }
   0x1   :  { %v236_v0 = vld [vmem:[%s350_s1 + $0x8] sm:$0xff]  ;;  %v235_v1 = vld [vmem:[%s350_s1] sm:$0xff]  ;;  %v240_v5 = vld [vmem:[%s354_s3 + $0x18] sm:$0xff]  ;;  %247 = vrcp.f32 %v259_v26 }
   0x2   :  { %60 = vmatpush.bf16.msra.mxu0 %v236_v0  ;;  %v27_v2 = vld [vmem:[%s351_s0] sm:$0xff]  ;;  %v28_v3 = vld [vmem:[%s351_s0 + $0x8] sm:$0xff]  ;;  %115 = vmatpush.bf16.msra.mxu1 %v240_v5  ;;  %v239_v6 = vld [vmem:[%s354_s3 + $0x10] sm:$0xff]  ;;  %249 = vrcp.f32 %v260_v43 }
   0x3   :  { %v29_v4 = vpack.c.bf16 %v28_v3, %v27_v2  ;;  %v238_v7 = vld [vmem:[%s354_s3 + $0x8] sm:$0xff]  ;;  %v237_v8 = vld [vmem:[%s354_s3] sm:$0xff] }
   0x4   :  { %v243_v10 = vld [vmem:[%s352_s2] ss:$0 sm:$0xff] }
   0x5   :  { %v244_v17 = vld [vmem:[%s353_s4] ss:$0 sm:$0xff] }
   0x6   :  { %61 = vmatpush.bf16.msra.mxu0 %v235_v1  ;;  %116 = vmatpush.bf16.msra.mxu1 %v239_v6 }
   0x7   :  { %v248_v27 = vpop.eup %247 }
   0x8   :  { %v136_v28 = vmul.f32 32.0, %v248_v27  ;;  %vm140_vm2 = vweird.f32 %v248_v27  ;;  %v250_v44 = vpop.eup %249 }
   0x9   :  { %217 = vmatmul.msk.bf16.vlgmr.msra.gmra.mxu0 %vm50_vm0, %v29_v4  ;;  %v155_v45 = vmul.f32 31.0, %v250_v44  ;;  %vm159_vm3 = vweird.f32 %v250_v44 }
   0xa   :  { %117 = vmatpush.bf16.msra.mxu1 %v238_v7  ;;  %v137_v29 = vsub.f32 1.0, %v136_v28 }
   0xb   :  { %v156_v46 = vsub.f32 1.0, %v155_v45 }
   0xc   :  { %v138_v30 = vmul.f32 %v248_v27, %v137_v29 }
   0xd   :  { %v157_v47 = vmul.f32 %v250_v44, %v156_v46 }
   0xe   :  { %118 = vmatpush.bf16.msra.mxu1 %v237_v8  ;;  %v139_v31 = vadd.f32 %v248_v27, %v138_v30 }
   0xf   :  { %v158_v48 = vadd.f32 %v250_v44, %v157_v47 }
  0x10   :  { %v141_v32 = vsel %vm140_vm2, %v248_v27, %v139_v31 }
  0x11   :  { %v160_v49 = vsel %vm159_vm3, %v250_v44, %v158_v48 }
  0x86   :  { %v63_v9 = vpop.f32.mrf.mxu0 }
  0x87   :  { %v64_v11 = vadd.f32 %v243_v10, %v63_v9 }
  0x89   :  { %v68_v14 = vmax.f32 %v64_v11, 0.0 }
  0x8e   :  { %v65_v12 = vpop.f32.mrf.mxu0 }
  0x8f   :  { %v66_v13 = vadd.f32 %v243_v10, %v65_v12  ;;  %v245_v10 = vld [vmem:[%s355_s5] ss:$0 sm:$0xff] }
  0x91   :  { %v69_v15 = vmax.f32 %v66_v13, 0.0 }
  0x93   :  { %v70_v16 = vpack.c.bf16 %v69_v15, %v68_v14  ;;  %v246_v14 = vld [vmem:[%s356_s6] ss:$0 sm:$0xff] }
  0x95   :  { %234 = vmatmul.msk.bf16.vlgmr.msra.gmra.mxu1 %vm107_vm1, %v70_v16 }
 0x112   :  { %v120_v18 = vpop.f32.mrf.mxu1 }
 0x113   :  { %v121_v19 = vadd.f32 %v244_v17, %v120_v18 }
 0x115   :  { %v125_v20 = vadd.f32 %v121_v19, %v27_v2 }
 0x117   :  { %v129_v21 = vsel %vm50_vm0, %v125_v20, 0.0 }
 0x118   :  { %130 = vadd.xlane.f32.xlu0 %v129_v21 }
 0x11a   :  { %v122_v22 = vpop.f32.mrf.mxu1 }
 0x11b   :  { %v123_v23 = vadd.f32 %v244_v17, %v122_v22 }
 0x11d   :  { %v126_v24 = vadd.f32 %v123_v23, %v28_v3 }
 0x11f   :  { %v132_v25 = vsel %vm50_vm0, %v126_v24, 0.0 }
 0x120   :  { %133 = vadd.xlane.f32.xlu0 %v132_v25 }
 0x18b   :  { %v131_v33 = vpop.xlane.xlu0 %130 }
 0x18c   :  { %v142_v34 = vmul.f32 %v141_v32, %v131_v33 }
 0x18e   :  { %v144_v35 = vsub.f32 %v125_v20, %v142_v34 }
 0x190   :  { %v146_v36 = vmul.f32 %v144_v35, %v144_v35 }
 0x192   :  { %v148_v37 = vsel %vm50_vm0, %v146_v36, 0.0 }
 0x193   :  { %149 = vadd.xlane.f32.xlu1 %v148_v37  ;;  %v134_v38 = vpop.xlane.xlu0 %133 }
 0x194   :  { %v143_v39 = vmul.f32 %v141_v32, %v134_v38 }
 0x196   :  { %v145_v40 = vsub.f32 %v126_v24, %v143_v39 }
 0x198   :  { %v147_v41 = vmul.f32 %v145_v40, %v145_v40 }
 0x19a   :  { %v151_v42 = vsel %vm50_vm0, %v147_v41, 0.0 }
 0x19b   :  { %152 = vadd.xlane.f32.xlu1 %v151_v42 }
 0x206   :  { %v150_v50 = vpop.xlane.xlu1 %149 }
 0x207   :  { %v161_v51 = vmul.f32 %v160_v49, %v150_v50 }
 0x209   :  { %251 = vrsqrt.f32 %v161_v51  ;;  %vm170_vm4 = vcmp.eq.f32.partialorder %v161_v51, inf  ;;  %v173_v0 = vand.u32 2147483648, %v161_v51  ;;  %vm172_vm5 = vcmp.eq.f32.partialorder %v161_v51, 0.0 }
 0x20e   :  { %v153_v52 = vpop.xlane.xlu1 %152 }
 0x20f   :  { %v252_v53 = vpop.eup %251  ;;  %v162_v54 = vmul.f32 %v160_v49, %v153_v52 }
 0x210   :  { %v164_v55 = vmul.f32 %v252_v53, %v161_v51 }
 0x211   :  { %253 = vrsqrt.f32 %v162_v54  ;;  %vm182_vm6 = vcmp.eq.f32.partialorder %v162_v54, inf  ;;  %v185_v8 = vand.u32 2147483648, %v162_v54  ;;  %vm184_vm7 = vcmp.eq.f32.partialorder %v162_v54, 0.0 }
 0x212   :  { %v165_v56 = vmul.f32 %v252_v53, %v164_v55 }
 0x214   :  { %v166_v57 = vmul.f32 0.5, %v165_v56 }
 0x216   :  { %v167_v58 = vsub.f32 1.5, %v166_v57 }
 0x217   :  { %v254_v59 = vpop.eup %253 }
 0x218   :  { %v168_v60 = vmul.f32 %v252_v53, %v167_v58  ;;  %v176_v61 = vmul.f32 %v254_v59, %v162_v54 }
 0x21a   :  { %v169_v62 = vmul.f32 %v168_v60, %v161_v51  ;;  %v177_v63 = vmul.f32 %v254_v59, %v176_v61 }
 0x21c   :  { %v171_v1 = vsel %vm170_vm4, %v161_v51, %v169_v62  ;;  %v178_v2 = vmul.f32 0.5, %v177_v63 }
 0x21d   :  { %v174_v3 = vsel %vm172_vm5, %v173_v0, %v171_v1 }
 0x21e   :  { %v187_v4 = vadd.f32 1e-12, %v174_v3  ;;  %v179_v5 = vsub.f32 1.5, %v178_v2 }
 0x220   :  { %255 = vrcp.f32 %v187_v4  ;;  %v180_v6 = vmul.f32 %v254_v59, %v179_v5 }
 0x222   :  { %v181_v7 = vmul.f32 %v180_v6, %v162_v54 }
 0x224   :  { %v183_v9 = vsel %vm182_vm6, %v162_v54, %v181_v7 }
 0x225   :  { %v186_v11 = vsel %vm184_vm7, %v185_v8, %v183_v9 }
 0x226   :  { %v256_v12 = vpop.eup %255  ;;  %v188_v13 = vadd.f32 1e-12, %v186_v11 }
 0x227   :  { %v191_v15 = vmul.f32 %v256_v12, %v144_v35 }
 0x228   :  { %257 = vrcp.f32 %v188_v13 }
 0x229   :  { %v196_v16 = vmul.f32 %v245_v10, %v191_v15 }
 0x22b   :  { %v201_v17 = vadd.f32 %v246_v14, %v196_v16 }
 0x22d   :  { %203 = vst.msk [vmem:[%s357_s7] sm:$0xff] %vm50_vm0, %v201_v17 }
 0x22e   :  { %v258_v18 = vpop.eup %257 }
 0x22f   :  { %v192_v19 = vmul.f32 %v258_v18, %v145_v40 }
 0x231   :  { %v197_v20 = vmul.f32 %v245_v10, %v192_v19 }
 0x233   :  { %v202_v21 = vadd.f32 %v246_v14, %v197_v20 }
 0x235   :  { %204 = vst.msk [vmem:[%s357_s7 + $0x8] sm:$0xff] %vm50_vm0, %v202_v21 }

// kernel: encoder_forward.6
= control target key start
LH: loop header
LB: loop body
LE: loop exit
PB: predicated region body
PF: predicated region fallthrough
CT: control target
= control target key end

     0   :  { %12 = vsyncpa [#allocation3], 0  ;;  %s2947_s0 = inlined_call_operand.vmem [shape: f32[2,8,32], index: 0, kind: input, shape index: {}]   ;;  %s2948_s1 = inlined_call_operand.hbm [shape: bf16[32,96], index: 1, kind: input, shape index: {}]   ;;  %s2949_s2 = inlined_call_operand.vmem [shape: f32[1,96], index: 2, kind: input, shape index: {}]   ;;  %s2950_s3 = inlined_call_operand.hbm [shape: bf16[32,32], index: 3, kind: input, shape index: {}]   ;;  %s2951_s4 = inlined_call_operand.hbm [shape: f32[1,32], index: 4, kind: input, shape index: {}]   ;;  %s2952_s5 = inlined_call_operand.hbm [shape: f32[1,32], index: 5, kind: input, shape index: {}]   ;;  %s2953_s6 = inlined_call_operand.hbm [shape: f32[1,32], index: 6, kind: input, shape index: {}]   ;;  %s2954_s7 = inlined_call_operand.vmem [shape: f32[2,8,32], index: 7, kind: output, shape index: {}]  }
   0x1   :  { %13 = vsyncpa [#allocation5], 0 }
   0x2   :  { %14 = vsyncpa [#allocation8], 0  ;;  %s2583_s24 = smov 0  }
   0x3 LB: > { %s2589_s25 = sadd.s32 4294967295, %s2522_s24   ;;  %p2121_p0 = scmp.ge.s32.totalorder %s2522_s24, 1  ;;  %s2522_s24 = sphi %s2583_s24, %s20_s24  }
   0x4   : > { %p203_p1 = scmp.lt.s32.totalorder %s2522_s24, 3  ;;  %p2204_p2 = scmp.eq.s32.totalorder %s2589_s25, 0 }
   0x5   : > { %s231_s28 = sshll.u32 %s2950_s3, 4  ;;  %s258_s9 = sshll.u32 %s2952_s5, 4  ;;  %s232_s28 = int_to_ptr.hbm [resolvable:$true] %s231_s28  ;;  %s259_s9 = int_to_ptr.hbm [resolvable:$true] %s258_s9 }
   0x6   : > { %p2597_p3 = pnand %p2121_p0, %p203_p1  ;;  %s2524_s10 = smov [#allocation4]  }
   0x7   : > { %s233_s11 = sshll.u32 %s2524_s10, 4  ;;  %s2525_s13 = smov [#allocation7]   ;;  %s234_s11 = int_to_ptr.vmem [resolvable:$true] %s233_s11 }
   0x8   : > { %p2188_p4 = pneg %p2597_p3  ;;  %s260_s14 = sshll.u32 %s2525_s13, 4  ;;  %s261_s14 = int_to_ptr.vmem [resolvable:$true] %s260_s14 }
   0x9   : > { %s214_s17 = sshll.u32 %s2948_s1, 4  ;;  %s2526_s18 = smov 64   ;;  %s215_s17 = int_to_ptr.hbm [resolvable:$true] %s214_s17 }
   0xa   : > { %p2608_p5 = pnand %p2204_p2, %p2188_p4  ;;  %s2527_s19 = smov 4  }
   0xb   : > { %s2528_s20 = smov [#allocation2]   ;;  %s246_s26 = sshll.u32 %s2951_s4, 4  ;;  %s247_s26 = int_to_ptr.hbm [resolvable:$true] %s246_s26 }
   0xc   : > { %2194 = dma.hbm_to_vmem [thread:$0]  (!%p2608_p5), %s232_s28, 256, %s234_s11, [#allocation5], %s2526_s18, %s2526_s18, %s2527_s19  }
   0xd   : > { %2200 = dma.hbm_to_vmem [thread:$0]  (!%p2608_p5), %s259_s9, 16, %s261_s14, [#allocation8]  }
   0xe   : > { %s216_s21 = sshll.u32 %s2528_s20, 4  ;;  %s270_s8 = sshll.u32 %s2953_s6, 4  ;;  %s217_s21 = int_to_ptr.vmem [resolvable:$true] %s216_s21  ;;  %s271_s8 = int_to_ptr.hbm [resolvable:$true] %s270_s8 }
   0xf   : > { %2191 = dma.hbm_to_vmem [thread:$0]  (!%p2608_p5), %s215_s17, 256, %s217_s21, [#allocation3], %s2526_s18, %s2526_s18, %s2527_s19  }
  0x10   : > { %s2529_s10 = smov [#allocation6]   ;;  %s2530_s9 = smov [#allocation9]  }
  0x11   : > { %s248_s28 = sshll.u32 %s2529_s10, 4  ;;  %s272_s11 = sshll.u32 %s2530_s9, 4  ;;  %s249_s28 = int_to_ptr.vmem [resolvable:$true] %s248_s28  ;;  %s273_s11 = int_to_ptr.vmem [resolvable:$true] %s272_s11 }
  0x12   : > { %2197 = dma.hbm_to_vmem [thread:$0]  (!%p2608_p5), %s247_s26, 16, %s249_s28, [#allocation5]  }
  0x13   : > { %2203 = dma.hbm_to_vmem [thread:$0]  (!%p2608_p5), %s271_s8, 16, %s273_s11, [#allocation8]  }
  0x14   : > { %292 = sbr.rel (%p2597_p3) target bundleno = 2390 (0x956), region = 48 }
  0x19   : > { %2509 = dma.done.wait (%p2204_p2), [#allocation3], 256  }
  0x1a   : > { %2511 = vsyncadd (%p2204_p2), [#allocation3], 4294967040 }
  0x1b   : > { %2513 = dma.done.wait (%p2204_p2), [#allocation5], 272  }
  0x1c   : > { %2515 = vsyncadd (%p2204_p2), [#allocation5], 4294967024 }
  0x1d   : > { %2517 = dma.done.wait (%p2204_p2), [#allocation8], 32  }
  0x1e   : > { %2519 = vsyncadd (%p2204_p2), [#allocation8], 4294967264  ;;  %p343_p6 = scmp.lt.s32.totalorder %s2589_s25, 1  ;;  %v2165_v0 = vld [vmem:[#allocation2 + $0x8] sm:$0xff]  ;;  %v2164_v1 = vld [vmem:[#allocation2] sm:$0xff]  ;;  %vm374_vm0 = vcmask 261120  }
  0x1f   : > { %384 = vmatpush.bf16.msra.mxu0 %v2165_v0  ;;  %v2325_v4 = vld [vmem:[%s2949_s2] ss:$0 sm:$0xff]  ;;  %s2531_s17 = smov 112   ;;  %s2532_s18 = smov 120   ;;  %v2535_v16 = vmov 1983009808  }
  0x20   : > { %s2958_s25 = smov (!%p343_p6, %s2589_s25), 1  ;;  %s2533_s19 = smov 104   ;;  %v407_v17 = vunpack.c.l.s4 %v2535_v16  ;;  %vm402_vm1 = vcmask 1047556   ;;  %v2536_v24 = vmov 1934713408   ;;  %vm1079_vm2 = vcmask 1043456  }
  0x21   : > { %s2134_s29 = sshll.u32 %s2958_s25, 3  ;;  %s2534_s20 = smov 96   ;;  %v431_v25 = vunpack.c.l.s4 %v2536_v24  ;;  %vm1075_vm3 = vcmask 64512   ;;  %vm1924_vm4 = vcmask 130048   ;;  %vm1926_vm5 = vcmask 195584  }
  0x22   : > { %s2655_s14 = scalar_lea.vmem %s2947_s0, %s2134_s29  ;;  %v2683_v23 = vunpack.c.0.s8 %v407_v17  ;;  %s2537_s21 = smov 64  }
  0x23   : > { %v352_v2 = vld [vmem:[%s2655_s14] sm:$0xff]  ;;  %385 = vmatpush.bf16.msra.mxu0 %v2164_v1  ;;  %v2693_v37 = vunpack.c.0.s8 %v431_v25  ;;  %s2538_s22 = smov 24   ;;  %s2539_s23 = smov 16  }
  0x24   : > { %v353_v3 = vpack.c.bf16 %v352_v2, %v352_v2  ;;  %s2540_s26 = smov 8   ;;  %s350_s8 = scalar_lea.vmem %s2954_s7, %s2134_s29 }
  0x26   : > { %2144 = vmatmul.msk.bf16.vlgmr.msra.gmra.mxu0 %vm374_vm0, %v353_v3 }
  0xa3   : > { %v387_v5 = vpop.f32.mrf.mxu0 }
  0xa4   : > { %v2662_v6 = vadd.f32 %v2325_v4, %v387_v5 }
  0xa6   : > { %395 = vrot.lane.b32.xlu1 %v2662_v6, %s2531_s17  ;;  %392 = vrot.lane.b32.xlu0 %v2662_v6, %s2532_s18 }
  0xab   : > { %v389_v7 = vpop.f32.mrf.mxu0 }
  0xae   : > { %398 = vrot.lane.b32.xlu0 %v2662_v6, %s2533_s19 }
 0x118   : > { %v2667_v8 = vpop.permute.xlu0 %392  ;;  %v2674_v10 = vpop.permute.xlu1 %395 }
 0x119   : > { %v2671_v9 = vpack.i.bf16 %v2662_v6, %v2667_v8 }
 0x11b   : > { %2244 = vrot.lane.b32.xlu1 %v2671_v9, %s2534_s20 }
 0x120   : > { %v2676_v11 = vpop.permute.xlu0 %398 }
 0x121   : > { %v2680_v12 = vpack.i.bf16 %v2674_v10, %v2676_v11 }
 0x123   : > { %2249 = vrot.lane.b32.xlu2 %v2680_v12, %s2534_s20 }
 0x17d   : > { %v2250_v13 = vpop.permute.xlu2 %2249 }
 0x17e   : > { %v2252_v14 = vunpack.i.h.bf16 %v2250_v13  ;;  %v2251_v15 = vunpack.i.l.bf16 %v2250_v13 }
 0x180   : > { %v470_v19 = vrot.slane %v2252_v14, 4  ;;  %v482_v20 = vrot.slane %v2251_v15, 4 }
 0x18d   : > { %v2245_v18 = vpop.permute.xlu1 %2244 }
 0x18e   : > { %v2247_v21 = vunpack.i.h.bf16 %v2245_v18  ;;  %v2246_v22 = vunpack.i.l.bf16 %v2245_v18 }
 0x190   : > { %v472_v26 = vrot.slane %v2247_v21, 4  ;;  %v471_v27 = vsel %vm402_vm1, %v470_v19, %v2247_v21  ;;  %v483_v28 = vsel %vm402_vm1, %v482_v20, %v2246_v22  ;;  %v484_v29 = vrot.slane %v2246_v22, 4 }
 0x191   : > { %v489_v30 = vperm.slane %v483_v28, %v2683_v23  ;;  %v477_v33 = vperm.slane %v471_v27, %v2683_v23 }
 0x192   : > { %v473_v31 = vsel %vm402_vm1, %v2252_v14, %v472_v26  ;;  %v485_v32 = vsel %vm402_vm1, %v2251_v15, %v484_v29 }
 0x193   : > { %v481_v34 = vperm.slane %v473_v31, %v2683_v23  ;;  %v493_v35 = vperm.slane %v485_v32, %v2683_v23  ;;  %v494_v36 = vrot.slane %v489_v30, 4  ;;  %v496_v52 = vrot.slane %v477_v33, 4 }
 0x195   : > { %v506_v38 = vrot.slane %v493_v35, 4  ;;  %v508_v39 = vrot.slane %v481_v34, 4  ;;  %v495_v40 = vsel %vm402_vm1, %v494_v36, %v477_v33  ;;  %v497_v59 = vsel %vm402_vm1, %v489_v30, %v496_v52 }
 0x196   : > { %v501_v41 = vperm.slane %v495_v40, %v2693_v37  ;;  %v505_v60 = vperm.slane %v497_v59, %v2693_v37 }
 0x197   : > { %v509_v42 = vsel %vm402_vm1, %v493_v35, %v508_v39  ;;  %v507_v43 = vsel %vm402_vm1, %v506_v38, %v481_v34 }
 0x198   : > { %v518_v44 = vrot.slane %v501_v41, 4  ;;  %v517_v45 = vperm.slane %v509_v42, %v2693_v37  ;;  %v513_v46 = vperm.slane %v507_v43, %v2693_v37  ;;  %v610_v50 = vpack.c.bf16 %v501_v41, %v501_v41 }
 0x199   : > { %v520_v61 = vrot.slane %v505_v60, 4  ;;  %v612_v63 = vpack.c.bf16 %v505_v60, %v505_v60 }
 0x19a   : > { %v519_v47 = vsel %vm402_vm1, 0.0, %v518_v44  ;;  %v524_v48 = vrot.slane %v517_v45, 4  ;;  %v522_v49 = vrot.slane %v513_v46, 4  ;;  %v616_v55 = vpack.c.bf16 %v517_v45, %v517_v45 }
 0x19b   : > { %v611_v51 = vpack.c.bf16 %v519_v47, %v519_v47  ;;  %v614_v58 = vpack.c.bf16 %v513_v46, %v513_v46  ;;  %v521_v62 = vsel %vm402_vm1, 0.0, %v520_v61 }
 0x19c   : > { %v525_v53 = vsel %vm402_vm1, 0.0, %v524_v48  ;;  %v523_v54 = vsel %vm402_vm1, 0.0, %v522_v49  ;;  %v613_v0 = vpack.c.bf16 %v521_v62, %v521_v62 }
 0x19d   : > { %2259 = vxpose.binary.xlu0.c.b16.start.end [1/2] (short) (narrow) %v611_v51, %v610_v50, 16  ;;  %v617_v56 = vpack.c.bf16 %v525_v53, %v525_v53  ;;  %v615_v57 = vpack.c.bf16 %v523_v54, %v523_v54 }
 0x19f   : > { %2253 = vxpose.binary.xlu1.c.b16.start.end [1/2] (short) (narrow) %v617_v56, %v616_v55, 16 }
 0x1a0   : > { %2256 = vxpose.binary.xlu2.c.b16.start.end [1/2] (short) (narrow) %v615_v57, %v614_v58, 16 }
 0x1b0   : > { %2262 = vxpose.binary.xlu2.c.b16.start.end [1/2] (short) (narrow) %v613_v0, %v612_v63, 16  ;;  %v404_v0 = vrot.slane %v2662_v6, 4 }
 0x219   : > { %2269 = vrot.lane.b32.xlu2 %v2671_v9, %s2537_s21 }
 0x241   : > { %v2257_v1 = vpop.trf.xlu2 }
 0x242   : > { %v807_v5 = vrot.slane %v2257_v1, 4  ;;  %v401_v1 = vrot.slane %v2674_v10, 4 }
 0x249   : > { %v2258_v2 = vpop.trf.xlu2  ;;  %v2260_v3 = vpop.trf.xlu0 }
 0x24a   : > { %v808_v13 = vsel %vm402_vm1, %v807_v5, %v2260_v3  ;;  %v835_v16 = vrot.slane %v2258_v2, 4  ;;  %v405_v2 = vsel %vm402_vm1, %v2674_v10, %v404_v0  ;;  %v416_v3 = vrot.slane %v2667_v8, 4 }
 0x24b   : > { %v2254_v4 = vpop.trf.xlu1  ;;  %v812_v18 = vperm.slane %v808_v13, %v2683_v23  ;;  %v403_v13 = vsel %vm402_vm1, %v401_v1, %v2662_v6 }
 0x24c   : > { %v813_v7 = vrot.slane %v2254_v4, 4  ;;  %v414_v4 = vrot.slane %v2676_v11, 4  ;;  %v417_v5 = vsel %vm402_vm1, %v2676_v11, %v416_v3 }
 0x24d   : > { %v821_v24 = vrot.slane %v812_v18, 4 }
 0x251   : > { %v2263_v14 = vpop.trf.xlu2  ;;  %v2261_v15 = vpop.trf.xlu0 }
 0x252   : > { %v814_v17 = vsel %vm402_vm1, %v813_v7, %v2263_v14  ;;  %v836_v9 = vsel %vm402_vm1, %v835_v16, %v2261_v15  ;;  %v413_v7 = vperm.slane %v405_v2, %v2683_v23  ;;  %v415_v14 = vsel %vm402_vm1, %v414_v4, %v2667_v8 }
 0x253   : > { %v818_v19 = vperm.slane %v814_v17, %v2683_v23  ;;  %v2255_v20 = vpop.trf.xlu1  ;;  %v840_v26 = vperm.slane %v836_v9, %v2683_v23  ;;  %v409_v15 = vperm.slane %v403_v13, %v2683_v23  ;;  %v421_v16 = vperm.slane %v415_v14, %v2683_v23 }
 0x254   : > { %v841_v22 = vrot.slane %v2255_v20, 4  ;;  %v440_v10 = vrot.slane %v413_v7, 4 }
 0x255   : > { %v819_v21 = vrot.slane %v818_v19, 4  ;;  %v822_v27 = vsel %vm402_vm1, %v818_v19, %v821_v24  ;;  %v849_v31 = vrot.slane %v840_v26, 4  ;;  %v428_v19 = vrot.slane %v409_v15, 4 }
 0x256   : > { %v830_v33 = vperm.slane %v822_v27, %v2693_v37  ;;  %v426_v20 = vrot.slane %v421_v16, 4 }
 0x257   : > { %v820_v25 = vsel %vm402_vm1, %v819_v21, %v812_v18  ;;  %v429_v9 = vsel %vm402_vm1, %v421_v16, %v428_v19 }
 0x258   : > { %v826_v29 = vperm.slane %v820_v25, %v2693_v37  ;;  %v883_v40 = vshrl.u32 %v830_v33, 16  ;;  %v833_v57 = vrot.slane %v830_v33, 4  ;;  %v437_v21 = vperm.slane %v429_v9, %v2693_v37 }
 0x259   : > { %v2264_v28 = vpop.trf.xlu2  ;;  %v427_v24 = vsel %vm402_vm1, %v426_v20, %v409_v15 }
 0x25a   : > { %v842_v30 = vsel %vm402_vm1, %v841_v22, %v2264_v28  ;;  %v831_v36 = vrot.slane %v826_v29, 4  ;;  %v867_v43 = vshrl.u32 %v826_v29, 16  ;;  %v834_v59 = vsel %vm402_vm1, 0, %v833_v57 }
 0x25b   : > { %v846_v32 = vperm.slane %v842_v30, %v2683_v23  ;;  %v891_v61 = vshrl.u32 %v834_v59, 16  ;;  %v452_v27 = vrot.slane %v437_v21, 4 }
 0x25c   : > { %v832_v44 = vsel %vm402_vm1, 0, %v831_v36 }
 0x25d   : > { %v847_v34 = vrot.slane %v846_v32, 4  ;;  %v850_v35 = vsel %vm402_vm1, %v846_v32, %v849_v31  ;;  %v875_v52 = vshrl.u32 %v832_v44, 16 }
 0x25e   : > { %v858_v38 = vperm.slane %v850_v35, %v2693_v37 }
 0x25f   : > { %v848_v39 = vsel %vm402_vm1, %v847_v34, %v840_v26  ;;  %v433_v26 = vperm.slane %v427_v24, %v2693_v37  ;;  %v453_v34 = vsel %vm402_vm1, 0.0, %v452_v27 }
 0x260   : > { %v884_v41 = vshrl.u32 %v858_v38, 16  ;;  %v854_v42 = vperm.slane %v848_v39, %v2693_v37  ;;  %v881_v45 = vpack.i.b16 %v858_v38, %v830_v33  ;;  %v861_v56 = vrot.slane %v858_v38, 4 }
 0x261   : > { %v450_v31 = vrot.slane %v433_v26, 4 }
 0x262   : > { %v885_v46 = vpack.i.b16 %v884_v41, %v883_v40  ;;  %v868_v47 = vshrl.u32 %v854_v42, 16  ;;  %v859_v48 = vrot.slane %v854_v42, 4  ;;  %v865_v49 = vpack.i.b16 %v854_v42, %v826_v29 }
 0x263   : > { %v862_v58 = vsel %vm402_vm1, 0, %v861_v56  ;;  %v597_v40 = vmul.f32 0.35355338, %v453_v34  ;;  %v451_v41 = vsel %vm402_vm1, 0.0, %v450_v31  ;;  %v596_v42 = vmul.f32 0.35355338, %v437_v21 }
 0x264   : > { %2273 = vxpose.binary.xlu0.c.b16.start.end [1/2] (short) (narrow) %v885_v46, %v881_v45, 16  ;;  %v869_v50 = vpack.i.b16 %v868_v47, %v867_v43  ;;  %v860_v51 = vsel %vm402_vm1, 0, %v859_v48  ;;  %v892_v60 = vshrl.u32 %v862_v58, 16  ;;  %v889_v62 = vpack.i.b16 %v862_v58, %v834_v59 }
 0x265   : > { %v876_v53 = vshrl.u32 %v860_v51, 16  ;;  %v873_v54 = vpack.i.b16 %v860_v51, %v832_v44  ;;  %v595_v47 = vmul.f32 0.35355338, %v451_v41  ;;  %v605_v48 = vpack.c.bf16 %v597_v40, %v597_v40 }
 0x266   : > { %2265 = vxpose.binary.xlu1.c.b16.start.end [1/2] (short) (narrow) %v869_v50, %v865_v49, 16  ;;  %v893_v63 = vpack.i.b16 %v892_v60, %v891_v61  ;;  %v604_v50 = vpack.c.bf16 %v596_v42, %v596_v42 }
 0x267   : > { %v877_v55 = vpack.i.b16 %v876_v53, %v875_v52  ;;  %v603_v57 = vpack.c.bf16 %v595_v47, %v595_v47 }
 0x269   : > { %2276 = vxpose.binary.xlu2.c.b16.start.end [1/2] (short) (narrow) %v877_v55, %v873_v54, 16  ;;  %v594_v54 = vmul.f32 0.35355338, %v433_v26 }
 0x273   : > { %v2757_v33 = vpop.permute.xlu2 %2269 }
 0x274   : > { %2279 = vxpose.binary.xlu0.c.b16.start.end [1/2] (short) (narrow) %v893_v63, %v889_v62, 16  ;;  %v602_v62 = vpack.c.bf16 %v594_v54, %v594_v54 }
 0x2e2   : > { %2283 = vrot.lane.b32.xlu0 %v2680_v12, %s2537_s21  ;;  %v425_v12 = vperm.slane %v417_v5, %v2683_v23 }
 0x2e4   : > { %v438_v17 = vrot.slane %v425_v12, 4  ;;  %v441_v18 = vsel %vm402_vm1, %v425_v12, %v440_v10 }
 0x2e5   : > { %v449_v11 = vperm.slane %v441_v18, %v2693_v37 }
 0x2e6   : > { %v439_v6 = vsel %vm402_vm1, %v438_v17, %v413_v7 }
 0x2e7   : > { %v445_v8 = vperm.slane %v439_v6, %v2693_v37  ;;  %v456_v22 = vrot.slane %v449_v11, 4  ;;  %v600_v35 = vmul.f32 0.35355338, %v449_v11 }
 0x2e9   : > { %v454_v28 = vrot.slane %v445_v8, 4  ;;  %v457_v29 = vsel %vm402_vm1, 0.0, %v456_v22  ;;  %v598_v43 = vmul.f32 0.35355338, %v445_v8  ;;  %v608_v44 = vpack.c.bf16 %v600_v35, %v600_v35 }
 0x2ea   : > { %v601_v30 = vmul.f32 0.35355338, %v457_v29 }
 0x2eb   : > { %v455_v32 = vsel %vm402_vm1, 0.0, %v454_v28  ;;  %v606_v51 = vpack.c.bf16 %v598_v43, %v598_v43  ;;  %v633_v52 = vrot.slane %v608_v44, 4 }
 0x2ec   : > { %v599_v36 = vmul.f32 0.35355338, %v455_v32  ;;  %v609_v38 = vpack.c.bf16 %v601_v30, %v601_v30 }
 0x2ed   : > { %v626_v61 = vrot.slane %v606_v51, 4  ;;  %v634_v63 = vsel %vm402_vm1, %v633_v52, %v604_v50 }
 0x2ee   : > { %v607_v45 = vpack.c.bf16 %v599_v36, %v599_v36  ;;  %v653_v46 = vrot.slane %v609_v38, 4  ;;  %v638_v5 = vperm.slane %v634_v63, %v2683_v23  ;;  %v2271_v63 = vunpack.i.l.bf16 %v2757_v33 }
 0x2ef   : > { %v628_v12 = vsel %vm402_vm1, %v626_v61, %v602_v62  ;;  %v2272_v62 = vunpack.i.h.bf16 %v2757_v33 }
 0x2f0   : > { %v647_v58 = vrot.slane %v607_v45, 4  ;;  %v654_v59 = vsel %vm402_vm1, %v653_v46, %v605_v48  ;;  %v632_v20 = vperm.slane %v628_v12, %v2683_v23  ;;  %v639_v9 = vrot.slane %v638_v5, 4 }
 0x2f1   : > { %v658_v2 = vperm.slane %v654_v59, %v2683_v23 }
 0x2f2   : > { %v648_v4 = vsel %vm402_vm1, %v647_v58, %v603_v57 }
 0x2f3   : > { %v652_v10 = vperm.slane %v648_v4, %v2683_v23  ;;  %v659_v16 = vrot.slane %v658_v2, 4  ;;  %v552_v2 = vrot.slane %v2271_v63, 4 }
 0x2f5   : > { %v660_v22 = vsel %vm402_vm1, %v659_v16, %v652_v10 }
 0x2f6   : > { %v664_v28 = vperm.slane %v660_v22, %v2693_v37 }
 0x2f8   : > { %v665_v35 = vrot.slane %v664_v28, 4  ;;  %v671_v45 = vshrl.u32 %v664_v28, 16 }
 0x2fa   : > { %v666_v52 = vsel %vm402_vm1, 0, %v665_v35 }
 0x2fb   : > { %v677_v59 = vshrl.u32 %v666_v52, 16 }
 0x30a   : > { %v2277_v49 = vpop.trf.xlu2 }
 0x310   : > { %v2274_v25 = vpop.trf.xlu0 }
 0x311   : > { %v1023_v55 = vrot.slane %v2274_v25, 4  ;;  %v640_v25 = vsel %vm402_vm1, %v639_v9, %v632_v20 }
 0x312   : > { %v2266_v53 = vpop.trf.xlu1  ;;  %v2278_v15 = vpop.trf.xlu2  ;;  %v644_v31 = vperm.slane %v640_v25, %v2693_v37 }
 0x313   : > { %v1024_v0 = vsel %vm402_vm1, %v1023_v55, %v2266_v53 }
 0x314   : > { %v1028_v7 = vperm.slane %v1024_v0, %v2683_v23  ;;  %v645_v41 = vrot.slane %v644_v31, 4  ;;  %v669_v50 = vpack.i.b16 %v664_v28, %v644_v31  ;;  %v670_v51 = vshrl.u32 %v644_v31, 16 }
 0x316   : > { %v672_v55 = vpack.i.b16 %v671_v45, %v670_v51 }
 0x318   : > { %v2275_v39 = vpop.trf.xlu0 }
 0x319   : > { %v1043_v14 = vrot.slane %v2275_v39, 4 }
 0x31a   : > { %v2267_v17 = vpop.trf.xlu1 }
 0x31b   : > { %v1044_v6 = vsel %vm402_vm1, %v1043_v14, %v2267_v17 }
 0x31c   : > { %v1048_v26 = vperm.slane %v1044_v6, %v2683_v23 }
 0x320   : > { %v2280_v56 = vpop.trf.xlu0 }
 0x321   : > { %v1029_v60 = vrot.slane %v2280_v56, 4  ;;  %v646_v56 = vsel %vm402_vm1, 0, %v645_v41 }
 0x322   : > { %v675_v58 = vpack.i.b16 %v666_v52, %v646_v56 }
 0x323   : > { %v1030_v1 = vsel %vm402_vm1, %v1029_v60, %v2277_v49  ;;  %v676_v60 = vshrl.u32 %v646_v56, 16 }
 0x324   : > { %v1034_v3 = vperm.slane %v1030_v1, %v2683_v23  ;;  %v540_v1 = vrot.slane %v2272_v62, 4 }
 0x325   : > { %v678_v61 = vpack.i.b16 %v677_v59, %v676_v60 }
 0x326   : > { %v1035_v13 = vrot.slane %v1034_v3, 4 }
 0x328   : > { %v2281_v18 = vpop.trf.xlu0  ;;  %v1036_v19 = vsel %vm402_vm1, %v1035_v13, %v1028_v7 }
 0x329   : > { %v1049_v11 = vrot.slane %v2281_v18, 4  ;;  %v1040_v8 = vperm.slane %v1036_v19, %v2693_v37 }
 0x32b   : > { %v1050_v21 = vsel %vm402_vm1, %v1049_v11, %v2278_v15  ;;  %v1041_v29 = vrot.slane %v1040_v8, 4  ;;  %v1066_v34 = vshrl.u32 %v1040_v8, 16 }
 0x32c   : > { %v1054_v24 = vperm.slane %v1050_v21, %v2683_v23 }
 0x32d   : > { %v1042_v39 = vsel %vm402_vm1, 0, %v1041_v29 }
 0x32e   : > { %v1055_v27 = vrot.slane %v1054_v24, 4  ;;  %v1072_v47 = vshrl.u32 %v1042_v39, 16 }
 0x330   : > { %v1056_v30 = vsel %vm402_vm1, %v1055_v27, %v1048_v26 }
 0x331   : > { %v1060_v32 = vperm.slane %v1056_v30, %v2693_v37 }
 0x333   : > { %v1065_v36 = vpack.i.b16 %v1060_v32, %v1040_v8  ;;  %v1067_v38 = vshrl.u32 %v1060_v32, 16  ;;  %v1061_v40 = vrot.slane %v1060_v32, 4 }
 0x335   : > { %v1081_v42 = vsel %vm1079_vm2, %v1065_v36, 0  ;;  %v1068_v43 = vpack.i.b16 %v1067_v38, %v1066_v34  ;;  %v1062_v44 = vsel %vm402_vm1, 0, %v1061_v40 }
 0x336   : > { %1090 = vmatpush.bf16.msra.mxu1 %v1081_v42  ;;  %v1071_v46 = vpack.i.b16 %v1062_v44, %v1042_v39  ;;  %v1073_v48 = vshrl.u32 %v1062_v44, 16 }
 0x337   : > { %v1100_v49 = vsel %vm1079_vm2, %v1068_v43, 0 }
 0x338   : > { %1109 = vmatpush.bf16.msra.mxu2 %v1100_v49  ;;  %v1119_v53 = vsel %vm1079_vm2, %v1071_v46, 0  ;;  %v1074_v54 = vpack.i.b16 %v1073_v48, %v1072_v47 }
 0x339   : > { %2145 = vmatmul.msk.bf16.vlgmr.msra.gmra.mxu1 %vm1075_vm3, %v669_v50  ;;  %1128 = vmatpush.bf16.msra.mxu3 %v1119_v53 }
 0x33a   : > { %v1138_v57 = vsel %vm1079_vm2, %v1074_v54, 0 }
 0x33b   : > { %2146 = vmatmul.msk.bf16.vlgmr.msra.gmra.mxu2 %vm1075_vm3, %v672_v55  ;;  %1147 = vmatpush.bf16.msrb.mxu1 %v1138_v57 }
 0x33c   : > { %2147 = vmatmul.msk.bf16.vlgmr.msra.gmra.mxu3 %vm1075_vm3, %v675_v58 }
 0x349   : > { %2148 = vmatmul.msk.bf16.vlgmr.msrb.gmra.mxu1 %vm1075_vm3, %v678_v61 }
 0x354   : > { %v2284_v0 = vpop.permute.xlu0 %2283 }
 0x355   : > { %v2286_v3 = vunpack.i.h.bf16 %v2284_v0  ;;  %v2285_v4 = vunpack.i.l.bf16 %v2284_v0 }
 0x357   : > { %v538_v5 = vrot.slane %v2286_v3, 4  ;;  %v541_v7 = vsel %vm402_vm1, %v2286_v3, %v540_v1  ;;  %v550_v13 = vrot.slane %v2285_v4, 4  ;;  %v553_v12 = vsel %vm402_vm1, %v2285_v4, %v552_v2 }
 0x358   : > { %v549_v14 = vperm.slane %v541_v7, %v2683_v23  ;;  %v561_v15 = vperm.slane %v553_v12, %v2683_v23 }
 0x359   : > { %v539_v10 = vsel %vm402_vm1, %v538_v5, %v2272_v62  ;;  %v551_v16 = vsel %vm402_vm1, %v550_v13, %v2271_v63 }
 0x35a   : > { %v576_v33 = vrot.slane %v549_v14, 4  ;;  %v557_v17 = vperm.slane %v551_v16, %v2683_v23  ;;  %v574_v18 = vrot.slane %v561_v15, 4  ;;  %v545_v19 = vperm.slane %v539_v10, %v2683_v23 }
 0x35c   : > { %v562_v11 = vrot.slane %v557_v17, 4  ;;  %v575_v20 = vsel %vm402_vm1, %v574_v18, %v549_v14  ;;  %v577_v9 = vsel %vm402_vm1, %v561_v15, %v576_v33  ;;  %v564_v24 = vrot.slane %v545_v19, 4 }
 0x35d   : > { %v581_v6 = vperm.slane %v575_v20, %v2693_v37  ;;  %v585_v52 = vperm.slane %v577_v9, %v2693_v37 }
 0x35e   : > { %v563_v21 = vsel %vm402_vm1, %v562_v11, %v545_v19  ;;  %v565_v32 = vsel %vm402_vm1, %v557_v17, %v564_v24 }
 0x35f   : > { %v590_v8 = vrot.slane %v581_v6, 4  ;;  %v569_v22 = vperm.slane %v563_v21, %v2693_v37  ;;  %v622_v27 = vpack.c.bf16 %v581_v6, %v581_v6  ;;  %v573_v34 = vperm.slane %v565_v32, %v2693_v37 }
 0x360   : > { %v592_v53 = vrot.slane %v585_v52, 4  ;;  %v624_v55 = vpack.c.bf16 %v585_v52, %v585_v52 }
 0x361   : > { %v591_v25 = vsel %vm402_vm1, 0.0, %v590_v8  ;;  %v586_v26 = vrot.slane %v569_v22, 4  ;;  %v618_v30 = vpack.c.bf16 %v569_v22, %v569_v22  ;;  %v588_v35 = vrot.slane %v573_v34, 4 }
 0x362   : > { %v623_v28 = vpack.c.bf16 %v591_v25, %v591_v25  ;;  %v620_v38 = vpack.c.bf16 %v573_v34, %v573_v34  ;;  %v593_v54 = vsel %vm402_vm1, 0.0, %v592_v53 }
 0x363   : > { %v587_v29 = vsel %vm402_vm1, 0.0, %v586_v26  ;;  %v589_v36 = vsel %vm402_vm1, 0.0, %v588_v35  ;;  %v625_v56 = vpack.c.bf16 %v593_v54, %v593_v54 }
 0x364   : > { %2287 = vxpose.binary.xlu0.c.b16.start.end [1/2] (short) (narrow) %v623_v28, %v622_v27, 16  ;;  %v619_v31 = vpack.c.bf16 %v587_v29, %v587_v29  ;;  %v621_v39 = vpack.c.bf16 %v589_v36, %v589_v36 }
 0x366   : > { %2290 = vxpose.binary.xlu1.c.b16.start.end [1/2] (short) (narrow) %v619_v31, %v618_v30, 16 }
 0x374   : > { %2296 = vxpose.binary.xlu0.c.b16.start.end [1/2] (short) (narrow) %v621_v39, %v620_v38, 16 }
 0x3b6   : > { %v2817_v40 = vpop.f32.mrf.mxu1 }
 0x3b7   : > { %v1153_v45 = vsel %vm1075_vm3, %v2817_v40, -inf }
 0x3be   : > { %v1094_v41 = vpop.f32.mrf.mxu1  ;;  %v1111_v42 = vpop.f32.mrf.mxu2 }
 0x3bf   : > { %v1130_v43 = vpop.f32.mrf.mxu3  ;;  %v1156_v49 = vsel %vm1075_vm3, %v1111_v42, -inf }
 0x3c0   : > { %v1159_v44 = vsel %vm1075_vm3, %v1130_v43, -inf }
 0x3c1   : > { %1160 = vmax.xlane.f32.xlu2 %v1159_v44 }
 0x3c6   : > { %v1113_v46 = vpop.f32.mrf.mxu2  ;;  %1154 = vmax.xlane.f32.xlu1 %v1153_v45  ;;  %v1149_v47 = vpop.f32.mrf.mxu1 }
 0x3c7   : > { %v1132_v48 = vpop.f32.mrf.mxu3  ;;  %v1162_v51 = vsel %vm1075_vm3, %v1149_v47, -inf }
 0x3ce   : > { %1157 = vmax.xlane.f32.xlu1 %v1156_v49  ;;  %v1151_v50 = vpop.f32.mrf.mxu1 }
 0x3d6   : > { %1163 = vmax.xlane.f32.xlu1 %v1162_v51 }
 0x3ea   : > { %2293 = vxpose.binary.xlu2.c.b16.start.end [1/2] (short) (narrow) %v625_v56, %v624_v55, 16 }
 0x410   : > { %v2288_v10 = vpop.trf.xlu0 }
 0x411   : > { %v1329_v33 = vrot.slane %v2288_v10, 4 }
 0x412   : > { %v2291_v57 = vpop.trf.xlu1 }
 0x413   : > { %v1330_v17 = vsel %vm402_vm1, %v1329_v33, %v2291_v57 }
 0x414   : > { %v1334_v19 = vperm.slane %v1330_v17, %v2683_v23 }
 0x416   : > { %v1343_v21 = vrot.slane %v1334_v19, 4 }
 0x418   : > { %v2289_v16 = vpop.trf.xlu0 }
 0x419   : > { %v1357_v20 = vrot.slane %v2289_v16, 4 }
 0x41a   : > { %v2292_v58 = vpop.trf.xlu1 }
 0x41b   : > { %v1358_v22 = vsel %vm402_vm1, %v1357_v20, %v2292_v58 }
 0x41c   : > { %v1362_v26 = vperm.slane %v1358_v22, %v2683_v23 }
 0x41e   : > { %v1371_v35 = vrot.slane %v1362_v26, 4 }
 0x420   : > { %v2297_v18 = vpop.trf.xlu0 }
 0x428   : > { %v2298_v30 = vpop.trf.xlu0 }
 0x434   : > { %v1161_v63 = vpop.xlane.xlu2 %1160 }
 0x435   : > { %v1167_v0 = vsub.f32 %v1130_v43, %v1161_v63 }
 0x437   : > { %v1173_v5 = vmul.f32 1.442695, %v1167_v0 }
 0x439   : > { %v2826_v59 = vpop.xlane.xlu1 %1154 }
 0x441   : > { %v1158_v60 = vpop.xlane.xlu1 %1157 }
 0x442   : > { %v1166_v61 = vsub.f32 %v1111_v42, %v1158_v60 }
 0x444   : > { %v1171_v62 = vmul.f32 1.442695, %v1166_v61 }
 0x446   : > { %2329 = vpow2.f32 %v1171_v62 }
 0x449   : > { %v1164_v1 = vpop.xlane.xlu1 %1163 }
 0x44a   : > { %v1168_v2 = vsub.f32 %v1149_v47, %v1164_v1 }
 0x44c   : > { %v2828_v3 = vpop.eup %2329  ;;  %v1175_v4 = vmul.f32 1.442695, %v1168_v2 }
 0x44d   : > { %v1180_v7 = vsel %vm1075_vm3, %v2828_v3, 0.0 }
 0x44e   : > { %2331 = vpow2.f32 %v1175_v4  ;;  %1181 = vadd.xlane.f32.xlu1 %v1180_v7 }
 0x44f   : > { %2333 = vpow2.f32 %v1173_v5 }
 0x454   : > { %v2832_v13 = vpop.eup %2331 }
 0x455   : > { %v1186_v12 = vsel %vm1075_vm3, %v2832_v13, 0.0  ;;  %v2836_v14 = vpop.eup %2333 }
 0x456   : > { %1187 = vadd.xlane.f32.xlu1 %v1186_v12  ;;  %v1183_v15 = vsel %vm1075_vm3, %v2836_v14, 0.0 }
 0x45b   : > { %1184 = vadd.xlane.f32.xlu2 %v1183_v15 }
 0x48b   : > { %v2294_v11 = vpop.trf.xlu2 }
 0x48c   : > { %v1335_v9 = vrot.slane %v2294_v11, 4 }
 0x48e   : > { %v1336_v6 = vsel %vm402_vm1, %v1335_v9, %v2297_v18 }
 0x48f   : > { %v1340_v8 = vperm.slane %v1336_v6, %v2683_v23 }
 0x491   : > { %v1341_v24 = vrot.slane %v1340_v8, 4  ;;  %v1344_v25 = vsel %vm402_vm1, %v1340_v8, %v1343_v21  ;;  %v1165_v8 = vsub.f32 %v2817_v40, %v2826_v59 }
 0x492   : > { %v1352_v28 = vperm.slane %v1344_v25, %v2693_v37 }
 0x493   : > { %v1342_v27 = vsel %vm402_vm1, %v1341_v24, %v1334_v19  ;;  %v2295_v29 = vpop.trf.xlu2  ;;  %v1169_v22 = vmul.f32 1.442695, %v1165_v8 }
 0x494   : > { %v1363_v31 = vrot.slane %v2295_v29, 4  ;;  %v2850_v32 = vperm.slane %v1342_v27, %v2693_v37  ;;  %v1355_v38 = vrot.slane %v1352_v28, 4  ;;  %v1405_v45 = vshrl.u32 %v1352_v28, 16 }
 0x496   : > { %v1364_v34 = vsel %vm402_vm1, %v1363_v31, %v2298_v30  ;;  %v1353_v42 = vrot.slane %v2850_v32, 4  ;;  %v1356_v46 = vsel %vm402_vm1, 0, %v1355_v38  ;;  %v1389_v52 = vshrl.u32 %v2850_v32, 16 }
 0x497   : > { %v1368_v36 = vperm.slane %v1364_v34, %v2683_v23  ;;  %v1413_v58 = vshrl.u32 %v1356_v46, 16 }
 0x498   : > { %v1354_v51 = vsel %vm402_vm1, 0, %v1353_v42 }
 0x499   : > { %v1369_v39 = vrot.slane %v1368_v36, 4  ;;  %v1372_v41 = vsel %vm402_vm1, %v1368_v36, %v1371_v35  ;;  %v1397_v63 = vshrl.u32 %v1354_v51, 16 }
 0x49a   : > { %v1380_v43 = vperm.slane %v1372_v41, %v2693_v37 }
 0x49b   : > { %v1370_v44 = vsel %vm402_vm1, %v1369_v39, %v1362_v26 }
 0x49c   : > { %v1376_v47 = vperm.slane %v1370_v44, %v2693_v37  ;;  %v1403_v48 = vpack.i.b16 %v1380_v43, %v1352_v28  ;;  %v1406_v49 = vshrl.u32 %v1380_v43, 16  ;;  %v1383_v50 = vrot.slane %v1380_v43, 4 }
 0x49e   : > { %v1407_v53 = vpack.i.b16 %v1406_v49, %v1405_v45  ;;  %v1384_v54 = vsel %vm402_vm1, 0, %v1383_v50  ;;  %v1381_v55 = vrot.slane %v1376_v47, 4  ;;  %v1387_v56 = vpack.i.b16 %v1376_v47, %v2850_v32 }
 0x49f   : > { %v1411_v57 = vpack.i.b16 %v1384_v54, %v1356_v46  ;;  %v1414_v60 = vshrl.u32 %v1384_v54, 16  ;;  %v1390_v61 = vshrl.u32 %v1376_v47, 16 }
 0x4a0   : > { %2305 = vxpose.binary.xlu2.c.b16.start.end [1/2] (short) (narrow) %v1407_v53, %v1403_v48, 16  ;;  %v1382_v62 = vsel %vm402_vm1, 0, %v1381_v55 }
 0x4a1   : > { %v1415_v0 = vpack.i.b16 %v1414_v60, %v1413_v58  ;;  %v1395_v1 = vpack.i.b16 %v1382_v62, %v1354_v51  ;;  %v1398_v2 = vshrl.u32 %v1382_v62, 16  ;;  %v1391_v4 = vpack.i.b16 %v1390_v61, %v1389_v52 }
 0x4a3   : > { %2299 = vxpose.binary.xlu0.c.b16.start.end [1/2] (short) (narrow) %v1415_v0, %v1411_v57, 16  ;;  %v1399_v5 = vpack.i.b16 %v1398_v2, %v1397_v63 }
 0x4a5   : > { %2302 = vxpose.binary.xlu1.c.b16.start.end [1/2] (short) (narrow) %v1399_v5, %v1395_v1, 16 }
 0x4c1   : > { %v1182_v7 = vpop.xlane.xlu1 %1181 }
 0x4c2   : > { %2335 = vrcp.f32 %v1182_v7 }
 0x4c8   : > { %v2336_v12 = vpop.eup %2335 }
 0x4c9   : > { %v1188_v15 = vpop.xlane.xlu1 %1187  ;;  %v1194_v10 = vmul.f32 %v2336_v12, %v2828_v3 }
 0x4ca   : > { %2337 = vrcp.f32 %v1188_v15 }
 0x4cb   : > { %v1198_v16 = vpack.c.bf16 %v1194_v10, %v1194_v10 }
 0x4cd   : > { %v1620_v33 = vsel %vm1075_vm3, %v1198_v16, 0 }
 0x4ce   : > { %1629 = vmatpush.bf16.xpose.msrb.mxu3 %v1620_v33  ;;  %v1185_v17 = vpop.xlane.xlu2 %1184 }
 0x4cf   : > { %2339 = vrcp.f32 %v1185_v17 }
 0x4d0   : > { %v2338_v18 = vpop.eup %2337  ;;  %2341 = vpow2.f32 %v1169_v22 }
 0x4d1   : > { %v1196_v19 = vmul.f32 %v2338_v18, %v2832_v13 }
 0x4d3   : > { %v1200_v11 = vpack.c.bf16 %v1196_v19, %v1196_v19 }
 0x4d5   : > { %v2340_v20 = vpop.eup %2339  ;;  %v1658_v9 = vsel %vm1075_vm3, %v1200_v11, 0 }
 0x4d6   : > { %1667 = vmatpush.bf16.xpose.msra.mxu1 %v1658_v9  ;;  %v1195_v6 = vmul.f32 %v2340_v20, %v2836_v14  ;;  %v2342_v24 = vpop.eup %2341 }
 0x4d7   : > { %v1177_v25 = vsel %vm1075_vm3, %v2342_v24, 0.0 }
 0x4d8   : > { %v1199_v21 = vpack.c.bf16 %v1195_v6, %v1195_v6 }
 0x4da   : > { %v1639_v3 = vsel %vm1075_vm3, %v1199_v21, 0 }
 0x4db   : > { %1648 = vmatpush.bf16.xpose.msrb.mxu0 %v1639_v3 }
 0x514   : > { %1178 = vadd.xlane.f32.xlu0 %v1177_v25 }
 0x53d   : > { %2308 = vxpose.binary.xlu0.c.b16.start.end [1/2] (short) (narrow) %v1391_v4, %v1387_v56, 16 }
 0x541   : > { %v2306_v40 = vpop.trf.xlu2 }
 0x542   : > { %v1545_v34 = vrot.slane %v2306_v40, 4 }
 0x549   : > { %v2307_v44 = vpop.trf.xlu2 }
 0x54a   : > { %v1565_v47 = vrot.slane %v2307_v44, 4 }
 0x54f   : > { %v2300_v13 = vpop.trf.xlu0 }
 0x550   : > { %v1551_v32 = vrot.slane %v2300_v13, 4 }
 0x551   : > { %v2303_v31 = vpop.trf.xlu1 }
 0x552   : > { %v1552_v59 = vsel %vm402_vm1, %v1551_v32, %v2303_v31 }
 0x553   : > { %v1556_v35 = vperm.slane %v1552_v59, %v2683_v23 }
 0x555   : > { %v1557_v42 = vrot.slane %v1556_v35, 4 }
 0x557   : > { %v2301_v26 = vpop.trf.xlu0 }
 0x558   : > { %v1571_v36 = vrot.slane %v2301_v26, 4 }
 0x559   : > { %v2304_v38 = vpop.trf.xlu1 }
 0x55a   : > { %v1572_v45 = vsel %vm402_vm1, %v1571_v36, %v2304_v38 }
 0x55b   : > { %v1576_v48 = vperm.slane %v1572_v45, %v2683_v23 }
 0x55d   : > { %v1577_v52 = vrot.slane %v1576_v48, 4 }
 0x587   : > { %v1179_v27 = vpop.xlane.xlu0 %1178 }
 0x588   : > { %2343 = vrcp.f32 %v1179_v27 }
 0x58e   : > { %v2344_v28 = vpop.eup %2343 }
 0x58f   : > { %v1193_v14 = vmul.f32 %v2344_v28, %v2342_v24 }
 0x591   : > { %v1197_v29 = vpack.c.bf16 %v1193_v14, %v1193_v14 }
 0x593   : > { %v1601_v30 = vsel %vm1075_vm3, %v1197_v29, 0 }
 0x594   : > { %1610 = vmatpush.bf16.xpose.msrb.mxu2 %v1601_v30 }
 0x5e9   : > { %v2309_v39 = vpop.trf.xlu0 }
 0x5ea   : > { %v1546_v41 = vsel %vm402_vm1, %v1545_v34, %v2309_v39 }
 0x5eb   : > { %v1550_v43 = vperm.slane %v1546_v41, %v2683_v23 }
 0x5ed   : > { %v1558_v46 = vsel %vm402_vm1, %v1557_v42, %v1550_v43 }
 0x5ee   : > { %v1562_v49 = vperm.slane %v1558_v46, %v2693_v37 }
 0x5f0   : > { %v1563_v54 = vrot.slane %v1562_v49, 4  ;;  %v1588_v57 = vshrl.u32 %v1562_v49, 16 }
 0x5f1   : > { %v2310_v50 = vpop.trf.xlu0 }
 0x5f2   : > { %v1566_v51 = vsel %vm402_vm1, %v1565_v47, %v2310_v50  ;;  %v1564_v61 = vsel %vm402_vm1, 0, %v1563_v54 }
 0x5f3   : > { %v1570_v53 = vperm.slane %v1566_v51, %v2683_v23  ;;  %v1594_v2 = vshrl.u32 %v1564_v61, 16 }
 0x5f5   : > { %v1578_v55 = vsel %vm402_vm1, %v1577_v52, %v1570_v53 }
 0x5f6   : > { %v1582_v56 = vperm.slane %v1578_v55, %v2693_v37 }
 0x5f8   : > { %v1587_v58 = vpack.i.b16 %v1582_v56, %v1562_v49  ;;  %v1589_v60 = vshrl.u32 %v1582_v56, 16  ;;  %v1583_v62 = vrot.slane %v1582_v56, 4 }
 0x5fa   : > { %2149 = vmatmul.msk.bf16.vlgmr.msrb.gmra.mxu2 %vm1075_vm3, %v1587_v58  ;;  %v1590_v63 = vpack.i.b16 %v1589_v60, %v1588_v57  ;;  %v1584_v0 = vsel %vm402_vm1, 0, %v1583_v62 }
 0x5fb   : > { %v1593_v1 = vpack.i.b16 %v1584_v0, %v1564_v61  ;;  %v1595_v4 = vshrl.u32 %v1584_v0, 16 }
 0x5fc   : > { %2150 = vmatmul.msk.bf16.vlgmr.msrb.gmra.mxu3 %vm1075_vm3, %v1590_v63 }
 0x5fd   : > { %v1596_v5 = vpack.i.b16 %v1595_v4, %v1594_v2  ;;  %2151 = vmatmul.msk.bf16.vlgmr.msrb.gmra.mxu0 %vm1075_vm3, %v1593_v1 }
 0x5ff   : > { %2152 = vmatmul.msk.bf16.vlgmr.msra.gmra.mxu1 %vm1075_vm3, %v1596_v5 }
 0x67a   : > { %v1650_v7 = vpop.f32.mrf.mxu0 }
 0x67c   : > { %v1669_v12 = vpop.f32.mrf.mxu1 }
 0x67d   : > { %v1612_v15 = vpop.f32.mrf.mxu2 }
 0x67e   : > { %v2311_v10 = vpack.i.bf16 %v1612_v15, %v1650_v7 }
 0x67f   : > { %v1631_v16 = vpop.f32.mrf.mxu3 }
 0x680   : > { %v2318_v33 = vpack.i.bf16 %v1631_v16, %v1669_v12  ;;  %2312 = vxpose.xlu0.b32.start.end [1/1] (short) (narrow) %v2311_v10, 8 }
 0x682   : > { %v1652_v17 = vpop.f32.mrf.mxu0  ;;  %2319 = vxpose.xlu1.b32.start.end [1/1] (short) (narrow) %v2318_v33, 8 }
 0x684   : > { %v1671_v18 = vpop.f32.mrf.mxu1 }
 0x685   : > { %v1614_v19 = vpop.f32.mrf.mxu2 }
 0x687   : > { %v1633_v11 = vpop.f32.mrf.mxu3 }
 0x724   : > { %v2313_v20 = vpop.trf.xlu0 }
 0x725   : > { %v2317_v9 = vunpack.i.h.bf16 %v2313_v20  ;;  %v2314_v6 = vunpack.i.l.bf16 %v2313_v20 }
 0x726   : > { %v2320_v21 = vpop.trf.xlu1 }
 0x727   : > { %v1803_v3 = vrot.slane %v2317_v9, 4  ;;  %v1801_v8 = vrot.slane %v2314_v6, 4  ;;  %v2324_v22 = vunpack.i.h.bf16 %v2320_v21  ;;  %v2321_v24 = vunpack.i.l.bf16 %v2320_v21 }
 0x729   : > { %v1802_v25 = vsel %vm402_vm1, %v1801_v8, %v2317_v9  ;;  %v1804_v13 = vsel %vm402_vm1, %v2314_v6, %v1803_v3  ;;  %v1815_v26 = vrot.slane %v2324_v22, 4  ;;  %v1813_v14 = vrot.slane %v2321_v24, 4  ;;  %v2167_v8 = vld [vmem:[#allocation4 + $0x8] sm:$0xff] }
 0x72a   : > { %v1808_v27 = vperm.slane %v1802_v25, %v2683_v23  ;;  %v1812_v28 = vperm.slane %v1804_v13, %v2683_v23  ;;  %1958 = vmatpush.bf16.msra.mxu2 %v2167_v8 }
 0x72b   : > { %v1816_v29 = vsel %vm402_vm1, %v2321_v24, %v1815_v26  ;;  %v1814_v32 = vsel %vm402_vm1, %v1813_v14, %v2324_v22  ;;  %v2326_v14 = vld [vmem:[#allocation6] ss:$0 sm:$0xff] }
 0x72c   : > { %v1827_v30 = vrot.slane %v1808_v27, 4  ;;  %v1839_v31 = vrot.slane %v1812_v28, 4  ;;  %v1824_v40 = vperm.slane %v1816_v29, %v2683_v23  ;;  %v1820_v59 = vperm.slane %v1814_v32, %v2683_v23 }
 0x72e   : > { %v1837_v34 = vrot.slane %v1824_v40, 4  ;;  %v1840_v35 = vsel %vm402_vm1, %v1824_v40, %v1839_v31  ;;  %v1825_v36 = vrot.slane %v1820_v59, 4  ;;  %v1828_v38 = vsel %vm402_vm1, %v1820_v59, %v1827_v30  ;;  %v2353_v31 = vld [vmem:[%s2655_s14] sm:$0xff] }
 0x72f   : > { %v1848_v39 = vperm.slane %v1840_v35, %v2693_v37  ;;  %v1836_v41 = vperm.slane %v1828_v38, %v2693_v37 }
 0x730   : > { %v1838_v42 = vsel %vm402_vm1, %v1837_v34, %v1812_v28  ;;  %v1826_v43 = vsel %vm402_vm1, %v1825_v36, %v1808_v27  ;;  %v2541_v34 = vmov 32.0  }
 0x731   : > { %v1844_v44 = vperm.slane %v1838_v42, %v2693_v37  ;;  %v1855_v45 = vrot.slane %v1848_v39, 4  ;;  %v1832_v46 = vperm.slane %v1826_v43, %v2693_v37  ;;  %v1851_v47 = vrot.slane %v1836_v41, 4 }
 0x732   : > { %2345 = vrcp.f32 %v2541_v34 }
 0x733   : > { %v1853_v48 = vrot.slane %v1844_v44, 4  ;;  %v1856_v49 = vsel %vm402_vm1, 0.0, %v1855_v45  ;;  %v1868_v50 = vsel %vm402_vm1, %v1855_v45, %v1844_v44  ;;  %v1852_v51 = vsel %vm402_vm1, 0.0, %v1851_v47 }
 0x734   : > { %v1849_v52 = vrot.slane %v1832_v46, 4  ;;  %v1857_v53 = vsel %vm402_vm1, %v1851_v47, %v1832_v46  ;;  %v1872_v54 = vperm.slane %v1868_v50, %v2683_v23  ;;  %v1862_v57 = vrot.slane %v1852_v51, 4 }
 0x735   : > { %v1854_v55 = vsel %vm402_vm1, 0.0, %v1853_v48  ;;  %v1861_v56 = vperm.slane %v1857_v53, %v2683_v23  ;;  %v1873_v58 = vrot.slane %v1856_v49, 4  ;;  %v2542_v48 = vmov 31.0  }
 0x736   : > { %v1850_v60 = vsel %vm402_vm1, 0.0, %v1849_v52  ;;  %v1893_v61 = vrot.slane %v1872_v54, 4  ;;  %2347 = vrcp.f32 %v2542_v48 }
 0x737   : > { %v1863_v62 = vsel %vm402_vm1, %v1862_v57, %v1850_v60  ;;  %v1874_v63 = vsel %vm402_vm1, %v1873_v58, %v1854_v55  ;;  %v1881_v0 = vrot.slane %v1861_v56, 4 }
 0x738   : > { %v1867_v1 = vperm.slane %v1863_v62, %v2683_v23  ;;  %v1878_v2 = vperm.slane %v1874_v63, %v2683_v23  ;;  %v2346_v35 = vpop.eup %2345 }
 0x739   : > { %v1972_v36 = vmul.f32 32.0, %v2346_v35  ;;  %vm1976_vm6 = vweird.f32 %v2346_v35 }
 0x73a   : > { %v1882_v4 = vsel %vm402_vm1, %v1867_v1, %v1881_v0  ;;  %v1894_v5 = vsel %vm402_vm1, %v1878_v2, %v1893_v61  ;;  %v1879_v7 = vrot.slane %v1867_v1, 4  ;;  %v1891_v12 = vrot.slane %v1878_v2, 4 }
 0x73b   : > { %v1890_v15 = vperm.slane %v1882_v4, %v2693_v37  ;;  %v1902_v10 = vperm.slane %v1894_v5, %v2693_v37  ;;  %v1973_v38 = vsub.f32 1.0, %v1972_v36 }
 0x73c   : > { %v1880_v16 = vsel %vm402_vm1, %v1879_v7, %v1861_v56  ;;  %v1892_v33 = vsel %vm402_vm1, %v1891_v12, %v1872_v54  ;;  %v2348_v49 = vpop.eup %2347  ;;  %v2327_v7 = vld [vmem:[#allocation7] ss:$0 sm:$0xff] }
 0x73d   : > { %v1909_v17 = vrot.slane %v1890_v15, 4  ;;  %v1907_v18 = vrot.slane %v1902_v10, 4  ;;  %v1886_v19 = vperm.slane %v1880_v16, %v2693_v37  ;;  %v1898_v23 = vperm.slane %v1892_v33, %v2693_v37  ;;  %v2166_v37 = vld [vmem:[#allocation4] sm:$0xff] }
 0x73e   : > { %1959 = vmatpush.bf16.msra.mxu2 %v2166_v37  ;;  %v1974_v39 = vmul.f32 %v2346_v35, %v1973_v38  ;;  %v1985_v50 = vmul.f32 31.0, %v2348_v49  ;;  %vm1989_vm7 = vweird.f32 %v2348_v49 }
 0x73f   : > { %v1910_v11 = vsel %vm402_vm1, %v1902_v10, %v1909_v17  ;;  %v1908_v20 = vsel %vm402_vm1, %v1907_v18, %v1890_v15  ;;  %v1903_v9 = vrot.slane %v1898_v23, 4  ;;  %v1905_v6 = vrot.slane %v1886_v19, 4  ;;  %v2328_v15 = vld [vmem:[#allocation9] ss:$0 sm:$0xff] }
 0x740   : > { %1920 = vrot.lane.b32.xlu1 %v1910_v11, %s2538_s22  ;;  %1916 = vrot.lane.b32.xlu0 %v1908_v20, %s2539_s23  ;;  %v1975_v41 = vadd.f32 %v2346_v35, %v1974_v39  ;;  %v1986_v51 = vsub.f32 1.0, %v1985_v50 }
 0x741   : > { %v1906_v21 = vsel %vm402_vm1, %v1898_v23, %v1905_v6  ;;  %v1904_v3 = vsel %vm402_vm1, %v1903_v9, %v1886_v19 }
 0x742   : > { %1912 = vrot.lane.b32.xlu2 %v1906_v21, %s2540_s26  ;;  %v1977_v42 = vsel %vm1976_vm6, %v2346_v35, %v1975_v41  ;;  %v1987_v52 = vmul.f32 %v2348_v49, %v1986_v51 }
 0x744   : > { %v1988_v53 = vadd.f32 %v2348_v49, %v1987_v52 }
 0x746   : > { %v1990_v54 = vsel %vm1989_vm7, %v2348_v49, %v1988_v53 }
 0x79c   : > { %v1913_v22 = vpop.permute.xlu2 %1912 }
 0x79d   : > { %v1923_v24 = vsel %vm1075_vm3, %v1904_v3, %v1913_v22 }
 0x7b2   : > { %v1921_v25 = vpop.permute.xlu1 %1920  ;;  %v1917_v13 = vpop.permute.xlu0 %1916 }
 0x7b3   : > { %v1925_v26 = vsel %vm1924_vm4, %v1923_v24, %v1917_v13 }
 0x7b4   : > { %v1927_v27 = vsel %vm1926_vm5, %v1925_v26, %v1921_v25 }
 0x7b5   : > { %v1928_v28 = vpack.c.bf16 %v1927_v27, %v1927_v27 }
 0x7b7   : > { %2161 = vmatmul.msk.bf16.vlgmr.msra.gmra.mxu2 %vm374_vm0, %v1928_v28 }
 0x83a   : > { %v1961_v29 = vpop.f32.mrf.mxu2 }
 0x83b   : > { %v1962_v30 = vadd.f32 %v2326_v14, %v1961_v29 }
 0x83d   : > { %v1965_v32 = vadd.f32 %v2353_v31, %v1962_v30 }
 0x83f   : > { %v1968_v40 = vsel %vm374_vm0, %v1965_v32, 0.0 }
 0x840   : > { %1969 = vadd.xlane.f32.xlu1 %v1968_v40 }
 0x842   : > { %v1963_v59 = vpop.f32.mrf.mxu2 }
 0x8b3   : > { %v1970_v43 = vpop.xlane.xlu1 %1969 }
 0x8b4   : > { %v1978_v44 = vmul.f32 %v1977_v42, %v1970_v43 }
 0x8b6   : > { %v1979_v45 = vsub.f32 %v1965_v32, %v1978_v44 }
 0x8b8   : > { %v1980_v46 = vmul.f32 %v1979_v45, %v1979_v45 }
 0x8ba   : > { %v1981_v47 = vsel %vm374_vm0, %v1980_v46, 0.0 }
 0x8bb   : > { %1982 = vadd.xlane.f32.xlu2 %v1981_v47 }
 0x92e   : > { %v1983_v55 = vpop.xlane.xlu2 %1982 }
 0x92f   : > { %v1991_v56 = vmul.f32 %v1990_v54, %v1983_v55 }
 0x931   : > { %2349 = vrsqrt.f32 %v1991_v56  ;;  %vm1999_vm8 = vcmp.eq.f32.partialorder %v1991_v56, inf  ;;  %v2002_v1 = vand.u32 2147483648, %v1991_v56  ;;  %vm2001_vm9 = vcmp.eq.f32.partialorder %v1991_v56, 0.0 }
 0x937   : > { %v2350_v57 = vpop.eup %2349 }
 0x938   : > { %v1993_v58 = vmul.f32 %v2350_v57, %v1991_v56 }
 0x93a   : > { %v1994_v60 = vmul.f32 %v2350_v57, %v1993_v58 }
 0x93c   : > { %v1995_v61 = vmul.f32 0.5, %v1994_v60 }
 0x93e   : > { %v1996_v62 = vsub.f32 1.5, %v1995_v61 }
 0x940   : > { %v1997_v63 = vmul.f32 %v2350_v57, %v1996_v62 }
 0x942   : > { %v1998_v0 = vmul.f32 %v1997_v63, %v1991_v56 }
 0x944   : > { %v2000_v2 = vsel %vm1999_vm8, %v1991_v56, %v1998_v0 }
 0x945   : > { %v2003_v4 = vsel %vm2001_vm9, %v2002_v1, %v2000_v2 }
 0x946   : > { %v2004_v5 = vadd.f32 1e-12, %v2003_v4 }
 0x948   : > { %2351 = vrcp.f32 %v2004_v5 }
 0x94e   : > { %v2352_v12 = vpop.eup %2351 }
 0x94f   : > { %v2006_v10 = vmul.f32 %v2352_v12, %v1979_v45 }
 0x951   : > { %v2010_v16 = vmul.f32 %v2327_v7, %v2006_v10 }
 0x953   : > { %v2014_v33 = vadd.f32 %v2328_v15, %v2010_v16 }
 0x955   : > { %2015 = vst.msk [vmem:[%s350_s8] sm:$0xff] %vm374_vm0, %v2014_v33 }
 0x956 PF: > { %s20_s24 = sadd.s32 1, %s2522_s24  }
 0x957   : > { %p17_p7 = scmp.ge.s32.totalorder %s20_s24, 4  }
 0x959   :  { %19 = sbr.rel (!%p17_p7) target bundleno = 3 (0x3), region = 99 }
 0x95e   :  { %2035 = vsyncpa [#allocation3], 1 }
 0x95f   :  { %2037 = vsyncpa [#allocation3 + $0x1], 1 }
 0x960   :  { %2038 = vsyncpa [#allocation5], 1 }
 0x961   :  { %2039 = vsyncpa [#allocation8], 1 }

// kernel: encoder_forward.9
= control target key start
LH: loop header
LB: loop body
LE: loop exit
PB: predicated region body
PF: predicated region fallthrough
CT: control target
= control target key end

     0   :  { %s394_s0 = inlined_call_operand.vmem [shape: f32[16,32], index: 0, kind: input, shape index: {}]   ;;  %s395_s1 = inlined_call_operand.vmem [shape: bf16[32,64], index: 1, kind: input, shape index: {}]   ;;  %s396_s2 = inlined_call_operand.vmem [shape: f32[1,64], index: 2, kind: input, shape index: {}]   ;;  %s397_s3 = inlined_call_operand.vmem [shape: bf16[64,32], index: 3, kind: input, shape index: {}]   ;;  %s398_s4 = inlined_call_operand.vmem [shape: f32[1,32], index: 4, kind: input, shape index: {}]   ;;  %s399_s5 = inlined_call_operand.vmem [shape: f32[1,32], index: 5, kind: input, shape index: {}]   ;;  %s400_s6 = inlined_call_operand.vmem [shape: f32[1,32], index: 6, kind: input, shape index: {}]   ;;  %s401_s7 = inlined_call_operand.hbm [shape: f32[16,32], index: 7, kind: output, shape index: {}]  }
   0x1   :  { %v251_v0 = vld [vmem:[%s395_s1 + $0x8] sm:$0xff]  ;;  %v250_v1 = vld [vmem:[%s395_s1] sm:$0xff] }
   0x2   :  { %v28_v2 = vld [vmem:[%s394_s0] sm:$0xff]  ;;  %v29_v3 = vld [vmem:[%s394_s0 + $0x8] sm:$0xff]  ;;  %61 = vmatpush.bf16.msra.mxu0 %v251_v0 }
   0x3   :  { %12 = vsyncpa [#allocation3], 0  ;;  %v30_v4 = vpack.c.bf16 %v29_v3, %v28_v2  ;;  %vm51_vm0 = vcmask 261120   ;;  %v255_v5 = vld [vmem:[%s397_s3 + $0x18] sm:$0xff]  ;;  %v254_v6 = vld [vmem:[%s397_s3 + $0x10] sm:$0xff]  ;;  %vm108_vm1 = vcmask 523264  }
   0x4   :  { %116 = vmatpush.bf16.msra.mxu1 %v255_v5  ;;  %v253_v7 = vld [vmem:[%s397_s3 + $0x8] sm:$0xff]  ;;  %v252_v8 = vld [vmem:[%s397_s3] sm:$0xff]  ;;  %v303_v26 = vmov 32.0   ;;  %v304_v43 = vmov 31.0   ;;  %s305_s20 = smov [#allocation2]   ;;  %s307_s24 = smov 8  }
   0x5   :  { %v261_v10 = vld [vmem:[%s396_s2] ss:$0 sm:$0xff]  ;;  %265 = vrcp.f32 %v303_v26  ;;  %s210_s21 = sshll.u32 %s305_s20, 4  ;;  %s211_s21 = int_to_ptr.vmem [resolvable:$true] %s210_s21 }
   0x6   :  { %62 = vmatpush.bf16.msra.mxu0 %v250_v1  ;;  %v262_v17 = vld [vmem:[%s398_s4] ss:$0 sm:$0xff]  ;;  %267 = vrcp.f32 %v304_v43 }
   0x8   :  { %117 = vmatpush.bf16.msra.mxu1 %v254_v6 }
   0x9   :  { %232 = vmatmul.msk.bf16.vlgmr.msra.gmra.mxu0 %vm51_vm0, %v30_v4 }
   0xb   :  { %v266_v27 = vpop.eup %265 }
   0xc   :  { %118 = vmatpush.bf16.msra.mxu1 %v253_v7  ;;  %v137_v28 = vmul.f32 32.0, %v266_v27  ;;  %vm141_vm2 = vweird.f32 %v266_v27  ;;  %v268_v44 = vpop.eup %267 }
   0xd   :  { %v156_v45 = vmul.f32 31.0, %v268_v44  ;;  %vm160_vm3 = vweird.f32 %v268_v44 }
   0xe   :  { %v138_v29 = vsub.f32 1.0, %v137_v28 }
   0xf   :  { %v157_v46 = vsub.f32 1.0, %v156_v45 }
  0x10   :  { %119 = vmatpush.bf16.msra.mxu1 %v252_v8  ;;  %v139_v30 = vmul.f32 %v266_v27, %v138_v29 }
  0x11   :  { %v158_v47 = vmul.f32 %v268_v44, %v157_v46 }
  0x12   :  { %v140_v31 = vadd.f32 %v266_v27, %v139_v30 }
  0x13   :  { %v159_v48 = vadd.f32 %v268_v44, %v158_v47 }
  0x14   :  { %v142_v32 = vsel %vm141_vm2, %v266_v27, %v140_v31 }
  0x15   :  { %v161_v49 = vsel %vm160_vm3, %v268_v44, %v159_v48 }
  0x86   :  { %v64_v9 = vpop.f32.mrf.mxu0 }
  0x87   :  { %v65_v11 = vadd.f32 %v261_v10, %v64_v9 }
  0x89   :  { %v69_v14 = vmax.f32 %v65_v11, 0.0  ;;  %v263_v11 = vld [vmem:[%s399_s5] ss:$0 sm:$0xff]  ;;  %s212_s5 = sshll.u32 %s401_s7, 4  ;;  %s213_s5 = int_to_ptr.hbm [resolvable:$true] %s212_s5 }
  0x8e   :  { %v66_v12 = vpop.f32.mrf.mxu0 }
  0x8f   :  { %v67_v13 = vadd.f32 %v261_v10, %v66_v12 }
  0x91   :  { %v70_v15 = vmax.f32 %v67_v13, 0.0 }
  0x93   :  { %v71_v16 = vpack.c.bf16 %v70_v15, %v69_v14  ;;  %v264_v15 = vld [vmem:[%s400_s6] ss:$0 sm:$0xff]  ;;  %s306_s6 = smov 128  }
  0x95   :  { %249 = vmatmul.msk.bf16.vlgmr.msra.gmra.mxu1 %vm108_vm1, %v71_v16 }
 0x112   :  { %v121_v18 = vpop.f32.mrf.mxu1 }
 0x113   :  { %v122_v19 = vadd.f32 %v262_v17, %v121_v18 }
 0x115   :  { %v126_v20 = vadd.f32 %v122_v19, %v28_v2 }
 0x117   :  { %v130_v21 = vsel %vm51_vm0, %v126_v20, 0.0 }
 0x118   :  { %131 = vadd.xlane.f32.xlu0 %v130_v21 }
 0x11a   :  { %v123_v22 = vpop.f32.mrf.mxu1 }
 0x11b   :  { %v124_v23 = vadd.f32 %v262_v17, %v123_v22 }
 0x11d   :  { %v127_v24 = vadd.f32 %v124_v23, %v29_v3 }
 0x11f   :  { %v133_v25 = vsel %vm51_vm0, %v127_v24, 0.0 }
 0x120   :  { %134 = vadd.xlane.f32.xlu0 %v133_v25 }
 0x18b   :  { %v132_v33 = vpop.xlane.xlu0 %131 }
 0x18c   :  { %v143_v34 = vmul.f32 %v142_v32, %v132_v33 }
 0x18e   :  { %v145_v35 = vsub.f32 %v126_v20, %v143_v34 }
 0x190   :  { %v147_v36 = vmul.f32 %v145_v35, %v145_v35 }
 0x192   :  { %v149_v37 = vsel %vm51_vm0, %v147_v36, 0.0 }
 0x193   :  { %150 = vadd.xlane.f32.xlu1 %v149_v37  ;;  %v135_v38 = vpop.xlane.xlu0 %134 }
 0x194   :  { %v144_v39 = vmul.f32 %v142_v32, %v135_v38 }
 0x196   :  { %v146_v40 = vsub.f32 %v127_v24, %v144_v39 }
 0x198   :  { %v148_v41 = vmul.f32 %v146_v40, %v146_v40 }
 0x19a   :  { %v152_v42 = vsel %vm51_vm0, %v148_v41, 0.0 }
 0x19b   :  { %153 = vadd.xlane.f32.xlu1 %v152_v42 }
 0x206   :  { %v151_v50 = vpop.xlane.xlu1 %150 }
 0x207   :  { %v162_v51 = vmul.f32 %v161_v49, %v151_v50 }
 0x209   :  { %269 = vrsqrt.f32 %v162_v51  ;;  %vm171_vm4 = vcmp.eq.f32.partialorder %v162_v51, inf  ;;  %v174_v0 = vand.u32 2147483648, %v162_v51  ;;  %vm173_vm5 = vcmp.eq.f32.partialorder %v162_v51, 0.0 }
 0x20e   :  { %v154_v52 = vpop.xlane.xlu1 %153 }
 0x20f   :  { %v270_v53 = vpop.eup %269  ;;  %v163_v54 = vmul.f32 %v161_v49, %v154_v52 }
 0x210   :  { %v165_v55 = vmul.f32 %v270_v53, %v162_v51 }
 0x211   :  { %271 = vrsqrt.f32 %v163_v54  ;;  %vm183_vm6 = vcmp.eq.f32.partialorder %v163_v54, inf  ;;  %v186_v8 = vand.u32 2147483648, %v163_v54  ;;  %vm185_vm7 = vcmp.eq.f32.partialorder %v163_v54, 0.0 }
 0x212   :  { %v166_v56 = vmul.f32 %v270_v53, %v165_v55 }
 0x214   :  { %v167_v57 = vmul.f32 0.5, %v166_v56 }
 0x216   :  { %v168_v58 = vsub.f32 1.5, %v167_v57 }
 0x217   :  { %v272_v59 = vpop.eup %271 }
 0x218   :  { %v169_v60 = vmul.f32 %v270_v53, %v168_v58  ;;  %v177_v61 = vmul.f32 %v272_v59, %v163_v54 }
 0x21a   :  { %v170_v62 = vmul.f32 %v169_v60, %v162_v51  ;;  %v178_v63 = vmul.f32 %v272_v59, %v177_v61 }
 0x21c   :  { %v172_v1 = vsel %vm171_vm4, %v162_v51, %v170_v62  ;;  %v179_v2 = vmul.f32 0.5, %v178_v63 }
 0x21d   :  { %v175_v3 = vsel %vm173_vm5, %v174_v0, %v172_v1 }
 0x21e   :  { %v180_v4 = vsub.f32 1.5, %v179_v2  ;;  %v188_v5 = vadd.f32 1e-12, %v175_v3 }
 0x220   :  { %v181_v6 = vmul.f32 %v272_v59, %v180_v4  ;;  %273 = vrcp.f32 %v188_v5 }
 0x222   :  { %v182_v7 = vmul.f32 %v181_v6, %v163_v54 }
 0x224   :  { %v184_v9 = vsel %vm183_vm6, %v163_v54, %v182_v7 }
 0x225   :  { %v187_v10 = vsel %vm185_vm7, %v186_v8, %v184_v9 }
 0x226   :  { %v274_v12 = vpop.eup %273  ;;  %v189_v13 = vadd.f32 1e-12, %v187_v10 }
 0x227   :  { %v192_v14 = vmul.f32 %v274_v12, %v145_v35 }
 0x228   :  { %275 = vrcp.f32 %v189_v13 }
 0x229   :  { %v197_v16 = vmul.f32 %v263_v11, %v192_v14 }
 0x22b   :  { %v202_v17 = vadd.f32 %v264_v15, %v197_v16 }
 0x22d   :  { %204 = vst.msk [vmem:[#allocation2] sm:$0xff] %vm51_vm0, %v202_v17 }
 0x22e   :  { %v276_v18 = vpop.eup %275 }
 0x22f   :  { %v193_v19 = vmul.f32 %v276_v18, %v146_v40 }
 0x231   :  { %v198_v20 = vmul.f32 %v263_v11, %v193_v19 }
 0x233   :  { %v203_v21 = vadd.f32 %v264_v15, %v198_v20 }
 0x235   :  { %205 = vst.msk [vmem:[#allocation2 + $0x8] sm:$0xff] %vm51_vm0, %v203_v21 }
 0x236   :  { %218 = dma.vmem_to_hbm [thread:$0]  %s211_s21, 256, %s213_s5, [#allocation3], %s306_s6, %s306_s6, %s307_s24  }
 0x237   :  { %301 = dma.done.wait [#allocation3], 256  }
 0x238   :  { %302 = vsyncadd [#allocation3], 4294967040 }
 0x239   :  { %223 = vsyncpa [#allocation3], 1 }

// kernel: encoder_forward.8
= control target key start
LH: loop header
LB: loop body
LE: loop exit
PB: predicated region body
PF: predicated region fallthrough
CT: control target
= control target key end

     0   :  { %12 = vsyncpa [#allocation3], 0  ;;  %s2792_s0 = inlined_call_operand.vmem [shape: f32[2,8,32], index: 0, kind: input, shape index: {}]   ;;  %s2793_s1 = inlined_call_operand.vmem [shape: bf16[32,96], index: 1, kind: input, shape index: {}]   ;;  %s2794_s2 = inlined_call_operand.vmem [shape: f32[1,96], index: 2, kind: input, shape index: {}]   ;;  %s2795_s3 = inlined_call_operand.hbm [shape: bf16[32,32], index: 3, kind: input, shape index: {}]   ;;  %s2796_s4 = inlined_call_operand.hbm [shape: f32[1,32], index: 4, kind: input, shape index: {}]   ;;  %s2797_s5 = inlined_call_operand.vmem [shape: f32[1,32], index: 5, kind: input, shape index: {}]   ;;  %s2798_s6 = inlined_call_operand.hbm [shape: f32[1,32], index: 6, kind: input, shape index: {}]   ;;  %s2799_s7 = inlined_call_operand.vmem [shape: f32[2,8,32], index: 7, kind: output, shape index: {}]  }
   0x1   :  { %13 = vsyncpa [#allocation5], 0  ;;  %s2443_s24 = smov 0  }
   0x2 LB: > { %s234_s27 = sshll.u32 %s2796_s4, 4  ;;  %s2452_s28 = sadd.s32 4294967295, %s2384_s24   ;;  %s2384_s24 = sphi %s2443_s24, %s19_s24   ;;  %s235_s27 = int_to_ptr.hbm [resolvable:$true] %s234_s27 }
   0x3   : > { %p2071_p0 = scmp.ge.s32.totalorder %s2384_s24, 1  ;;  %p202_p1 = scmp.lt.s32.totalorder %s2384_s24, 3 }
   0x4   : > { %p2136_p2 = scmp.eq.s32.totalorder %s2452_s28, 0  ;;  %s2386_s30 = smov [#allocation4]  }
   0x5   : > { %p2457_p3 = pnand %p2071_p0, %p202_p1  ;;  %s236_s8 = sshll.u32 %s2386_s30, 4  ;;  %s237_s8 = int_to_ptr.vmem [resolvable:$true] %s236_s8 }
   0x6   : > { %s219_s11 = sshll.u32 %s2795_s3, 4  ;;  %s2387_s12 = smov [#allocation2]   ;;  %s220_s11 = int_to_ptr.hbm [resolvable:$true] %s219_s11 }
   0x7   : > { %p2126_p4 = pneg %p2457_p3  ;;  %s221_s13 = sshll.u32 %s2387_s12, 4  ;;  %s222_s13 = int_to_ptr.vmem [resolvable:$true] %s221_s13 }
   0x8   : > { %s249_s16 = sshll.u32 %s2798_s6, 4  ;;  %s2388_s17 = smov 64   ;;  %s250_s16 = int_to_ptr.hbm [resolvable:$true] %s249_s16 }
   0x9   : > { %p2127_p5 = pnand %p2136_p2, %p2126_p4  ;;  %s2389_s18 = smov 4  }
   0xa   : > { %s2390_s19 = smov [#allocation6]   ;;  %271 = sbr.rel (%p2457_p3) target bundleno = 2378 (0x94a), region = 48 }
   0xb   : > { %2132 = dma.hbm_to_vmem [thread:$0]  (!%p2127_p5), %s235_s27, 16, %s237_s8, [#allocation5]  }
   0xc   : > { %2129 = dma.hbm_to_vmem [thread:$0]  (!%p2127_p5), %s220_s11, 256, %s222_s13, [#allocation3], %s2388_s17, %s2388_s17, %s2389_s18  }
   0xd   : > { %s251_s20 = sshll.u32 %s2390_s19, 4  ;;  %s252_s20 = int_to_ptr.vmem [resolvable:$true] %s251_s20 }
   0xe   : > { %2135 = dma.hbm_to_vmem [thread:$0]  (!%p2127_p5), %s250_s16, 16, %s252_s20, [#allocation5]  }
   0xf   : > { %2375 = dma.done.wait (%p2136_p2), [#allocation3], 256  }
  0x10   : > { %2377 = vsyncadd (%p2136_p2), [#allocation3], 4294967040 }
  0x11   : > { %2379 = dma.done.wait (%p2136_p2), [#allocation5], 32  }
  0x12   : > { %2381 = vsyncadd (%p2136_p2), [#allocation5], 4294967264  ;;  %p312_p6 = scmp.lt.s32.totalorder %s2452_s28, 1  ;;  %v2111_v0 = vld [vmem:[%s2793_s1 + $0x8] sm:$0xff]  ;;  %v2110_v1 = vld [vmem:[%s2793_s1] sm:$0xff]  ;;  %vm343_vm0 = vcmask 261120  }
  0x13   : > { %353 = vmatpush.bf16.msra.mxu0 %v2111_v0  ;;  %v2251_v4 = vld [vmem:[%s2794_s2] ss:$0 sm:$0xff]  ;;  %s2391_s10 = smov 112   ;;  %s2392_s11 = smov 120   ;;  %v2395_v16 = vmov 1983009808  }
  0x14   : > { %s2802_s28 = smov (!%p312_p6, %s2452_s28), 1  ;;  %s2393_s12 = smov 104   ;;  %v376_v17 = vunpack.c.l.s4 %v2395_v16  ;;  %vm371_vm1 = vcmask 1047556   ;;  %v2396_v24 = vmov 1934713408   ;;  %vm1048_vm2 = vcmask 1043456  }
  0x15   : > { %s2080_s21 = sshll.u32 %s2802_s28, 3  ;;  %s2394_s13 = smov 96   ;;  %v400_v25 = vunpack.c.l.s4 %v2396_v24  ;;  %vm1044_vm3 = vcmask 64512   ;;  %vm1893_vm4 = vcmask 130048   ;;  %vm1895_vm5 = vcmask 195584  }
  0x16   : > { %s2491_s25 = scalar_lea.vmem %s2792_s0, %s2080_s21  ;;  %v2525_v23 = vunpack.c.0.s8 %v376_v17  ;;  %s2397_s14 = smov 64  }
  0x17   : > { %v321_v2 = vld [vmem:[%s2491_s25] sm:$0xff]  ;;  %354 = vmatpush.bf16.msra.mxu0 %v2110_v1  ;;  %v2535_v37 = vunpack.c.0.s8 %v400_v25  ;;  %s2398_s15 = smov 24   ;;  %s2399_s16 = smov 16  }
  0x18   : > { %v322_v3 = vpack.c.bf16 %v321_v2, %v321_v2  ;;  %s2400_s17 = smov 8   ;;  %s319_s23 = scalar_lea.vmem %s2799_s7, %s2080_s21 }
  0x1a   : > { %2090 = vmatmul.msk.bf16.vlgmr.msra.gmra.mxu0 %vm343_vm0, %v322_v3 }
  0x97   : > { %v356_v5 = vpop.f32.mrf.mxu0 }
  0x98   : > { %v2504_v6 = vadd.f32 %v2251_v4, %v356_v5 }
  0x9a   : > { %364 = vrot.lane.b32.xlu1 %v2504_v6, %s2391_s10  ;;  %361 = vrot.lane.b32.xlu0 %v2504_v6, %s2392_s11 }
  0x9f   : > { %v358_v7 = vpop.f32.mrf.mxu0 }
  0xa2   : > { %367 = vrot.lane.b32.xlu0 %v2504_v6, %s2393_s12 }
 0x10c   : > { %v2509_v8 = vpop.permute.xlu0 %361  ;;  %v2516_v10 = vpop.permute.xlu1 %364 }
 0x10d   : > { %v2513_v9 = vpack.i.bf16 %v2504_v6, %v2509_v8 }
 0x10f   : > { %2170 = vrot.lane.b32.xlu1 %v2513_v9, %s2394_s13 }
 0x114   : > { %v2518_v11 = vpop.permute.xlu0 %367 }
 0x115   : > { %v2522_v12 = vpack.i.bf16 %v2516_v10, %v2518_v11 }
 0x117   : > { %2175 = vrot.lane.b32.xlu2 %v2522_v12, %s2394_s13 }
 0x171   : > { %v2176_v13 = vpop.permute.xlu2 %2175 }
 0x172   : > { %v2178_v14 = vunpack.i.h.bf16 %v2176_v13  ;;  %v2177_v15 = vunpack.i.l.bf16 %v2176_v13 }
 0x174   : > { %v439_v19 = vrot.slane %v2178_v14, 4  ;;  %v451_v20 = vrot.slane %v2177_v15, 4 }
 0x181   : > { %v2171_v18 = vpop.permute.xlu1 %2170 }
 0x182   : > { %v2173_v21 = vunpack.i.h.bf16 %v2171_v18  ;;  %v2172_v22 = vunpack.i.l.bf16 %v2171_v18 }
 0x184   : > { %v441_v26 = vrot.slane %v2173_v21, 4  ;;  %v440_v27 = vsel %vm371_vm1, %v439_v19, %v2173_v21  ;;  %v452_v28 = vsel %vm371_vm1, %v451_v20, %v2172_v22  ;;  %v453_v29 = vrot.slane %v2172_v22, 4 }
 0x185   : > { %v458_v30 = vperm.slane %v452_v28, %v2525_v23  ;;  %v446_v33 = vperm.slane %v440_v27, %v2525_v23 }
 0x186   : > { %v442_v31 = vsel %vm371_vm1, %v2178_v14, %v441_v26  ;;  %v454_v32 = vsel %vm371_vm1, %v2177_v15, %v453_v29 }
 0x187   : > { %v450_v34 = vperm.slane %v442_v31, %v2525_v23  ;;  %v462_v35 = vperm.slane %v454_v32, %v2525_v23  ;;  %v463_v36 = vrot.slane %v458_v30, 4  ;;  %v465_v52 = vrot.slane %v446_v33, 4 }
 0x189   : > { %v475_v38 = vrot.slane %v462_v35, 4  ;;  %v477_v39 = vrot.slane %v450_v34, 4  ;;  %v464_v40 = vsel %vm371_vm1, %v463_v36, %v446_v33  ;;  %v466_v59 = vsel %vm371_vm1, %v458_v30, %v465_v52 }
 0x18a   : > { %v470_v41 = vperm.slane %v464_v40, %v2535_v37  ;;  %v474_v60 = vperm.slane %v466_v59, %v2535_v37 }
 0x18b   : > { %v478_v42 = vsel %vm371_vm1, %v462_v35, %v477_v39  ;;  %v476_v43 = vsel %vm371_vm1, %v475_v38, %v450_v34 }
 0x18c   : > { %v487_v44 = vrot.slane %v470_v41, 4  ;;  %v486_v45 = vperm.slane %v478_v42, %v2535_v37  ;;  %v482_v46 = vperm.slane %v476_v43, %v2535_v37  ;;  %v579_v50 = vpack.c.bf16 %v470_v41, %v470_v41 }
 0x18d   : > { %v489_v61 = vrot.slane %v474_v60, 4  ;;  %v581_v63 = vpack.c.bf16 %v474_v60, %v474_v60 }
 0x18e   : > { %v488_v47 = vsel %vm371_vm1, 0.0, %v487_v44  ;;  %v493_v48 = vrot.slane %v486_v45, 4  ;;  %v491_v49 = vrot.slane %v482_v46, 4  ;;  %v585_v55 = vpack.c.bf16 %v486_v45, %v486_v45 }
 0x18f   : > { %v580_v51 = vpack.c.bf16 %v488_v47, %v488_v47  ;;  %v583_v58 = vpack.c.bf16 %v482_v46, %v482_v46  ;;  %v490_v62 = vsel %vm371_vm1, 0.0, %v489_v61 }
 0x190   : > { %v494_v53 = vsel %vm371_vm1, 0.0, %v493_v48  ;;  %v492_v54 = vsel %vm371_vm1, 0.0, %v491_v49  ;;  %v582_v0 = vpack.c.bf16 %v490_v62, %v490_v62 }
 0x191   : > { %2185 = vxpose.binary.xlu0.c.b16.start.end [1/2] (short) (narrow) %v580_v51, %v579_v50, 16  ;;  %v586_v56 = vpack.c.bf16 %v494_v53, %v494_v53  ;;  %v584_v57 = vpack.c.bf16 %v492_v54, %v492_v54 }
 0x193   : > { %2179 = vxpose.binary.xlu1.c.b16.start.end [1/2] (short) (narrow) %v586_v56, %v585_v55, 16 }
 0x194   : > { %2182 = vxpose.binary.xlu2.c.b16.start.end [1/2] (short) (narrow) %v584_v57, %v583_v58, 16 }
 0x1a4   : > { %2188 = vxpose.binary.xlu2.c.b16.start.end [1/2] (short) (narrow) %v582_v0, %v581_v63, 16  ;;  %v373_v0 = vrot.slane %v2504_v6, 4 }
 0x20d   : > { %2195 = vrot.lane.b32.xlu2 %v2513_v9, %s2397_s14 }
 0x235   : > { %v2183_v1 = vpop.trf.xlu2 }
 0x236   : > { %v776_v5 = vrot.slane %v2183_v1, 4  ;;  %v370_v1 = vrot.slane %v2516_v10, 4 }
 0x23d   : > { %v2184_v2 = vpop.trf.xlu2  ;;  %v2186_v3 = vpop.trf.xlu0 }
 0x23e   : > { %v777_v13 = vsel %vm371_vm1, %v776_v5, %v2186_v3  ;;  %v804_v16 = vrot.slane %v2184_v2, 4  ;;  %v374_v2 = vsel %vm371_vm1, %v2516_v10, %v373_v0  ;;  %v385_v3 = vrot.slane %v2509_v8, 4 }
 0x23f   : > { %v2180_v4 = vpop.trf.xlu1  ;;  %v781_v18 = vperm.slane %v777_v13, %v2525_v23  ;;  %v372_v13 = vsel %vm371_vm1, %v370_v1, %v2504_v6 }
 0x240   : > { %v782_v7 = vrot.slane %v2180_v4, 4  ;;  %v383_v4 = vrot.slane %v2518_v11, 4  ;;  %v386_v5 = vsel %vm371_vm1, %v2518_v11, %v385_v3 }
 0x241   : > { %v790_v24 = vrot.slane %v781_v18, 4 }
 0x245   : > { %v2189_v14 = vpop.trf.xlu2  ;;  %v2187_v15 = vpop.trf.xlu0 }
 0x246   : > { %v783_v17 = vsel %vm371_vm1, %v782_v7, %v2189_v14  ;;  %v805_v9 = vsel %vm371_vm1, %v804_v16, %v2187_v15  ;;  %v382_v7 = vperm.slane %v374_v2, %v2525_v23  ;;  %v384_v14 = vsel %vm371_vm1, %v383_v4, %v2509_v8 }
 0x247   : > { %v787_v19 = vperm.slane %v783_v17, %v2525_v23  ;;  %v2181_v20 = vpop.trf.xlu1  ;;  %v809_v26 = vperm.slane %v805_v9, %v2525_v23  ;;  %v378_v15 = vperm.slane %v372_v13, %v2525_v23  ;;  %v390_v16 = vperm.slane %v384_v14, %v2525_v23 }
 0x248   : > { %v810_v22 = vrot.slane %v2181_v20, 4  ;;  %v409_v10 = vrot.slane %v382_v7, 4 }
 0x249   : > { %v788_v21 = vrot.slane %v787_v19, 4  ;;  %v791_v27 = vsel %vm371_vm1, %v787_v19, %v790_v24  ;;  %v818_v31 = vrot.slane %v809_v26, 4  ;;  %v397_v19 = vrot.slane %v378_v15, 4 }
 0x24a   : > { %v799_v33 = vperm.slane %v791_v27, %v2535_v37  ;;  %v395_v20 = vrot.slane %v390_v16, 4 }
 0x24b   : > { %v789_v25 = vsel %vm371_vm1, %v788_v21, %v781_v18  ;;  %v398_v9 = vsel %vm371_vm1, %v390_v16, %v397_v19 }
 0x24c   : > { %v795_v29 = vperm.slane %v789_v25, %v2535_v37  ;;  %v852_v40 = vshrl.u32 %v799_v33, 16  ;;  %v802_v57 = vrot.slane %v799_v33, 4  ;;  %v406_v21 = vperm.slane %v398_v9, %v2535_v37 }
 0x24d   : > { %v2190_v28 = vpop.trf.xlu2  ;;  %v396_v24 = vsel %vm371_vm1, %v395_v20, %v378_v15 }
 0x24e   : > { %v811_v30 = vsel %vm371_vm1, %v810_v22, %v2190_v28  ;;  %v800_v36 = vrot.slane %v795_v29, 4  ;;  %v836_v43 = vshrl.u32 %v795_v29, 16  ;;  %v803_v59 = vsel %vm371_vm1, 0, %v802_v57 }
 0x24f   : > { %v815_v32 = vperm.slane %v811_v30, %v2525_v23  ;;  %v860_v61 = vshrl.u32 %v803_v59, 16  ;;  %v421_v27 = vrot.slane %v406_v21, 4 }
 0x250   : > { %v801_v44 = vsel %vm371_vm1, 0, %v800_v36 }
 0x251   : > { %v816_v34 = vrot.slane %v815_v32, 4  ;;  %v819_v35 = vsel %vm371_vm1, %v815_v32, %v818_v31  ;;  %v844_v52 = vshrl.u32 %v801_v44, 16 }
 0x252   : > { %v827_v38 = vperm.slane %v819_v35, %v2535_v37 }
 0x253   : > { %v817_v39 = vsel %vm371_vm1, %v816_v34, %v809_v26  ;;  %v402_v26 = vperm.slane %v396_v24, %v2535_v37  ;;  %v422_v34 = vsel %vm371_vm1, 0.0, %v421_v27 }
 0x254   : > { %v853_v41 = vshrl.u32 %v827_v38, 16  ;;  %v823_v42 = vperm.slane %v817_v39, %v2535_v37  ;;  %v850_v45 = vpack.i.b16 %v827_v38, %v799_v33  ;;  %v830_v56 = vrot.slane %v827_v38, 4 }
 0x255   : > { %v419_v31 = vrot.slane %v402_v26, 4 }
 0x256   : > { %v854_v46 = vpack.i.b16 %v853_v41, %v852_v40  ;;  %v837_v47 = vshrl.u32 %v823_v42, 16  ;;  %v828_v48 = vrot.slane %v823_v42, 4  ;;  %v834_v49 = vpack.i.b16 %v823_v42, %v795_v29 }
 0x257   : > { %v831_v58 = vsel %vm371_vm1, 0, %v830_v56  ;;  %v566_v40 = vmul.f32 0.35355338, %v422_v34  ;;  %v420_v41 = vsel %vm371_vm1, 0.0, %v419_v31  ;;  %v565_v42 = vmul.f32 0.35355338, %v406_v21 }
 0x258   : > { %2199 = vxpose.binary.xlu0.c.b16.start.end [1/2] (short) (narrow) %v854_v46, %v850_v45, 16  ;;  %v838_v50 = vpack.i.b16 %v837_v47, %v836_v43  ;;  %v829_v51 = vsel %vm371_vm1, 0, %v828_v48  ;;  %v861_v60 = vshrl.u32 %v831_v58, 16  ;;  %v858_v62 = vpack.i.b16 %v831_v58, %v803_v59 }
 0x259   : > { %v845_v53 = vshrl.u32 %v829_v51, 16  ;;  %v842_v54 = vpack.i.b16 %v829_v51, %v801_v44  ;;  %v564_v47 = vmul.f32 0.35355338, %v420_v41  ;;  %v574_v48 = vpack.c.bf16 %v566_v40, %v566_v40 }
 0x25a   : > { %2191 = vxpose.binary.xlu1.c.b16.start.end [1/2] (short) (narrow) %v838_v50, %v834_v49, 16  ;;  %v862_v63 = vpack.i.b16 %v861_v60, %v860_v61  ;;  %v573_v50 = vpack.c.bf16 %v565_v42, %v565_v42 }
 0x25b   : > { %v846_v55 = vpack.i.b16 %v845_v53, %v844_v52  ;;  %v572_v57 = vpack.c.bf16 %v564_v47, %v564_v47 }
 0x25d   : > { %2202 = vxpose.binary.xlu2.c.b16.start.end [1/2] (short) (narrow) %v846_v55, %v842_v54, 16  ;;  %v563_v54 = vmul.f32 0.35355338, %v402_v26 }
 0x267   : > { %v2599_v33 = vpop.permute.xlu2 %2195 }
 0x268   : > { %2205 = vxpose.binary.xlu0.c.b16.start.end [1/2] (short) (narrow) %v862_v63, %v858_v62, 16  ;;  %v571_v62 = vpack.c.bf16 %v563_v54, %v563_v54 }
 0x2d6   : > { %2209 = vrot.lane.b32.xlu0 %v2522_v12, %s2397_s14  ;;  %v394_v12 = vperm.slane %v386_v5, %v2525_v23 }
 0x2d8   : > { %v407_v17 = vrot.slane %v394_v12, 4  ;;  %v410_v18 = vsel %vm371_vm1, %v394_v12, %v409_v10 }
 0x2d9   : > { %v418_v11 = vperm.slane %v410_v18, %v2535_v37 }
 0x2da   : > { %v408_v6 = vsel %vm371_vm1, %v407_v17, %v382_v7 }
 0x2db   : > { %v414_v8 = vperm.slane %v408_v6, %v2535_v37  ;;  %v425_v22 = vrot.slane %v418_v11, 4  ;;  %v569_v35 = vmul.f32 0.35355338, %v418_v11 }
 0x2dd   : > { %v423_v28 = vrot.slane %v414_v8, 4  ;;  %v426_v29 = vsel %vm371_vm1, 0.0, %v425_v22  ;;  %v567_v43 = vmul.f32 0.35355338, %v414_v8  ;;  %v577_v44 = vpack.c.bf16 %v569_v35, %v569_v35 }
 0x2de   : > { %v570_v30 = vmul.f32 0.35355338, %v426_v29 }
 0x2df   : > { %v424_v32 = vsel %vm371_vm1, 0.0, %v423_v28  ;;  %v575_v51 = vpack.c.bf16 %v567_v43, %v567_v43  ;;  %v602_v52 = vrot.slane %v577_v44, 4 }
 0x2e0   : > { %v568_v36 = vmul.f32 0.35355338, %v424_v32  ;;  %v578_v38 = vpack.c.bf16 %v570_v30, %v570_v30 }
 0x2e1   : > { %v595_v61 = vrot.slane %v575_v51, 4  ;;  %v603_v63 = vsel %vm371_vm1, %v602_v52, %v573_v50 }
 0x2e2   : > { %v576_v45 = vpack.c.bf16 %v568_v36, %v568_v36  ;;  %v622_v46 = vrot.slane %v578_v38, 4  ;;  %v607_v5 = vperm.slane %v603_v63, %v2525_v23  ;;  %v2197_v63 = vunpack.i.l.bf16 %v2599_v33 }
 0x2e3   : > { %v597_v12 = vsel %vm371_vm1, %v595_v61, %v571_v62  ;;  %v2198_v62 = vunpack.i.h.bf16 %v2599_v33 }
 0x2e4   : > { %v616_v58 = vrot.slane %v576_v45, 4  ;;  %v623_v59 = vsel %vm371_vm1, %v622_v46, %v574_v48  ;;  %v601_v20 = vperm.slane %v597_v12, %v2525_v23  ;;  %v608_v9 = vrot.slane %v607_v5, 4 }
 0x2e5   : > { %v627_v2 = vperm.slane %v623_v59, %v2525_v23 }
 0x2e6   : > { %v617_v4 = vsel %vm371_vm1, %v616_v58, %v572_v57 }
 0x2e7   : > { %v621_v10 = vperm.slane %v617_v4, %v2525_v23  ;;  %v628_v16 = vrot.slane %v627_v2, 4  ;;  %v521_v2 = vrot.slane %v2197_v63, 4 }
 0x2e9   : > { %v629_v22 = vsel %vm371_vm1, %v628_v16, %v621_v10 }
 0x2ea   : > { %v633_v28 = vperm.slane %v629_v22, %v2535_v37 }
 0x2ec   : > { %v634_v35 = vrot.slane %v633_v28, 4  ;;  %v640_v45 = vshrl.u32 %v633_v28, 16 }
 0x2ee   : > { %v635_v52 = vsel %vm371_vm1, 0, %v634_v35 }
 0x2ef   : > { %v646_v59 = vshrl.u32 %v635_v52, 16 }
 0x2fe   : > { %v2203_v49 = vpop.trf.xlu2 }
 0x304   : > { %v2200_v25 = vpop.trf.xlu0 }
 0x305   : > { %v992_v55 = vrot.slane %v2200_v25, 4  ;;  %v609_v25 = vsel %vm371_vm1, %v608_v9, %v601_v20 }
 0x306   : > { %v2192_v53 = vpop.trf.xlu1  ;;  %v2204_v15 = vpop.trf.xlu2  ;;  %v613_v31 = vperm.slane %v609_v25, %v2535_v37 }
 0x307   : > { %v993_v0 = vsel %vm371_vm1, %v992_v55, %v2192_v53 }
 0x308   : > { %v997_v7 = vperm.slane %v993_v0, %v2525_v23  ;;  %v614_v41 = vrot.slane %v613_v31, 4  ;;  %v638_v50 = vpack.i.b16 %v633_v28, %v613_v31  ;;  %v639_v51 = vshrl.u32 %v613_v31, 16 }
 0x30a   : > { %v641_v55 = vpack.i.b16 %v640_v45, %v639_v51 }
 0x30c   : > { %v2201_v39 = vpop.trf.xlu0 }
 0x30d   : > { %v1012_v14 = vrot.slane %v2201_v39, 4 }
 0x30e   : > { %v2193_v17 = vpop.trf.xlu1 }
 0x30f   : > { %v1013_v6 = vsel %vm371_vm1, %v1012_v14, %v2193_v17 }
 0x310   : > { %v1017_v26 = vperm.slane %v1013_v6, %v2525_v23 }
 0x314   : > { %v2206_v56 = vpop.trf.xlu0 }
 0x315   : > { %v998_v60 = vrot.slane %v2206_v56, 4  ;;  %v615_v56 = vsel %vm371_vm1, 0, %v614_v41 }
 0x316   : > { %v644_v58 = vpack.i.b16 %v635_v52, %v615_v56 }
 0x317   : > { %v999_v1 = vsel %vm371_vm1, %v998_v60, %v2203_v49  ;;  %v645_v60 = vshrl.u32 %v615_v56, 16 }
 0x318   : > { %v1003_v3 = vperm.slane %v999_v1, %v2525_v23  ;;  %v509_v1 = vrot.slane %v2198_v62, 4 }
 0x319   : > { %v647_v61 = vpack.i.b16 %v646_v59, %v645_v60 }
 0x31a   : > { %v1004_v13 = vrot.slane %v1003_v3, 4 }
 0x31c   : > { %v2207_v18 = vpop.trf.xlu0  ;;  %v1005_v19 = vsel %vm371_vm1, %v1004_v13, %v997_v7 }
 0x31d   : > { %v1018_v11 = vrot.slane %v2207_v18, 4  ;;  %v1009_v8 = vperm.slane %v1005_v19, %v2535_v37 }
 0x31f   : > { %v1019_v21 = vsel %vm371_vm1, %v1018_v11, %v2204_v15  ;;  %v1010_v29 = vrot.slane %v1009_v8, 4  ;;  %v1035_v34 = vshrl.u32 %v1009_v8, 16 }
 0x320   : > { %v1023_v24 = vperm.slane %v1019_v21, %v2525_v23 }
 0x321   : > { %v1011_v39 = vsel %vm371_vm1, 0, %v1010_v29 }
 0x322   : > { %v1024_v27 = vrot.slane %v1023_v24, 4  ;;  %v1041_v47 = vshrl.u32 %v1011_v39, 16 }
 0x324   : > { %v1025_v30 = vsel %vm371_vm1, %v1024_v27, %v1017_v26 }
 0x325   : > { %v1029_v32 = vperm.slane %v1025_v30, %v2535_v37 }
 0x327   : > { %v1034_v36 = vpack.i.b16 %v1029_v32, %v1009_v8  ;;  %v1036_v38 = vshrl.u32 %v1029_v32, 16  ;;  %v1030_v40 = vrot.slane %v1029_v32, 4 }
 0x329   : > { %v1050_v42 = vsel %vm1048_vm2, %v1034_v36, 0  ;;  %v1037_v43 = vpack.i.b16 %v1036_v38, %v1035_v34  ;;  %v1031_v44 = vsel %vm371_vm1, 0, %v1030_v40 }
 0x32a   : > { %1059 = vmatpush.bf16.msra.mxu1 %v1050_v42  ;;  %v1040_v46 = vpack.i.b16 %v1031_v44, %v1011_v39  ;;  %v1042_v48 = vshrl.u32 %v1031_v44, 16 }
 0x32b   : > { %v1069_v49 = vsel %vm1048_vm2, %v1037_v43, 0 }
 0x32c   : > { %1078 = vmatpush.bf16.msra.mxu2 %v1069_v49  ;;  %v1088_v53 = vsel %vm1048_vm2, %v1040_v46, 0  ;;  %v1043_v54 = vpack.i.b16 %v1042_v48, %v1041_v47 }
 0x32d   : > { %2091 = vmatmul.msk.bf16.vlgmr.msra.gmra.mxu1 %vm1044_vm3, %v638_v50  ;;  %1097 = vmatpush.bf16.msra.mxu3 %v1088_v53 }
 0x32e   : > { %v1107_v57 = vsel %vm1048_vm2, %v1043_v54, 0 }
 0x32f   : > { %2092 = vmatmul.msk.bf16.vlgmr.msra.gmra.mxu2 %vm1044_vm3, %v641_v55  ;;  %1116 = vmatpush.bf16.msrb.mxu1 %v1107_v57 }
 0x330   : > { %2093 = vmatmul.msk.bf16.vlgmr.msra.gmra.mxu3 %vm1044_vm3, %v644_v58 }
 0x33d   : > { %2094 = vmatmul.msk.bf16.vlgmr.msrb.gmra.mxu1 %vm1044_vm3, %v647_v61 }
 0x348   : > { %v2210_v0 = vpop.permute.xlu0 %2209 }
 0x349   : > { %v2212_v3 = vunpack.i.h.bf16 %v2210_v0  ;;  %v2211_v4 = vunpack.i.l.bf16 %v2210_v0 }
 0x34b   : > { %v507_v5 = vrot.slane %v2212_v3, 4  ;;  %v510_v7 = vsel %vm371_vm1, %v2212_v3, %v509_v1  ;;  %v519_v13 = vrot.slane %v2211_v4, 4  ;;  %v522_v12 = vsel %vm371_vm1, %v2211_v4, %v521_v2 }
 0x34c   : > { %v518_v14 = vperm.slane %v510_v7, %v2525_v23  ;;  %v530_v15 = vperm.slane %v522_v12, %v2525_v23 }
 0x34d   : > { %v508_v10 = vsel %vm371_vm1, %v507_v5, %v2198_v62  ;;  %v520_v16 = vsel %vm371_vm1, %v519_v13, %v2197_v63 }
 0x34e   : > { %v545_v33 = vrot.slane %v518_v14, 4  ;;  %v526_v17 = vperm.slane %v520_v16, %v2525_v23  ;;  %v543_v18 = vrot.slane %v530_v15, 4  ;;  %v514_v19 = vperm.slane %v508_v10, %v2525_v23 }
 0x350   : > { %v531_v11 = vrot.slane %v526_v17, 4  ;;  %v544_v20 = vsel %vm371_vm1, %v543_v18, %v518_v14  ;;  %v546_v9 = vsel %vm371_vm1, %v530_v15, %v545_v33  ;;  %v533_v24 = vrot.slane %v514_v19, 4 }
 0x351   : > { %v550_v6 = vperm.slane %v544_v20, %v2535_v37  ;;  %v554_v52 = vperm.slane %v546_v9, %v2535_v37 }
 0x352   : > { %v532_v21 = vsel %vm371_vm1, %v531_v11, %v514_v19  ;;  %v534_v32 = vsel %vm371_vm1, %v526_v17, %v533_v24 }
 0x353   : > { %v559_v8 = vrot.slane %v550_v6, 4  ;;  %v538_v22 = vperm.slane %v532_v21, %v2535_v37  ;;  %v591_v27 = vpack.c.bf16 %v550_v6, %v550_v6  ;;  %v542_v34 = vperm.slane %v534_v32, %v2535_v37 }
 0x354   : > { %v561_v53 = vrot.slane %v554_v52, 4  ;;  %v593_v55 = vpack.c.bf16 %v554_v52, %v554_v52 }
 0x355   : > { %v560_v25 = vsel %vm371_vm1, 0.0, %v559_v8  ;;  %v555_v26 = vrot.slane %v538_v22, 4  ;;  %v587_v30 = vpack.c.bf16 %v538_v22, %v538_v22  ;;  %v557_v35 = vrot.slane %v542_v34, 4 }
 0x356   : > { %v592_v28 = vpack.c.bf16 %v560_v25, %v560_v25  ;;  %v589_v38 = vpack.c.bf16 %v542_v34, %v542_v34  ;;  %v562_v54 = vsel %vm371_vm1, 0.0, %v561_v53 }
 0x357   : > { %v556_v29 = vsel %vm371_vm1, 0.0, %v555_v26  ;;  %v558_v36 = vsel %vm371_vm1, 0.0, %v557_v35  ;;  %v594_v56 = vpack.c.bf16 %v562_v54, %v562_v54 }
 0x358   : > { %2213 = vxpose.binary.xlu0.c.b16.start.end [1/2] (short) (narrow) %v592_v28, %v591_v27, 16  ;;  %v588_v31 = vpack.c.bf16 %v556_v29, %v556_v29  ;;  %v590_v39 = vpack.c.bf16 %v558_v36, %v558_v36 }
 0x35a   : > { %2216 = vxpose.binary.xlu1.c.b16.start.end [1/2] (short) (narrow) %v588_v31, %v587_v30, 16 }
 0x368   : > { %2222 = vxpose.binary.xlu0.c.b16.start.end [1/2] (short) (narrow) %v590_v39, %v589_v38, 16 }
 0x3aa   : > { %v2659_v40 = vpop.f32.mrf.mxu1 }
 0x3ab   : > { %v1122_v45 = vsel %vm1044_vm3, %v2659_v40, -inf }
 0x3b2   : > { %v1063_v41 = vpop.f32.mrf.mxu1  ;;  %v1080_v42 = vpop.f32.mrf.mxu2 }
 0x3b3   : > { %v1099_v43 = vpop.f32.mrf.mxu3  ;;  %v1125_v49 = vsel %vm1044_vm3, %v1080_v42, -inf }
 0x3b4   : > { %v1128_v44 = vsel %vm1044_vm3, %v1099_v43, -inf }
 0x3b5   : > { %1129 = vmax.xlane.f32.xlu2 %v1128_v44 }
 0x3ba   : > { %v1082_v46 = vpop.f32.mrf.mxu2  ;;  %1123 = vmax.xlane.f32.xlu1 %v1122_v45  ;;  %v1118_v47 = vpop.f32.mrf.mxu1 }
 0x3bb   : > { %v1101_v48 = vpop.f32.mrf.mxu3  ;;  %v1131_v51 = vsel %vm1044_vm3, %v1118_v47, -inf }
 0x3c2   : > { %1126 = vmax.xlane.f32.xlu1 %v1125_v49  ;;  %v1120_v50 = vpop.f32.mrf.mxu1 }
 0x3ca   : > { %1132 = vmax.xlane.f32.xlu1 %v1131_v51 }
 0x3de   : > { %2219 = vxpose.binary.xlu2.c.b16.start.end [1/2] (short) (narrow) %v594_v56, %v593_v55, 16 }
 0x404   : > { %v2214_v10 = vpop.trf.xlu0 }
 0x405   : > { %v1298_v33 = vrot.slane %v2214_v10, 4 }
 0x406   : > { %v2217_v57 = vpop.trf.xlu1 }
 0x407   : > { %v1299_v17 = vsel %vm371_vm1, %v1298_v33, %v2217_v57 }
 0x408   : > { %v1303_v19 = vperm.slane %v1299_v17, %v2525_v23 }
 0x40a   : > { %v1312_v21 = vrot.slane %v1303_v19, 4 }
 0x40c   : > { %v2215_v16 = vpop.trf.xlu0 }
 0x40d   : > { %v1326_v20 = vrot.slane %v2215_v16, 4 }
 0x40e   : > { %v2218_v58 = vpop.trf.xlu1 }
 0x40f   : > { %v1327_v22 = vsel %vm371_vm1, %v1326_v20, %v2218_v58 }
 0x410   : > { %v1331_v26 = vperm.slane %v1327_v22, %v2525_v23 }
 0x412   : > { %v1340_v35 = vrot.slane %v1331_v26, 4 }
 0x414   : > { %v2223_v18 = vpop.trf.xlu0 }
 0x41c   : > { %v2224_v30 = vpop.trf.xlu0 }
 0x428   : > { %v1130_v63 = vpop.xlane.xlu2 %1129 }
 0x429   : > { %v1136_v0 = vsub.f32 %v1099_v43, %v1130_v63 }
 0x42b   : > { %v1142_v5 = vmul.f32 1.442695, %v1136_v0 }
 0x42d   : > { %v2668_v59 = vpop.xlane.xlu1 %1123 }
 0x435   : > { %v1127_v60 = vpop.xlane.xlu1 %1126 }
 0x436   : > { %v1135_v61 = vsub.f32 %v1080_v42, %v1127_v60 }
 0x438   : > { %v1140_v62 = vmul.f32 1.442695, %v1135_v61 }
 0x43a   : > { %2255 = vpow2.f32 %v1140_v62 }
 0x43d   : > { %v1133_v1 = vpop.xlane.xlu1 %1132 }
 0x43e   : > { %v1137_v2 = vsub.f32 %v1118_v47, %v1133_v1 }
 0x440   : > { %v2670_v3 = vpop.eup %2255  ;;  %v1144_v4 = vmul.f32 1.442695, %v1137_v2 }
 0x441   : > { %v1149_v7 = vsel %vm1044_vm3, %v2670_v3, 0.0 }
 0x442   : > { %2257 = vpow2.f32 %v1144_v4  ;;  %1150 = vadd.xlane.f32.xlu1 %v1149_v7 }
 0x443   : > { %2259 = vpow2.f32 %v1142_v5 }
 0x448   : > { %v2674_v13 = vpop.eup %2257 }
 0x449   : > { %v1155_v12 = vsel %vm1044_vm3, %v2674_v13, 0.0  ;;  %v2678_v14 = vpop.eup %2259 }
 0x44a   : > { %1156 = vadd.xlane.f32.xlu1 %v1155_v12  ;;  %v1152_v15 = vsel %vm1044_vm3, %v2678_v14, 0.0 }
 0x44f   : > { %1153 = vadd.xlane.f32.xlu2 %v1152_v15 }
 0x47f   : > { %v2220_v11 = vpop.trf.xlu2 }
 0x480   : > { %v1304_v9 = vrot.slane %v2220_v11, 4 }
 0x482   : > { %v1305_v6 = vsel %vm371_vm1, %v1304_v9, %v2223_v18 }
 0x483   : > { %v1309_v8 = vperm.slane %v1305_v6, %v2525_v23 }
 0x485   : > { %v1310_v24 = vrot.slane %v1309_v8, 4  ;;  %v1313_v25 = vsel %vm371_vm1, %v1309_v8, %v1312_v21  ;;  %v1134_v8 = vsub.f32 %v2659_v40, %v2668_v59 }
 0x486   : > { %v1321_v28 = vperm.slane %v1313_v25, %v2535_v37 }
 0x487   : > { %v1311_v27 = vsel %vm371_vm1, %v1310_v24, %v1303_v19  ;;  %v2221_v29 = vpop.trf.xlu2  ;;  %v1138_v22 = vmul.f32 1.442695, %v1134_v8 }
 0x488   : > { %v1332_v31 = vrot.slane %v2221_v29, 4  ;;  %v2692_v32 = vperm.slane %v1311_v27, %v2535_v37  ;;  %v1324_v38 = vrot.slane %v1321_v28, 4  ;;  %v1374_v45 = vshrl.u32 %v1321_v28, 16 }
 0x48a   : > { %v1333_v34 = vsel %vm371_vm1, %v1332_v31, %v2224_v30  ;;  %v1322_v42 = vrot.slane %v2692_v32, 4  ;;  %v1325_v46 = vsel %vm371_vm1, 0, %v1324_v38  ;;  %v1358_v52 = vshrl.u32 %v2692_v32, 16 }
 0x48b   : > { %v1337_v36 = vperm.slane %v1333_v34, %v2525_v23  ;;  %v1382_v58 = vshrl.u32 %v1325_v46, 16 }
 0x48c   : > { %v1323_v51 = vsel %vm371_vm1, 0, %v1322_v42 }
 0x48d   : > { %v1338_v39 = vrot.slane %v1337_v36, 4  ;;  %v1341_v41 = vsel %vm371_vm1, %v1337_v36, %v1340_v35  ;;  %v1366_v63 = vshrl.u32 %v1323_v51, 16 }
 0x48e   : > { %v1349_v43 = vperm.slane %v1341_v41, %v2535_v37 }
 0x48f   : > { %v1339_v44 = vsel %vm371_vm1, %v1338_v39, %v1331_v26 }
 0x490   : > { %v1345_v47 = vperm.slane %v1339_v44, %v2535_v37  ;;  %v1372_v48 = vpack.i.b16 %v1349_v43, %v1321_v28  ;;  %v1375_v49 = vshrl.u32 %v1349_v43, 16  ;;  %v1352_v50 = vrot.slane %v1349_v43, 4 }
 0x492   : > { %v1376_v53 = vpack.i.b16 %v1375_v49, %v1374_v45  ;;  %v1353_v54 = vsel %vm371_vm1, 0, %v1352_v50  ;;  %v1350_v55 = vrot.slane %v1345_v47, 4  ;;  %v1356_v56 = vpack.i.b16 %v1345_v47, %v2692_v32 }
 0x493   : > { %v1380_v57 = vpack.i.b16 %v1353_v54, %v1325_v46  ;;  %v1383_v60 = vshrl.u32 %v1353_v54, 16  ;;  %v1359_v61 = vshrl.u32 %v1345_v47, 16 }
 0x494   : > { %2231 = vxpose.binary.xlu2.c.b16.start.end [1/2] (short) (narrow) %v1376_v53, %v1372_v48, 16  ;;  %v1351_v62 = vsel %vm371_vm1, 0, %v1350_v55 }
 0x495   : > { %v1384_v0 = vpack.i.b16 %v1383_v60, %v1382_v58  ;;  %v1364_v1 = vpack.i.b16 %v1351_v62, %v1323_v51  ;;  %v1367_v2 = vshrl.u32 %v1351_v62, 16  ;;  %v1360_v4 = vpack.i.b16 %v1359_v61, %v1358_v52 }
 0x497   : > { %2225 = vxpose.binary.xlu0.c.b16.start.end [1/2] (short) (narrow) %v1384_v0, %v1380_v57, 16  ;;  %v1368_v5 = vpack.i.b16 %v1367_v2, %v1366_v63 }
 0x499   : > { %2228 = vxpose.binary.xlu1.c.b16.start.end [1/2] (short) (narrow) %v1368_v5, %v1364_v1, 16 }
 0x4b5   : > { %v1151_v7 = vpop.xlane.xlu1 %1150 }
 0x4b6   : > { %2261 = vrcp.f32 %v1151_v7 }
 0x4bc   : > { %v2262_v12 = vpop.eup %2261 }
 0x4bd   : > { %v1157_v15 = vpop.xlane.xlu1 %1156  ;;  %v1163_v10 = vmul.f32 %v2262_v12, %v2670_v3 }
 0x4be   : > { %2263 = vrcp.f32 %v1157_v15 }
 0x4bf   : > { %v1167_v16 = vpack.c.bf16 %v1163_v10, %v1163_v10 }
 0x4c1   : > { %v1589_v33 = vsel %vm1044_vm3, %v1167_v16, 0 }
 0x4c2   : > { %1598 = vmatpush.bf16.xpose.msrb.mxu3 %v1589_v33  ;;  %v1154_v17 = vpop.xlane.xlu2 %1153 }
 0x4c3   : > { %2265 = vrcp.f32 %v1154_v17 }
 0x4c4   : > { %v2264_v18 = vpop.eup %2263  ;;  %2267 = vpow2.f32 %v1138_v22 }
 0x4c5   : > { %v1165_v19 = vmul.f32 %v2264_v18, %v2674_v13 }
 0x4c7   : > { %v1169_v11 = vpack.c.bf16 %v1165_v19, %v1165_v19 }
 0x4c9   : > { %v2266_v20 = vpop.eup %2265  ;;  %v1627_v9 = vsel %vm1044_vm3, %v1169_v11, 0 }
 0x4ca   : > { %1636 = vmatpush.bf16.xpose.msra.mxu1 %v1627_v9  ;;  %v1164_v6 = vmul.f32 %v2266_v20, %v2678_v14  ;;  %v2268_v24 = vpop.eup %2267 }
 0x4cb   : > { %v1146_v25 = vsel %vm1044_vm3, %v2268_v24, 0.0 }
 0x4cc   : > { %v1168_v21 = vpack.c.bf16 %v1164_v6, %v1164_v6 }
 0x4ce   : > { %v1608_v3 = vsel %vm1044_vm3, %v1168_v21, 0 }
 0x4cf   : > { %1617 = vmatpush.bf16.xpose.msrb.mxu0 %v1608_v3 }
 0x508   : > { %1147 = vadd.xlane.f32.xlu0 %v1146_v25 }
 0x531   : > { %2234 = vxpose.binary.xlu0.c.b16.start.end [1/2] (short) (narrow) %v1360_v4, %v1356_v56, 16 }
 0x535   : > { %v2232_v40 = vpop.trf.xlu2 }
 0x536   : > { %v1514_v34 = vrot.slane %v2232_v40, 4 }
 0x53d   : > { %v2233_v44 = vpop.trf.xlu2 }
 0x53e   : > { %v1534_v47 = vrot.slane %v2233_v44, 4 }
 0x543   : > { %v2226_v13 = vpop.trf.xlu0 }
 0x544   : > { %v1520_v32 = vrot.slane %v2226_v13, 4 }
 0x545   : > { %v2229_v31 = vpop.trf.xlu1 }
 0x546   : > { %v1521_v59 = vsel %vm371_vm1, %v1520_v32, %v2229_v31 }
 0x547   : > { %v1525_v35 = vperm.slane %v1521_v59, %v2525_v23 }
 0x549   : > { %v1526_v42 = vrot.slane %v1525_v35, 4 }
 0x54b   : > { %v2227_v26 = vpop.trf.xlu0 }
 0x54c   : > { %v1540_v36 = vrot.slane %v2227_v26, 4 }
 0x54d   : > { %v2230_v38 = vpop.trf.xlu1 }
 0x54e   : > { %v1541_v45 = vsel %vm371_vm1, %v1540_v36, %v2230_v38 }
 0x54f   : > { %v1545_v48 = vperm.slane %v1541_v45, %v2525_v23 }
 0x551   : > { %v1546_v52 = vrot.slane %v1545_v48, 4 }
 0x57b   : > { %v1148_v27 = vpop.xlane.xlu0 %1147 }
 0x57c   : > { %2269 = vrcp.f32 %v1148_v27 }
 0x582   : > { %v2270_v28 = vpop.eup %2269 }
 0x583   : > { %v1162_v14 = vmul.f32 %v2270_v28, %v2268_v24 }
 0x585   : > { %v1166_v29 = vpack.c.bf16 %v1162_v14, %v1162_v14 }
 0x587   : > { %v1570_v30 = vsel %vm1044_vm3, %v1166_v29, 0 }
 0x588   : > { %1579 = vmatpush.bf16.xpose.msrb.mxu2 %v1570_v30 }
 0x5dd   : > { %v2235_v39 = vpop.trf.xlu0 }
 0x5de   : > { %v1515_v41 = vsel %vm371_vm1, %v1514_v34, %v2235_v39 }
 0x5df   : > { %v1519_v43 = vperm.slane %v1515_v41, %v2525_v23 }
 0x5e1   : > { %v1527_v46 = vsel %vm371_vm1, %v1526_v42, %v1519_v43 }
 0x5e2   : > { %v1531_v49 = vperm.slane %v1527_v46, %v2535_v37 }
 0x5e4   : > { %v1532_v54 = vrot.slane %v1531_v49, 4  ;;  %v1557_v57 = vshrl.u32 %v1531_v49, 16 }
 0x5e5   : > { %v2236_v50 = vpop.trf.xlu0 }
 0x5e6   : > { %v1535_v51 = vsel %vm371_vm1, %v1534_v47, %v2236_v50  ;;  %v1533_v61 = vsel %vm371_vm1, 0, %v1532_v54 }
 0x5e7   : > { %v1539_v53 = vperm.slane %v1535_v51, %v2525_v23  ;;  %v1563_v2 = vshrl.u32 %v1533_v61, 16 }
 0x5e9   : > { %v1547_v55 = vsel %vm371_vm1, %v1546_v52, %v1539_v53 }
 0x5ea   : > { %v1551_v56 = vperm.slane %v1547_v55, %v2535_v37 }
 0x5ec   : > { %v1556_v58 = vpack.i.b16 %v1551_v56, %v1531_v49  ;;  %v1558_v60 = vshrl.u32 %v1551_v56, 16  ;;  %v1552_v62 = vrot.slane %v1551_v56, 4 }
 0x5ee   : > { %2095 = vmatmul.msk.bf16.vlgmr.msrb.gmra.mxu2 %vm1044_vm3, %v1556_v58  ;;  %v1559_v63 = vpack.i.b16 %v1558_v60, %v1557_v57  ;;  %v1553_v0 = vsel %vm371_vm1, 0, %v1552_v62 }
 0x5ef   : > { %v1562_v1 = vpack.i.b16 %v1553_v0, %v1533_v61  ;;  %v1564_v4 = vshrl.u32 %v1553_v0, 16 }
 0x5f0   : > { %2096 = vmatmul.msk.bf16.vlgmr.msrb.gmra.mxu3 %vm1044_vm3, %v1559_v63 }
 0x5f1   : > { %v1565_v5 = vpack.i.b16 %v1564_v4, %v1563_v2  ;;  %2097 = vmatmul.msk.bf16.vlgmr.msrb.gmra.mxu0 %vm1044_vm3, %v1562_v1 }
 0x5f3   : > { %2098 = vmatmul.msk.bf16.vlgmr.msra.gmra.mxu1 %vm1044_vm3, %v1565_v5 }
 0x66e   : > { %v1619_v7 = vpop.f32.mrf.mxu0 }
 0x670   : > { %v1638_v12 = vpop.f32.mrf.mxu1 }
 0x671   : > { %v1581_v15 = vpop.f32.mrf.mxu2 }
 0x672   : > { %v2237_v10 = vpack.i.bf16 %v1581_v15, %v1619_v7 }
 0x673   : > { %v1600_v16 = vpop.f32.mrf.mxu3 }
 0x674   : > { %v2244_v33 = vpack.i.bf16 %v1600_v16, %v1638_v12  ;;  %2238 = vxpose.xlu0.b32.start.end [1/1] (short) (narrow) %v2237_v10, 8 }
 0x676   : > { %v1621_v17 = vpop.f32.mrf.mxu0  ;;  %2245 = vxpose.xlu1.b32.start.end [1/1] (short) (narrow) %v2244_v33, 8 }
 0x678   : > { %v1640_v18 = vpop.f32.mrf.mxu1 }
 0x679   : > { %v1583_v19 = vpop.f32.mrf.mxu2 }
 0x67b   : > { %v1602_v11 = vpop.f32.mrf.mxu3 }
 0x718   : > { %v2239_v20 = vpop.trf.xlu0 }
 0x719   : > { %v2243_v9 = vunpack.i.h.bf16 %v2239_v20  ;;  %v2240_v6 = vunpack.i.l.bf16 %v2239_v20 }
 0x71a   : > { %v2246_v21 = vpop.trf.xlu1 }
 0x71b   : > { %v1772_v3 = vrot.slane %v2243_v9, 4  ;;  %v1770_v8 = vrot.slane %v2240_v6, 4  ;;  %v2250_v22 = vunpack.i.h.bf16 %v2246_v21  ;;  %v2247_v24 = vunpack.i.l.bf16 %v2246_v21 }
 0x71d   : > { %v1771_v25 = vsel %vm371_vm1, %v1770_v8, %v2243_v9  ;;  %v1773_v13 = vsel %vm371_vm1, %v2240_v6, %v1772_v3  ;;  %v1784_v26 = vrot.slane %v2250_v22, 4  ;;  %v1782_v14 = vrot.slane %v2247_v24, 4  ;;  %v2113_v8 = vld [vmem:[#allocation2 + $0x8] sm:$0xff] }
 0x71e   : > { %v1777_v27 = vperm.slane %v1771_v25, %v2525_v23  ;;  %v1781_v28 = vperm.slane %v1773_v13, %v2525_v23  ;;  %1927 = vmatpush.bf16.msra.mxu2 %v2113_v8 }
 0x71f   : > { %v1785_v29 = vsel %vm371_vm1, %v2247_v24, %v1784_v26  ;;  %v1783_v32 = vsel %vm371_vm1, %v1782_v14, %v2250_v22  ;;  %v2252_v14 = vld [vmem:[#allocation4] ss:$0 sm:$0xff] }
 0x720   : > { %v1796_v30 = vrot.slane %v1777_v27, 4  ;;  %v1808_v31 = vrot.slane %v1781_v28, 4  ;;  %v1793_v40 = vperm.slane %v1785_v29, %v2525_v23  ;;  %v1789_v59 = vperm.slane %v1783_v32, %v2525_v23 }
 0x722   : > { %v1806_v34 = vrot.slane %v1793_v40, 4  ;;  %v1809_v35 = vsel %vm371_vm1, %v1793_v40, %v1808_v31  ;;  %v1794_v36 = vrot.slane %v1789_v59, 4  ;;  %v1797_v38 = vsel %vm371_vm1, %v1789_v59, %v1796_v30  ;;  %v2279_v31 = vld [vmem:[%s2491_s25] sm:$0xff] }
 0x723   : > { %v1817_v39 = vperm.slane %v1809_v35, %v2535_v37  ;;  %v1805_v41 = vperm.slane %v1797_v38, %v2535_v37 }
 0x724   : > { %v1807_v42 = vsel %vm371_vm1, %v1806_v34, %v1781_v28  ;;  %v1795_v43 = vsel %vm371_vm1, %v1794_v36, %v1777_v27  ;;  %v2401_v34 = vmov 32.0  }
 0x725   : > { %v1813_v44 = vperm.slane %v1807_v42, %v2535_v37  ;;  %v1824_v45 = vrot.slane %v1817_v39, 4  ;;  %v1801_v46 = vperm.slane %v1795_v43, %v2535_v37  ;;  %v1820_v47 = vrot.slane %v1805_v41, 4 }
 0x726   : > { %2271 = vrcp.f32 %v2401_v34 }
 0x727   : > { %v1822_v48 = vrot.slane %v1813_v44, 4  ;;  %v1825_v49 = vsel %vm371_vm1, 0.0, %v1824_v45  ;;  %v1837_v50 = vsel %vm371_vm1, %v1824_v45, %v1813_v44  ;;  %v1821_v51 = vsel %vm371_vm1, 0.0, %v1820_v47 }
 0x728   : > { %v1818_v52 = vrot.slane %v1801_v46, 4  ;;  %v1826_v53 = vsel %vm371_vm1, %v1820_v47, %v1801_v46  ;;  %v1841_v54 = vperm.slane %v1837_v50, %v2525_v23  ;;  %v1831_v57 = vrot.slane %v1821_v51, 4 }
 0x729   : > { %v1823_v55 = vsel %vm371_vm1, 0.0, %v1822_v48  ;;  %v1830_v56 = vperm.slane %v1826_v53, %v2525_v23  ;;  %v1842_v58 = vrot.slane %v1825_v49, 4  ;;  %v2402_v48 = vmov 31.0  }
 0x72a   : > { %v1819_v60 = vsel %vm371_vm1, 0.0, %v1818_v52  ;;  %v1862_v61 = vrot.slane %v1841_v54, 4  ;;  %2273 = vrcp.f32 %v2402_v48 }
 0x72b   : > { %v1832_v62 = vsel %vm371_vm1, %v1831_v57, %v1819_v60  ;;  %v1843_v63 = vsel %vm371_vm1, %v1842_v58, %v1823_v55  ;;  %v1850_v0 = vrot.slane %v1830_v56, 4 }
 0x72c   : > { %v1836_v1 = vperm.slane %v1832_v62, %v2525_v23  ;;  %v1847_v2 = vperm.slane %v1843_v63, %v2525_v23  ;;  %v2272_v35 = vpop.eup %2271 }
 0x72d   : > { %v1941_v36 = vmul.f32 32.0, %v2272_v35  ;;  %vm1945_vm6 = vweird.f32 %v2272_v35 }
 0x72e   : > { %v1851_v4 = vsel %vm371_vm1, %v1836_v1, %v1850_v0  ;;  %v1863_v5 = vsel %vm371_vm1, %v1847_v2, %v1862_v61  ;;  %v1848_v7 = vrot.slane %v1836_v1, 4  ;;  %v1860_v12 = vrot.slane %v1847_v2, 4 }
 0x72f   : > { %v1859_v15 = vperm.slane %v1851_v4, %v2535_v37  ;;  %v1871_v10 = vperm.slane %v1863_v5, %v2535_v37  ;;  %v1942_v38 = vsub.f32 1.0, %v1941_v36 }
 0x730   : > { %v1849_v16 = vsel %vm371_vm1, %v1848_v7, %v1830_v56  ;;  %v1861_v33 = vsel %vm371_vm1, %v1860_v12, %v1841_v54  ;;  %v2274_v49 = vpop.eup %2273  ;;  %v2253_v7 = vld [vmem:[%s2797_s5] ss:$0 sm:$0xff] }
 0x731   : > { %v1878_v17 = vrot.slane %v1859_v15, 4  ;;  %v1876_v18 = vrot.slane %v1871_v10, 4  ;;  %v1855_v19 = vperm.slane %v1849_v16, %v2535_v37  ;;  %v1867_v23 = vperm.slane %v1861_v33, %v2535_v37  ;;  %v2112_v37 = vld [vmem:[#allocation2] sm:$0xff] }
 0x732   : > { %1928 = vmatpush.bf16.msra.mxu2 %v2112_v37  ;;  %v1943_v39 = vmul.f32 %v2272_v35, %v1942_v38  ;;  %v1954_v50 = vmul.f32 31.0, %v2274_v49  ;;  %vm1958_vm7 = vweird.f32 %v2274_v49 }
 0x733   : > { %v1879_v11 = vsel %vm371_vm1, %v1871_v10, %v1878_v17  ;;  %v1877_v20 = vsel %vm371_vm1, %v1876_v18, %v1859_v15  ;;  %v1872_v9 = vrot.slane %v1867_v23, 4  ;;  %v1874_v6 = vrot.slane %v1855_v19, 4  ;;  %v2254_v15 = vld [vmem:[#allocation6] ss:$0 sm:$0xff] }
 0x734   : > { %1889 = vrot.lane.b32.xlu1 %v1879_v11, %s2398_s15  ;;  %1885 = vrot.lane.b32.xlu0 %v1877_v20, %s2399_s16  ;;  %v1944_v41 = vadd.f32 %v2272_v35, %v1943_v39  ;;  %v1955_v51 = vsub.f32 1.0, %v1954_v50 }
 0x735   : > { %v1875_v21 = vsel %vm371_vm1, %v1867_v23, %v1874_v6  ;;  %v1873_v3 = vsel %vm371_vm1, %v1872_v9, %v1855_v19 }
 0x736   : > { %1881 = vrot.lane.b32.xlu2 %v1875_v21, %s2400_s17  ;;  %v1946_v42 = vsel %vm1945_vm6, %v2272_v35, %v1944_v41  ;;  %v1956_v52 = vmul.f32 %v2274_v49, %v1955_v51 }
 0x738   : > { %v1957_v53 = vadd.f32 %v2274_v49, %v1956_v52 }
 0x73a   : > { %v1959_v54 = vsel %vm1958_vm7, %v2274_v49, %v1957_v53 }
 0x790   : > { %v1882_v22 = vpop.permute.xlu2 %1881 }
 0x791   : > { %v1892_v24 = vsel %vm1044_vm3, %v1873_v3, %v1882_v22 }
 0x7a6   : > { %v1890_v25 = vpop.permute.xlu1 %1889  ;;  %v1886_v13 = vpop.permute.xlu0 %1885 }
 0x7a7   : > { %v1894_v26 = vsel %vm1893_vm4, %v1892_v24, %v1886_v13 }
 0x7a8   : > { %v1896_v27 = vsel %vm1895_vm5, %v1894_v26, %v1890_v25 }
 0x7a9   : > { %v1897_v28 = vpack.c.bf16 %v1896_v27, %v1896_v27 }
 0x7ab   : > { %2107 = vmatmul.msk.bf16.vlgmr.msra.gmra.mxu2 %vm343_vm0, %v1897_v28 }
 0x82e   : > { %v1930_v29 = vpop.f32.mrf.mxu2 }
 0x82f   : > { %v1931_v30 = vadd.f32 %v2252_v14, %v1930_v29 }
 0x831   : > { %v1934_v32 = vadd.f32 %v2279_v31, %v1931_v30 }
 0x833   : > { %v1937_v40 = vsel %vm343_vm0, %v1934_v32, 0.0 }
 0x834   : > { %1938 = vadd.xlane.f32.xlu1 %v1937_v40 }
 0x836   : > { %v1932_v59 = vpop.f32.mrf.mxu2 }
 0x8a7   : > { %v1939_v43 = vpop.xlane.xlu1 %1938 }
 0x8a8   : > { %v1947_v44 = vmul.f32 %v1946_v42, %v1939_v43 }
 0x8aa   : > { %v1948_v45 = vsub.f32 %v1934_v32, %v1947_v44 }
 0x8ac   : > { %v1949_v46 = vmul.f32 %v1948_v45, %v1948_v45 }
 0x8ae   : > { %v1950_v47 = vsel %vm343_vm0, %v1949_v46, 0.0 }
 0x8af   : > { %1951 = vadd.xlane.f32.xlu2 %v1950_v47 }
 0x922   : > { %v1952_v55 = vpop.xlane.xlu2 %1951 }
 0x923   : > { %v1960_v56 = vmul.f32 %v1959_v54, %v1952_v55 }
 0x925   : > { %2275 = vrsqrt.f32 %v1960_v56  ;;  %vm1968_vm8 = vcmp.eq.f32.partialorder %v1960_v56, inf  ;;  %v1971_v1 = vand.u32 2147483648, %v1960_v56  ;;  %vm1970_vm9 = vcmp.eq.f32.partialorder %v1960_v56, 0.0 }
 0x92b   : > { %v2276_v57 = vpop.eup %2275 }
 0x92c   : > { %v1962_v58 = vmul.f32 %v2276_v57, %v1960_v56 }
 0x92e   : > { %v1963_v60 = vmul.f32 %v2276_v57, %v1962_v58 }
 0x930   : > { %v1964_v61 = vmul.f32 0.5, %v1963_v60 }
 0x932   : > { %v1965_v62 = vsub.f32 1.5, %v1964_v61 }
 0x934   : > { %v1966_v63 = vmul.f32 %v2276_v57, %v1965_v62 }
 0x936   : > { %v1967_v0 = vmul.f32 %v1966_v63, %v1960_v56 }
 0x938   : > { %v1969_v2 = vsel %vm1968_vm8, %v1960_v56, %v1967_v0 }
 0x939   : > { %v1972_v4 = vsel %vm1970_vm9, %v1971_v1, %v1969_v2 }
 0x93a   : > { %v1973_v5 = vadd.f32 1e-12, %v1972_v4 }
 0x93c   : > { %2277 = vrcp.f32 %v1973_v5 }
 0x942   : > { %v2278_v12 = vpop.eup %2277 }
 0x943   : > { %v1975_v10 = vmul.f32 %v2278_v12, %v1948_v45 }
 0x945   : > { %v1979_v16 = vmul.f32 %v2253_v7, %v1975_v10 }
 0x947   : > { %v1983_v33 = vadd.f32 %v2254_v15, %v1979_v16 }
 0x949   : > { %1984 = vst.msk [vmem:[%s319_s23] sm:$0xff] %vm343_vm0, %v1983_v33 }
 0x94a PF: > { %s19_s24 = sadd.s32 1, %s2384_s24  }
 0x94b   : > { %p16_p7 = scmp.ge.s32.totalorder %s19_s24, 4  }
 0x94d   :  { %18 = sbr.rel (!%p16_p7) target bundleno = 2 (0x2), region = 91 }
 0x952   :  { %2004 = vsyncpa [#allocation3], 1 }
 0x953   :  { %2006 = vsyncpa [#allocation3 + $0x1], 1 }
 0x954   :  { %2007 = vsyncpa [#allocation5], 1 }

</bundles_post_ra>
